<compile_context>
chip_gen: v7x
topology: tpu7x:2x2x1
jax: 0.10.0
libtpu: 0.0.40
codegen_flags: <defaults>
</compile_context>

<pallas_src>
import functools

import jax
import jax.numpy as jnp
from jax.experimental import pallas as pl
from jax.experimental.pallas import tpu as pltpu


# ---------------------------------------------------------------------------
# Fused kernel: one grid step == one image.
# ---------------------------------------------------------------------------
def _lenet_fused_kernel(x_ref, w1_ref, b1_ref, w2_ref, b2_ref,
                        fc1_ref, fc1b_ref, fc2_ref, fc2b_ref,
                        fc3_ref, fc3b_ref, o_ref, a1_scr, s_scr,
                        *, K, W, H2, W2, R1, RS, R2):
    f32 = jnp.float32
    cin = x_ref.shape[2]
    c1 = b1_ref.shape[1]
    c2 = b2_ref.shape[1]

    # ---- conv1: K*K-step shift-and-accumulate (each step = one MXU matmul) ----
    # acc1 row p corresponds to conv1 output pixel (p // W, p % W); only the
    # rows feeding valid pooled pixels are ever consumed downstream.
    acc1 = jnp.zeros((R1, c1), f32)
    for ki in range(K):
        for kj in range(K):
            sh = ki * W + kj
            w_blk = w1_ref[(ki * K + kj) * cin:(ki * K + kj + 1) * cin, :]
            acc1 = acc1 + jnp.dot(x_ref[0, sh:sh + R1, :], w_blk,
                                  preferred_element_type=f32)
    a1_scr[...] = jnp.tanh(acc1 + b1_ref[...])            # conv1 + tanh (VMEM)

    # ---- avgpool 2x2 / stride 2, kept in the sparse (stride-W) row layout ----
    # pooled pixel (oh, ow) ends up at row 2*oh*W + 2*ow of s_scr.
    s_scr[...] = 0.25 * (a1_scr[0:RS, :] + a1_scr[1:RS + 1, :]
                         + a1_scr[W:RS + W, :] + a1_scr[W + 1:RS + W + 1, :])

    # ---- conv2: shift-and-accumulate over the sparse pooled layout ----
    acc2 = jnp.zeros((R2, c2), f32)
    for ki in range(K):
        for kj in range(K):
            sh = 2 * W * ki + 2 * kj
            w_blk = w2_ref[(ki * K + kj) * c1:(ki * K + kj + 1) * c1, :]
            acc2 = acc2 + jnp.dot(s_scr[sh:sh + R2, :], w_blk,
                                  preferred_element_type=f32)
    a3 = jnp.tanh(acc2 + b2_ref[...])    # valid rows live at 2*W*ho2 + 2*wo2

    # ---- MLP head (PyTorch NCHW flatten order folded into fc1 row blocks) ----
    h = fc1b_ref[...]
    for ho2 in range(H2):
        for wo2 in range(W2):
            s_idx = ho2 * W2 + wo2
            r = 2 * W * ho2 + 2 * wo2
            h = h + jnp.dot(a3[r:r + 1, :],
                            fc1_ref[s_idx * c2:(s_idx + 1) * c2, :],
                            preferred_element_type=f32)
    h = jnp.tanh(h)                                               # (1, 120)
    h = jnp.tanh(jnp.dot(h, fc2_ref[...], preferred_element_type=f32)
                 + fc2b_ref[...])                                 # (1, 84)
    o_ref[0] = (jnp.dot(h, fc3_ref[...], preferred_element_type=f32)
                + fc3b_ref[...]).astype(o_ref.dtype)              # (1, n_out)


# ---------------------------------------------------------------------------
# Wrapper: one-time weight layout prep + single pallas_call.
# ---------------------------------------------------------------------------
def cnn_forward_pallas(x, p):
    B, cin, H, W = x.shape
    cout1, _, K, _ = p["conv1_w"].shape          # 6, cin, 5, 5
    cout2 = p["conv2_w"].shape[0]                # 16
    d1 = p["fc1_w"].shape[1]
    d2 = p["fc2_w"].shape[1]
    n_out = p["fc3_w"].shape[1]

    H1, W1 = H - K + 1, W - K + 1                # conv1 output
    assert H1 % 2 == 0 and W1 % 2 == 0  # TODO(synk): odd-size AvgPool edge crop not handled
    Hp, Wp = H1 // 2, W1 // 2                    # pooled
    H2, W2 = Hp - K + 1, Wp - K + 1              # conv2 output

    # Row-count bounds for the slice-based shift-and-accumulate chain.
    R2 = 2 * W * (H2 - 1) + 2 * (W2 - 1) + 1     # conv2 accumulator rows
    RS = R2 + 2 * (W + 1) * (K - 1)              # pooled rows needed
    R1 = RS + W + 1                              # conv1 output rows needed
    assert R1 + (K - 1) * (W + 1) <= H * W       # conv1 slices stay in bounds

    # One-time weight/bias layout prep (weights only -- no per-activation glue).
    w1p = jnp.transpose(p["conv1_w"], (2, 3, 1, 0)).reshape(K * K * cin, cout1)
    w2p = jnp.transpose(p["conv2_w"], (2, 3, 1, 0)).reshape(K * K * cout1, cout2)
    b1r = p["conv1_b"].reshape(1, cout1)
    b2r = p["conv2_b"].reshape(1, cout2)
    # fc1 rows permuted so block s = ho2*W2+wo2 holds the weights of channel c
    # at flatten index c*(H2*W2) + s (PyTorch NCHW flatten order).
    fc1p = (p["fc1_w"].reshape(cout2, H2 * W2, d1)
            .transpose(1, 0, 2).reshape(H2 * W2 * cout2, d1))
    fc1b = p["fc1_b"].reshape(1, d1)
    fc2w, fc2b = p["fc2_w"], p["fc2_b"].reshape(1, d2)
    fc3w, fc3b = p["fc3_w"], p["fc3_b"].reshape(1, n_out)

    # Activations enter the kernel as (flattened spatial, channel) rows per image.
    x_rows = jnp.transpose(x, (0, 2, 3, 1)).reshape(B, H * W, cin)

    kernel = functools.partial(_lenet_fused_kernel, K=K, W=W, H2=H2, W2=W2,
                               R1=R1, RS=RS, R2=R2)
    out = pl.pallas_call(
        kernel,
        out_shape=jax.ShapeDtypeStruct((B, 1, n_out), jnp.float32),
        grid=(B,),
        in_specs=[
            pl.BlockSpec((1, H * W, cin), lambda b: (b, 0, 0)),
            pl.BlockSpec((K * K * cin, cout1), lambda b: (0, 0)),
            pl.BlockSpec((1, cout1), lambda b: (0, 0)),
            pl.BlockSpec((K * K * cout1, cout2), lambda b: (0, 0)),
            pl.BlockSpec((1, cout2), lambda b: (0, 0)),
            pl.BlockSpec((H2 * W2 * cout2, d1), lambda b: (0, 0)),
            pl.BlockSpec((1, d1), lambda b: (0, 0)),
            pl.BlockSpec((d1, d2), lambda b: (0, 0)),
            pl.BlockSpec((1, d2), lambda b: (0, 0)),
            pl.BlockSpec((d2, n_out), lambda b: (0, 0)),
            pl.BlockSpec((1, n_out), lambda b: (0, 0)),
        ],
        out_specs=pl.BlockSpec((1, 1, n_out), lambda b: (b, 0, 0)),
        scratch_shapes=[pltpu.VMEM((R1, cout1), jnp.float32),
                        pltpu.VMEM((RS, cout1), jnp.float32)],
        compiler_params=pltpu.CompilerParams(
            dimension_semantics=("parallel",)),
    )(x_rows, w1p, b1r, w2p, b2r, fc1p, fc1b, fc2w, fc2b, fc3w, fc3b)
    return out.reshape(B, n_out)


# ---------------------------------------------------------------------------
# Parameter initialization (deterministic, PyTorch-default-like uniform)
# ---------------------------------------------------------------------------
def init_params(key, input_dim, output_size):
    c_in, h, w = input_dim
    h1, w1 = h - 4, w - 4                 # after conv1 (k=5)
    h2, w2 = h1 // 2, w1 // 2             # after avgpool
    h3, w3 = h2 - 4, w2 - 4               # after conv2 (k=5)
    n_flatten = 16 * h3 * w3

    def uinit(k, shape, fan_in):
        bound = 1.0 / jnp.sqrt(fan_in)
        return jax.random.uniform(k, shape, jnp.float32, -bound, bound)

    ks = jax.random.split(key, 10)
    return dict(
        conv1_w=uinit(ks[0], (6, c_in, 5, 5), c_in * 25),
        conv1_b=uinit(ks[1], (6,), c_in * 25),
        conv2_w=uinit(ks[2], (16, 6, 5, 5), 6 * 25),
        conv2_b=uinit(ks[3], (16,), 6 * 25),
        fc1_w=uinit(ks[4], (n_flatten, 120), n_flatten),   # stored as (in, out)
        fc1_b=uinit(ks[5], (120,), n_flatten),
        fc2_w=uinit(ks[6], (120, 84), 120),
        fc2_b=uinit(ks[7], (84,), 120),
        fc3_w=uinit(ks[8], (84, output_size), 84),
        fc3_b=uinit(ks[9], (output_size,), 84),
    )


# ---------------------------------------------------------------------------
# Pure-JAX reference for the correctness check
# ---------------------------------------------------------------------------
def cnn_forward_reference(x, p):
    dn = ("NCHW", "OIHW", "NCHW")
    y = jax.lax.conv_general_dilated(x, p["conv1_w"], (1, 1), "VALID",
                                     dimension_numbers=dn)
    y = jnp.tanh(y + p["conv1_b"][None, :, None, None])
    B, C, H, W = y.shape
    y = y.reshape(B, C, H // 2, 2, W // 2, 2).mean(axis=(3, 5))
    y = jax.lax.conv_general_dilated(y, p["conv2_w"], (1, 1), "VALID",
                                     dimension_numbers=dn)
    y = jnp.tanh(y + p["conv2_b"][None, :, None, None])
    y = y.reshape(B, -1)
    y = jnp.tanh(y @ p["fc1_w"] + p["fc1_b"])
    y = jnp.tanh(y @ p["fc2_w"] + p["fc2_b"])
    return y @ p["fc3_w"] + p["fc3_b"]


if __name__ == "__main__":
    input_dim = (4, 16, 16)   # (C, H, W), consistent with nn.Conv2d(input_dim[0], ...)
    output_size = 10
    batch = 2

    key = jax.random.PRNGKey(0)
    k_params, k_x = jax.random.split(key)
    params = init_params(k_params, input_dim, output_size)
    x = jax.random.normal(k_x, (batch, *input_dim), dtype=jnp.float32)

    fwd = jax.jit(cnn_forward_pallas)
    out = jax.block_until_ready(fwd(x, params))
    ref = jax.block_until_ready(cnn_forward_reference(x, params))

    assert out.shape == (batch, output_size), out.shape
    assert jnp.allclose(out, ref, atol=1e-4, rtol=1e-4), (out, ref)
    print("KERNEL_OK")
</pallas_src>

<mosaic_0001>
module attributes {stable_mosaic.version = 11 : i64} {
  func.func @_lenet_fused_kernel(%arg0: i32, %arg1: memref<1x256x4xf32, #tpu.memory_space<vmem>>, %arg2: memref<100x6xf32, #tpu.memory_space<vmem>>, %arg3: memref<1x6xf32, #tpu.memory_space<vmem>>, %arg4: memref<150x16xf32, #tpu.memory_space<vmem>>, %arg5: memref<1x16xf32, #tpu.memory_space<vmem>>, %arg6: memref<64x120xf32, #tpu.memory_space<vmem>>, %arg7: memref<1x120xf32, #tpu.memory_space<vmem>>, %arg8: memref<120x84xf32, #tpu.memory_space<vmem>>, %arg9: memref<1x84xf32, #tpu.memory_space<vmem>>, %arg10: memref<84x10xf32, #tpu.memory_space<vmem>>, %arg11: memref<1x10xf32, #tpu.memory_space<vmem>>, %arg12: memref<1x1x10xf32, #tpu.memory_space<vmem>>, %arg13: memref<188x6xf32, #tpu.memory_space<vmem>>, %arg14: memref<171x6xf32, #tpu.memory_space<vmem>>) attributes {dimension_semantics = [#tpu.dimension_semantics<parallel>], iteration_bounds = array<i64: 2>, scalar_prefetch = 0 : i64, scratch_operands = 2 : i64, tpu.core_type = #tpu.core_type<tc>, window_params = [{transform_indices = @transform_0, window_bounds = array<i64: 1, 256, 4>}, {pipeline_mode = #tpu.pipeline_mode<synchronous>, transform_indices = @transform_1, window_bounds = array<i64: 100, 6>}, {pipeline_mode = #tpu.pipeline_mode<synchronous>, transform_indices = @transform_2, window_bounds = array<i64: 1, 6>}, {pipeline_mode = #tpu.pipeline_mode<synchronous>, transform_indices = @transform_3, window_bounds = array<i64: 150, 16>}, {pipeline_mode = #tpu.pipeline_mode<synchronous>, transform_indices = @transform_4, window_bounds = array<i64: 1, 16>}, {pipeline_mode = #tpu.pipeline_mode<synchronous>, transform_indices = @transform_5, window_bounds = array<i64: 64, 120>}, {pipeline_mode = #tpu.pipeline_mode<synchronous>, transform_indices = @transform_6, window_bounds = array<i64: 1, 120>}, {pipeline_mode = #tpu.pipeline_mode<synchronous>, transform_indices = @transform_7, window_bounds = array<i64: 120, 84>}, {pipeline_mode = #tpu.pipeline_mode<synchronous>, transform_indices = @transform_8, window_bounds = array<i64: 1, 84>}, {pipeline_mode = #tpu.pipeline_mode<synchronous>, transform_indices = @transform_9, window_bounds = array<i64: 84, 10>}, {pipeline_mode = #tpu.pipeline_mode<synchronous>, transform_indices = @transform_10, window_bounds = array<i64: 1, 10>}, {transform_indices = @transform_11, window_bounds = array<i64: 1, 1, 10>}]} {
    %cst = arith.constant 0.000000e+00 : f32
    %0 = vector.broadcast %cst : f32 to vector<188x6xf32>
    %c0 = arith.constant 0 : index
    %c0_0 = arith.constant 0 : index
    %1 = vector.load %arg2[%c0, %c0_0] : memref<100x6xf32, #tpu.memory_space<vmem>>, vector<4x6xf32>
    %c0_1 = arith.constant 0 : index
    %c0_2 = arith.constant 0 : index
    %c0_3 = arith.constant 0 : index
    %2 = vector.load %arg1[%c0_1, %c0_2, %c0_3] : memref<1x256x4xf32, #tpu.memory_space<vmem>>, vector<1x188x4xf32>
    %3 = vector.shape_cast %2 : vector<1x188x4xf32> to vector<188x4xf32>
    %cst_4 = arith.constant dense<0.000000e+00> : vector<188x6xf32>
    %4 = tpu.matmul %3, %1, %cst_4 {dimension_numbers = #tpu.dot_dimension_numbers<[1], [0], [0], [1], [0, 0, 1, 1], [], []>} : vector<188x4xf32>, vector<4x6xf32>, vector<188x6xf32> -> vector<188x6xf32>
    %5 = arith.addf %0, %4 : vector<188x6xf32>
    %c4 = arith.constant 4 : index
    %c0_5 = arith.constant 0 : index
    %6 = vector.load %arg2[%c4, %c0_5] : memref<100x6xf32, #tpu.memory_space<vmem>>, vector<4x6xf32>
    %c0_6 = arith.constant 0 : index
    %c1 = arith.constant 1 : index
    %c0_7 = arith.constant 0 : index
    %7 = vector.load %arg1[%c0_6, %c1, %c0_7] : memref<1x256x4xf32, #tpu.memory_space<vmem>>, vector<1x188x4xf32>
    %8 = vector.shape_cast %7 : vector<1x188x4xf32> to vector<188x4xf32>
    %cst_8 = arith.constant dense<0.000000e+00> : vector<188x6xf32>
    %9 = tpu.matmul %8, %6, %cst_8 {dimension_numbers = #tpu.dot_dimension_numbers<[1], [0], [0], [1], [0, 0, 1, 1], [], []>} : vector<188x4xf32>, vector<4x6xf32>, vector<188x6xf32> -> vector<188x6xf32>
    %10 = arith.addf %5, %9 : vector<188x6xf32>
    %c8 = arith.constant 8 : index
    %c0_9 = arith.constant 0 : index
    %11 = vector.load %arg2[%c8, %c0_9] : memref<100x6xf32, #tpu.memory_space<vmem>>, vector<4x6xf32>
    %c0_10 = arith.constant 0 : index
    %c2 = arith.constant 2 : index
    %c0_11 = arith.constant 0 : index
    %12 = vector.load %arg1[%c0_10, %c2, %c0_11] : memref<1x256x4xf32, #tpu.memory_space<vmem>>, vector<1x188x4xf32>
    %13 = vector.shape_cast %12 : vector<1x188x4xf32> to vector<188x4xf32>
    %cst_12 = arith.constant dense<0.000000e+00> : vector<188x6xf32>
    %14 = tpu.matmul %13, %11, %cst_12 {dimension_numbers = #tpu.dot_dimension_numbers<[1], [0], [0], [1], [0, 0, 1, 1], [], []>} : vector<188x4xf32>, vector<4x6xf32>, vector<188x6xf32> -> vector<188x6xf32>
    %15 = arith.addf %10, %14 : vector<188x6xf32>
    %c12 = arith.constant 12 : index
    %c0_13 = arith.constant 0 : index
    %16 = vector.load %arg2[%c12, %c0_13] : memref<100x6xf32, #tpu.memory_space<vmem>>, vector<4x6xf32>
    %c0_14 = arith.constant 0 : index
    %c3 = arith.constant 3 : index
    %c0_15 = arith.constant 0 : index
    %17 = vector.load %arg1[%c0_14, %c3, %c0_15] : memref<1x256x4xf32, #tpu.memory_space<vmem>>, vector<1x188x4xf32>
    %18 = vector.shape_cast %17 : vector<1x188x4xf32> to vector<188x4xf32>
    %cst_16 = arith.constant dense<0.000000e+00> : vector<188x6xf32>
    %19 = tpu.matmul %18, %16, %cst_16 {dimension_numbers = #tpu.dot_dimension_numbers<[1], [0], [0], [1], [0, 0, 1, 1], [], []>} : vector<188x4xf32>, vector<4x6xf32>, vector<188x6xf32> -> vector<188x6xf32>
    %20 = arith.addf %15, %19 : vector<188x6xf32>
    %c16 = arith.constant 16 : index
    %c0_17 = arith.constant 0 : index
    %21 = vector.load %arg2[%c16, %c0_17] : memref<100x6xf32, #tpu.memory_space<vmem>>, vector<4x6xf32>
    %c0_18 = arith.constant 0 : index
    %c4_19 = arith.constant 4 : index
    %c0_20 = arith.constant 0 : index
    %22 = vector.load %arg1[%c0_18, %c4_19, %c0_20] : memref<1x256x4xf32, #tpu.memory_space<vmem>>, vector<1x188x4xf32>
    %23 = vector.shape_cast %22 : vector<1x188x4xf32> to vector<188x4xf32>
    %cst_21 = arith.constant dense<0.000000e+00> : vector<188x6xf32>
    %24 = tpu.matmul %23, %21, %cst_21 {dimension_numbers = #tpu.dot_dimension_numbers<[1], [0], [0], [1], [0, 0, 1, 1], [], []>} : vector<188x4xf32>, vector<4x6xf32>, vector<188x6xf32> -> vector<188x6xf32>
    %25 = arith.addf %20, %24 : vector<188x6xf32>
    %c20 = arith.constant 20 : index
    %c0_22 = arith.constant 0 : index
    %26 = vector.load %arg2[%c20, %c0_22] : memref<100x6xf32, #tpu.memory_space<vmem>>, vector<4x6xf32>
    %c0_23 = arith.constant 0 : index
    %c16_24 = arith.constant 16 : index
    %c0_25 = arith.constant 0 : index
    %27 = vector.load %arg1[%c0_23, %c16_24, %c0_25] : memref<1x256x4xf32, #tpu.memory_space<vmem>>, vector<1x188x4xf32>
    %28 = vector.shape_cast %27 : vector<1x188x4xf32> to vector<188x4xf32>
    %cst_26 = arith.constant dense<0.000000e+00> : vector<188x6xf32>
    %29 = tpu.matmul %28, %26, %cst_26 {dimension_numbers = #tpu.dot_dimension_numbers<[1], [0], [0], [1], [0, 0, 1, 1], [], []>} : vector<188x4xf32>, vector<4x6xf32>, vector<188x6xf32> -> vector<188x6xf32>
    %30 = arith.addf %25, %29 : vector<188x6xf32>
    %c24 = arith.constant 24 : index
    %c0_27 = arith.constant 0 : index
    %31 = vector.load %arg2[%c24, %c0_27] : memref<100x6xf32, #tpu.memory_space<vmem>>, vector<4x6xf32>
    %c0_28 = arith.constant 0 : index
    %c17 = arith.constant 17 : index
    %c0_29 = arith.constant 0 : index
    %32 = vector.load %arg1[%c0_28, %c17, %c0_29] : memref<1x256x4xf32, #tpu.memory_space<vmem>>, vector<1x188x4xf32>
    %33 = vector.shape_cast %32 : vector<1x188x4xf32> to vector<188x4xf32>
    %cst_30 = arith.constant dense<0.000000e+00> : vector<188x6xf32>
    %34 = tpu.matmul %33, %31, %cst_30 {dimension_numbers = #tpu.dot_dimension_numbers<[1], [0], [0], [1], [0, 0, 1, 1], [], []>} : vector<188x4xf32>, vector<4x6xf32>, vector<188x6xf32> -> vector<188x6xf32>
    %35 = arith.addf %30, %34 : vector<188x6xf32>
    %c28 = arith.constant 28 : index
    %c0_31 = arith.constant 0 : index
    %36 = vector.load %arg2[%c28, %c0_31] : memref<100x6xf32, #tpu.memory_space<vmem>>, vector<4x6xf32>
    %c0_32 = arith.constant 0 : index
    %c18 = arith.constant 18 : index
    %c0_33 = arith.constant 0 : index
    %37 = vector.load %arg1[%c0_32, %c18, %c0_33] : memref<1x256x4xf32, #tpu.memory_space<vmem>>, vector<1x188x4xf32>
    %38 = vector.shape_cast %37 : vector<1x188x4xf32> to vector<188x4xf32>
    %cst_34 = arith.constant dense<0.000000e+00> : vector<188x6xf32>
    %39 = tpu.matmul %38, %36, %cst_34 {dimension_numbers = #tpu.dot_dimension_numbers<[1], [0], [0], [1], [0, 0, 1, 1], [], []>} : vector<188x4xf32>, vector<4x6xf32>, vector<188x6xf32> -> vector<188x6xf32>
    %40 = arith.addf %35, %39 : vector<188x6xf32>
    %c32 = arith.constant 32 : index
    %c0_35 = arith.constant 0 : index
    %41 = vector.load %arg2[%c32, %c0_35] : memref<100x6xf32, #tpu.memory_space<vmem>>, vector<4x6xf32>
    %c0_36 = arith.constant 0 : index
    %c19 = arith.constant 19 : index
    %c0_37 = arith.constant 0 : index
    %42 = vector.load %arg1[%c0_36, %c19, %c0_37] : memref<1x256x4xf32, #tpu.memory_space<vmem>>, vector<1x188x4xf32>
    %43 = vector.shape_cast %42 : vector<1x188x4xf32> to vector<188x4xf32>
    %cst_38 = arith.constant dense<0.000000e+00> : vector<188x6xf32>
    %44 = tpu.matmul %43, %41, %cst_38 {dimension_numbers = #tpu.dot_dimension_numbers<[1], [0], [0], [1], [0, 0, 1, 1], [], []>} : vector<188x4xf32>, vector<4x6xf32>, vector<188x6xf32> -> vector<188x6xf32>
    %45 = arith.addf %40, %44 : vector<188x6xf32>
    %c36 = arith.constant 36 : index
    %c0_39 = arith.constant 0 : index
    %46 = vector.load %arg2[%c36, %c0_39] : memref<100x6xf32, #tpu.memory_space<vmem>>, vector<4x6xf32>
    %c0_40 = arith.constant 0 : index
    %c20_41 = arith.constant 20 : index
    %c0_42 = arith.constant 0 : index
    %47 = vector.load %arg1[%c0_40, %c20_41, %c0_42] : memref<1x256x4xf32, #tpu.memory_space<vmem>>, vector<1x188x4xf32>
    %48 = vector.shape_cast %47 : vector<1x188x4xf32> to vector<188x4xf32>
    %cst_43 = arith.constant dense<0.000000e+00> : vector<188x6xf32>
    %49 = tpu.matmul %48, %46, %cst_43 {dimension_numbers = #tpu.dot_dimension_numbers<[1], [0], [0], [1], [0, 0, 1, 1], [], []>} : vector<188x4xf32>, vector<4x6xf32>, vector<188x6xf32> -> vector<188x6xf32>
    %50 = arith.addf %45, %49 : vector<188x6xf32>
    %c40 = arith.constant 40 : index
    %c0_44 = arith.constant 0 : index
    %51 = vector.load %arg2[%c40, %c0_44] : memref<100x6xf32, #tpu.memory_space<vmem>>, vector<4x6xf32>
    %c0_45 = arith.constant 0 : index
    %c32_46 = arith.constant 32 : index
    %c0_47 = arith.constant 0 : index
    %52 = vector.load %arg1[%c0_45, %c32_46, %c0_47] : memref<1x256x4xf32, #tpu.memory_space<vmem>>, vector<1x188x4xf32>
    %53 = vector.shape_cast %52 : vector<1x188x4xf32> to vector<188x4xf32>
    %cst_48 = arith.constant dense<0.000000e+00> : vector<188x6xf32>
    %54 = tpu.matmul %53, %51, %cst_48 {dimension_numbers = #tpu.dot_dimension_numbers<[1], [0], [0], [1], [0, 0, 1, 1], [], []>} : vector<188x4xf32>, vector<4x6xf32>, vector<188x6xf32> -> vector<188x6xf32>
    %55 = arith.addf %50, %54 : vector<188x6xf32>
    %c44 = arith.constant 44 : index
    %c0_49 = arith.constant 0 : index
    %56 = vector.load %arg2[%c44, %c0_49] : memref<100x6xf32, #tpu.memory_space<vmem>>, vector<4x6xf32>
    %c0_50 = arith.constant 0 : index
    %c33 = arith.constant 33 : index
    %c0_51 = arith.constant 0 : index
    %57 = vector.load %arg1[%c0_50, %c33, %c0_51] : memref<1x256x4xf32, #tpu.memory_space<vmem>>, vector<1x188x4xf32>
    %58 = vector.shape_cast %57 : vector<1x188x4xf32> to vector<188x4xf32>
    %cst_52 = arith.constant dense<0.000000e+00> : vector<188x6xf32>
    %59 = tpu.matmul %58, %56, %cst_52 {dimension_numbers = #tpu.dot_dimension_numbers<[1], [0], [0], [1], [0, 0, 1, 1], [], []>} : vector<188x4xf32>, vector<4x6xf32>, vector<188x6xf32> -> vector<188x6xf32>
    %60 = arith.addf %55, %59 : vector<188x6xf32>
    %c48 = arith.constant 48 : index
    %c0_53 = arith.constant 0 : index
    %61 = vector.load %arg2[%c48, %c0_53] : memref<100x6xf32, #tpu.memory_space<vmem>>, vector<4x6xf32>
    %c0_54 = arith.constant 0 : index
    %c34 = arith.constant 34 : index
    %c0_55 = arith.constant 0 : index
    %62 = vector.load %arg1[%c0_54, %c34, %c0_55] : memref<1x256x4xf32, #tpu.memory_space<vmem>>, vector<1x188x4xf32>
    %63 = vector.shape_cast %62 : vector<1x188x4xf32> to vector<188x4xf32>
    %cst_56 = arith.constant dense<0.000000e+00> : vector<188x6xf32>
    %64 = tpu.matmul %63, %61, %cst_56 {dimension_numbers = #tpu.dot_dimension_numbers<[1], [0], [0], [1], [0, 0, 1, 1], [], []>} : vector<188x4xf32>, vector<4x6xf32>, vector<188x6xf32> -> vector<188x6xf32>
    %65 = arith.addf %60, %64 : vector<188x6xf32>
    %c52 = arith.constant 52 : index
    %c0_57 = arith.constant 0 : index
    %66 = vector.load %arg2[%c52, %c0_57] : memref<100x6xf32, #tpu.memory_space<vmem>>, vector<4x6xf32>
    %c0_58 = arith.constant 0 : index
    %c35 = arith.constant 35 : index
    %c0_59 = arith.constant 0 : index
    %67 = vector.load %arg1[%c0_58, %c35, %c0_59] : memref<1x256x4xf32, #tpu.memory_space<vmem>>, vector<1x188x4xf32>
    %68 = vector.shape_cast %67 : vector<1x188x4xf32> to vector<188x4xf32>
    %cst_60 = arith.constant dense<0.000000e+00> : vector<188x6xf32>
    %69 = tpu.matmul %68, %66, %cst_60 {dimension_numbers = #tpu.dot_dimension_numbers<[1], [0], [0], [1], [0, 0, 1, 1], [], []>} : vector<188x4xf32>, vector<4x6xf32>, vector<188x6xf32> -> vector<188x6xf32>
    %70 = arith.addf %65, %69 : vector<188x6xf32>
    %c56 = arith.constant 56 : index
    %c0_61 = arith.constant 0 : index
    %71 = vector.load %arg2[%c56, %c0_61] : memref<100x6xf32, #tpu.memory_space<vmem>>, vector<4x6xf32>
    %c0_62 = arith.constant 0 : index
    %c36_63 = arith.constant 36 : index
    %c0_64 = arith.constant 0 : index
    %72 = vector.load %arg1[%c0_62, %c36_63, %c0_64] : memref<1x256x4xf32, #tpu.memory_space<vmem>>, vector<1x188x4xf32>
    %73 = vector.shape_cast %72 : vector<1x188x4xf32> to vector<188x4xf32>
    %cst_65 = arith.constant dense<0.000000e+00> : vector<188x6xf32>
    %74 = tpu.matmul %73, %71, %cst_65 {dimension_numbers = #tpu.dot_dimension_numbers<[1], [0], [0], [1], [0, 0, 1, 1], [], []>} : vector<188x4xf32>, vector<4x6xf32>, vector<188x6xf32> -> vector<188x6xf32>
    %75 = arith.addf %70, %74 : vector<188x6xf32>
    %c60 = arith.constant 60 : index
    %c0_66 = arith.constant 0 : index
    %76 = vector.load %arg2[%c60, %c0_66] : memref<100x6xf32, #tpu.memory_space<vmem>>, vector<4x6xf32>
    %c0_67 = arith.constant 0 : index
    %c48_68 = arith.constant 48 : index
    %c0_69 = arith.constant 0 : index
    %77 = vector.load %arg1[%c0_67, %c48_68, %c0_69] : memref<1x256x4xf32, #tpu.memory_space<vmem>>, vector<1x188x4xf32>
    %78 = vector.shape_cast %77 : vector<1x188x4xf32> to vector<188x4xf32>
    %cst_70 = arith.constant dense<0.000000e+00> : vector<188x6xf32>
    %79 = tpu.matmul %78, %76, %cst_70 {dimension_numbers = #tpu.dot_dimension_numbers<[1], [0], [0], [1], [0, 0, 1, 1], [], []>} : vector<188x4xf32>, vector<4x6xf32>, vector<188x6xf32> -> vector<188x6xf32>
    %80 = arith.addf %75, %79 : vector<188x6xf32>
    %c64 = arith.constant 64 : index
    %c0_71 = arith.constant 0 : index
    %81 = vector.load %arg2[%c64, %c0_71] : memref<100x6xf32, #tpu.memory_space<vmem>>, vector<4x6xf32>
    %c0_72 = arith.constant 0 : index
    %c49 = arith.constant 49 : index
    %c0_73 = arith.constant 0 : index
    %82 = vector.load %arg1[%c0_72, %c49, %c0_73] : memref<1x256x4xf32, #tpu.memory_space<vmem>>, vector<1x188x4xf32>
    %83 = vector.shape_cast %82 : vector<1x188x4xf32> to vector<188x4xf32>
    %cst_74 = arith.constant dense<0.000000e+00> : vector<188x6xf32>
    %84 = tpu.matmul %83, %81, %cst_74 {dimension_numbers = #tpu.dot_dimension_numbers<[1], [0], [0], [1], [0, 0, 1, 1], [], []>} : vector<188x4xf32>, vector<4x6xf32>, vector<188x6xf32> -> vector<188x6xf32>
    %85 = arith.addf %80, %84 : vector<188x6xf32>
    %c68 = arith.constant 68 : index
    %c0_75 = arith.constant 0 : index
    %86 = vector.load %arg2[%c68, %c0_75] : memref<100x6xf32, #tpu.memory_space<vmem>>, vector<4x6xf32>
    %c0_76 = arith.constant 0 : index
    %c50 = arith.constant 50 : index
    %c0_77 = arith.constant 0 : index
    %87 = vector.load %arg1[%c0_76, %c50, %c0_77] : memref<1x256x4xf32, #tpu.memory_space<vmem>>, vector<1x188x4xf32>
    %88 = vector.shape_cast %87 : vector<1x188x4xf32> to vector<188x4xf32>
    %cst_78 = arith.constant dense<0.000000e+00> : vector<188x6xf32>
    %89 = tpu.matmul %88, %86, %cst_78 {dimension_numbers = #tpu.dot_dimension_numbers<[1], [0], [0], [1], [0, 0, 1, 1], [], []>} : vector<188x4xf32>, vector<4x6xf32>, vector<188x6xf32> -> vector<188x6xf32>
    %90 = arith.addf %85, %89 : vector<188x6xf32>
    %c72 = arith.constant 72 : index
    %c0_79 = arith.constant 0 : index
    %91 = vector.load %arg2[%c72, %c0_79] : memref<100x6xf32, #tpu.memory_space<vmem>>, vector<4x6xf32>
    %c0_80 = arith.constant 0 : index
    %c51 = arith.constant 51 : index
    %c0_81 = arith.constant 0 : index
    %92 = vector.load %arg1[%c0_80, %c51, %c0_81] : memref<1x256x4xf32, #tpu.memory_space<vmem>>, vector<1x188x4xf32>
    %93 = vector.shape_cast %92 : vector<1x188x4xf32> to vector<188x4xf32>
    %cst_82 = arith.constant dense<0.000000e+00> : vector<188x6xf32>
    %94 = tpu.matmul %93, %91, %cst_82 {dimension_numbers = #tpu.dot_dimension_numbers<[1], [0], [0], [1], [0, 0, 1, 1], [], []>} : vector<188x4xf32>, vector<4x6xf32>, vector<188x6xf32> -> vector<188x6xf32>
    %95 = arith.addf %90, %94 : vector<188x6xf32>
    %c76 = arith.constant 76 : index
    %c0_83 = arith.constant 0 : index
    %96 = vector.load %arg2[%c76, %c0_83] : memref<100x6xf32, #tpu.memory_space<vmem>>, vector<4x6xf32>
    %c0_84 = arith.constant 0 : index
    %c52_85 = arith.constant 52 : index
    %c0_86 = arith.constant 0 : index
    %97 = vector.load %arg1[%c0_84, %c52_85, %c0_86] : memref<1x256x4xf32, #tpu.memory_space<vmem>>, vector<1x188x4xf32>
    %98 = vector.shape_cast %97 : vector<1x188x4xf32> to vector<188x4xf32>
    %cst_87 = arith.constant dense<0.000000e+00> : vector<188x6xf32>
    %99 = tpu.matmul %98, %96, %cst_87 {dimension_numbers = #tpu.dot_dimension_numbers<[1], [0], [0], [1], [0, 0, 1, 1], [], []>} : vector<188x4xf32>, vector<4x6xf32>, vector<188x6xf32> -> vector<188x6xf32>
    %100 = arith.addf %95, %99 : vector<188x6xf32>
    %c80 = arith.constant 80 : index
    %c0_88 = arith.constant 0 : index
    %101 = vector.load %arg2[%c80, %c0_88] : memref<100x6xf32, #tpu.memory_space<vmem>>, vector<4x6xf32>
    %c0_89 = arith.constant 0 : index
    %c64_90 = arith.constant 64 : index
    %c0_91 = arith.constant 0 : index
    %102 = vector.load %arg1[%c0_89, %c64_90, %c0_91] : memref<1x256x4xf32, #tpu.memory_space<vmem>>, vector<1x188x4xf32>
    %103 = vector.shape_cast %102 : vector<1x188x4xf32> to vector<188x4xf32>
    %cst_92 = arith.constant dense<0.000000e+00> : vector<188x6xf32>
    %104 = tpu.matmul %103, %101, %cst_92 {dimension_numbers = #tpu.dot_dimension_numbers<[1], [0], [0], [1], [0, 0, 1, 1], [], []>} : vector<188x4xf32>, vector<4x6xf32>, vector<188x6xf32> -> vector<188x6xf32>
    %105 = arith.addf %100, %104 : vector<188x6xf32>
    %c84 = arith.constant 84 : index
    %c0_93 = arith.constant 0 : index
    %106 = vector.load %arg2[%c84, %c0_93] : memref<100x6xf32, #tpu.memory_space<vmem>>, vector<4x6xf32>
    %c0_94 = arith.constant 0 : index
    %c65 = arith.constant 65 : index
    %c0_95 = arith.constant 0 : index
    %107 = vector.load %arg1[%c0_94, %c65, %c0_95] : memref<1x256x4xf32, #tpu.memory_space<vmem>>, vector<1x188x4xf32>
    %108 = vector.shape_cast %107 : vector<1x188x4xf32> to vector<188x4xf32>
    %cst_96 = arith.constant dense<0.000000e+00> : vector<188x6xf32>
    %109 = tpu.matmul %108, %106, %cst_96 {dimension_numbers = #tpu.dot_dimension_numbers<[1], [0], [0], [1], [0, 0, 1, 1], [], []>} : vector<188x4xf32>, vector<4x6xf32>, vector<188x6xf32> -> vector<188x6xf32>
    %110 = arith.addf %105, %109 : vector<188x6xf32>
    %c88 = arith.constant 88 : index
    %c0_97 = arith.constant 0 : index
    %111 = vector.load %arg2[%c88, %c0_97] : memref<100x6xf32, #tpu.memory_space<vmem>>, vector<4x6xf32>
    %c0_98 = arith.constant 0 : index
    %c66 = arith.constant 66 : index
    %c0_99 = arith.constant 0 : index
    %112 = vector.load %arg1[%c0_98, %c66, %c0_99] : memref<1x256x4xf32, #tpu.memory_space<vmem>>, vector<1x188x4xf32>
    %113 = vector.shape_cast %112 : vector<1x188x4xf32> to vector<188x4xf32>
    %cst_100 = arith.constant dense<0.000000e+00> : vector<188x6xf32>
    %114 = tpu.matmul %113, %111, %cst_100 {dimension_numbers = #tpu.dot_dimension_numbers<[1], [0], [0], [1], [0, 0, 1, 1], [], []>} : vector<188x4xf32>, vector<4x6xf32>, vector<188x6xf32> -> vector<188x6xf32>
    %115 = arith.addf %110, %114 : vector<188x6xf32>
    %c92 = arith.constant 92 : index
    %c0_101 = arith.constant 0 : index
    %116 = vector.load %arg2[%c92, %c0_101] : memref<100x6xf32, #tpu.memory_space<vmem>>, vector<4x6xf32>
    %c0_102 = arith.constant 0 : index
    %c67 = arith.constant 67 : index
    %c0_103 = arith.constant 0 : index
    %117 = vector.load %arg1[%c0_102, %c67, %c0_103] : memref<1x256x4xf32, #tpu.memory_space<vmem>>, vector<1x188x4xf32>
    %118 = vector.shape_cast %117 : vector<1x188x4xf32> to vector<188x4xf32>
    %cst_104 = arith.constant dense<0.000000e+00> : vector<188x6xf32>
    %119 = tpu.matmul %118, %116, %cst_104 {dimension_numbers = #tpu.dot_dimension_numbers<[1], [0], [0], [1], [0, 0, 1, 1], [], []>} : vector<188x4xf32>, vector<4x6xf32>, vector<188x6xf32> -> vector<188x6xf32>
    %120 = arith.addf %115, %119 : vector<188x6xf32>
    %c96 = arith.constant 96 : index
    %c0_105 = arith.constant 0 : index
    %121 = vector.load %arg2[%c96, %c0_105] : memref<100x6xf32, #tpu.memory_space<vmem>>, vector<4x6xf32>
    %c0_106 = arith.constant 0 : index
    %c68_107 = arith.constant 68 : index
    %c0_108 = arith.constant 0 : index
    %122 = vector.load %arg1[%c0_106, %c68_107, %c0_108] : memref<1x256x4xf32, #tpu.memory_space<vmem>>, vector<1x188x4xf32>
    %123 = vector.shape_cast %122 : vector<1x188x4xf32> to vector<188x4xf32>
    %cst_109 = arith.constant dense<0.000000e+00> : vector<188x6xf32>
    %124 = tpu.matmul %123, %121, %cst_109 {dimension_numbers = #tpu.dot_dimension_numbers<[1], [0], [0], [1], [0, 0, 1, 1], [], []>} : vector<188x4xf32>, vector<4x6xf32>, vector<188x6xf32> -> vector<188x6xf32>
    %125 = arith.addf %120, %124 : vector<188x6xf32>
    %c0_110 = arith.constant 0 : index
    %c0_111 = arith.constant 0 : index
    %126 = vector.load %arg3[%c0_110, %c0_111] : memref<1x6xf32, #tpu.memory_space<vmem>>, vector<1x6xf32>
    %127 = vector.broadcast %126 : vector<1x6xf32> to vector<188x6xf32>
    %128 = arith.addf %125, %127 : vector<188x6xf32>
    %129 = math.tanh %128 : vector<188x6xf32>
    %c0_112 = arith.constant 0 : index
    %c0_113 = arith.constant 0 : index
    %130 = vector.load %arg13[%c0_112, %c0_113] : memref<188x6xf32, #tpu.memory_space<vmem>>, vector<188x6xf32>
    tpu.vector_store %arg13[%c0_112, %c0_113], %129 {strides = array<i32>} : memref<188x6xf32, #tpu.memory_space<vmem>>, vector<188x6xf32>,
    %c0_114 = arith.constant 0 : index
    %c0_115 = arith.constant 0 : index
    %131 = vector.load %arg13[%c0_114, %c0_115] : memref<188x6xf32, #tpu.memory_space<vmem>>, vector<171x6xf32>
    %c1_116 = arith.constant 1 : index
    %c0_117 = arith.constant 0 : index
    %132 = vector.load %arg13[%c1_116, %c0_117] : memref<188x6xf32, #tpu.memory_space<vmem>>, vector<171x6xf32>
    %133 = arith.addf %131, %132 : vector<171x6xf32>
    %c16_118 = arith.constant 16 : index
    %c0_119 = arith.constant 0 : index
    %134 = vector.load %arg13[%c16_118, %c0_119] : memref<188x6xf32, #tpu.memory_space<vmem>>, vector<171x6xf32>
    %135 = arith.addf %133, %134 : vector<171x6xf32>
    %c17_120 = arith.constant 17 : index
    %c0_121 = arith.constant 0 : index
    %136 = vector.load %arg13[%c17_120, %c0_121] : memref<188x6xf32, #tpu.memory_space<vmem>>, vector<171x6xf32>
    %137 = arith.addf %135, %136 : vector<171x6xf32>
    %cst_122 = arith.constant 2.500000e-01 : f32
    %138 = vector.broadcast %cst_122 : f32 to vector<171x6xf32>
    %139 = arith.mulf %138, %137 : vector<171x6xf32>
    %c0_123 = arith.constant 0 : index
    %c0_124 = arith.constant 0 : index
    %140 = vector.load %arg14[%c0_123, %c0_124] : memref<171x6xf32, #tpu.memory_space<vmem>>, vector<171x6xf32>
    tpu.vector_store %arg14[%c0_123, %c0_124], %139 {strides = array<i32>} : memref<171x6xf32, #tpu.memory_space<vmem>>, vector<171x6xf32>,
    %cst_125 = arith.constant 0.000000e+00 : f32
    %141 = vector.broadcast %cst_125 : f32 to vector<35x16xf32>
    %c0_126 = arith.constant 0 : index
    %c0_127 = arith.constant 0 : index
    %142 = vector.load %arg4[%c0_126, %c0_127] : memref<150x16xf32, #tpu.memory_space<vmem>>, vector<6x16xf32>
    %c0_128 = arith.constant 0 : index
    %c0_129 = arith.constant 0 : index
    %143 = vector.load %arg14[%c0_128, %c0_129] : memref<171x6xf32, #tpu.memory_space<vmem>>, vector<35x6xf32>
    %cst_130 = arith.constant dense<0.000000e+00> : vector<35x16xf32>
    %144 = tpu.matmul %143, %142, %cst_130 {dimension_numbers = #tpu.dot_dimension_numbers<[1], [0], [0], [1], [0, 0, 1, 1], [], []>} : vector<35x6xf32>, vector<6x16xf32>, vector<35x16xf32> -> vector<35x16xf32>
    %145 = arith.addf %141, %144 : vector<35x16xf32>
    %c6 = arith.constant 6 : index
    %c0_131 = arith.constant 0 : index
    %146 = vector.load %arg4[%c6, %c0_131] : memref<150x16xf32, #tpu.memory_space<vmem>>, vector<6x16xf32>
    %c2_132 = arith.constant 2 : index
    %c0_133 = arith.constant 0 : index
    %147 = vector.load %arg14[%c2_132, %c0_133] : memref<171x6xf32, #tpu.memory_space<vmem>>, vector<35x6xf32>
    %cst_134 = arith.constant dense<0.000000e+00> : vector<35x16xf32>
    %148 = tpu.matmul %147, %146, %cst_134 {dimension_numbers = #tpu.dot_dimension_numbers<[1], [0], [0], [1], [0, 0, 1, 1], [], []>} : vector<35x6xf32>, vector<6x16xf32>, vector<35x16xf32> -> vector<35x16xf32>
    %149 = arith.addf %145, %148 : vector<35x16xf32>
    %c12_135 = arith.constant 12 : index
    %c0_136 = arith.constant 0 : index
    %150 = vector.load %arg4[%c12_135, %c0_136] : memref<150x16xf32, #tpu.memory_space<vmem>>, vector<6x16xf32>
    %c4_137 = arith.constant 4 : index
    %c0_138 = arith.constant 0 : index
    %151 = vector.load %arg14[%c4_137, %c0_138] : memref<171x6xf32, #tpu.memory_space<vmem>>, vector<35x6xf32>
    %cst_139 = arith.constant dense<0.000000e+00> : vector<35x16xf32>
    %152 = tpu.matmul %151, %150, %cst_139 {dimension_numbers = #tpu.dot_dimension_numbers<[1], [0], [0], [1], [0, 0, 1, 1], [], []>} : vector<35x6xf32>, vector<6x16xf32>, vector<35x16xf32> -> vector<35x16xf32>
    %153 = arith.addf %149, %152 : vector<35x16xf32>
    %c18_140 = arith.constant 18 : index
    %c0_141 = arith.constant 0 : index
    %154 = vector.load %arg4[%c18_140, %c0_141] : memref<150x16xf32, #tpu.memory_space<vmem>>, vector<6x16xf32>
    %c6_142 = arith.constant 6 : index
    %c0_143 = arith.constant 0 : index
    %155 = vector.load %arg14[%c6_142, %c0_143] : memref<171x6xf32, #tpu.memory_space<vmem>>, vector<35x6xf32>
    %cst_144 = arith.constant dense<0.000000e+00> : vector<35x16xf32>
    %156 = tpu.matmul %155, %154, %cst_144 {dimension_numbers = #tpu.dot_dimension_numbers<[1], [0], [0], [1], [0, 0, 1, 1], [], []>} : vector<35x6xf32>, vector<6x16xf32>, vector<35x16xf32> -> vector<35x16xf32>
    %157 = arith.addf %153, %156 : vector<35x16xf32>
    %c24_145 = arith.constant 24 : index
    %c0_146 = arith.constant 0 : index
    %158 = vector.load %arg4[%c24_145, %c0_146] : memref<150x16xf32, #tpu.memory_space<vmem>>, vector<6x16xf32>
    %c8_147 = arith.constant 8 : index
    %c0_148 = arith.constant 0 : index
    %159 = vector.load %arg14[%c8_147, %c0_148] : memref<171x6xf32, #tpu.memory_space<vmem>>, vector<35x6xf32>
    %cst_149 = arith.constant dense<0.000000e+00> : vector<35x16xf32>
    %160 = tpu.matmul %159, %158, %cst_149 {dimension_numbers = #tpu.dot_dimension_numbers<[1], [0], [0], [1], [0, 0, 1, 1], [], []>} : vector<35x6xf32>, vector<6x16xf32>, vector<35x16xf32> -> vector<35x16xf32>
    %161 = arith.addf %157, %160 : vector<35x16xf32>
    %c30 = arith.constant 30 : index
    %c0_150 = arith.constant 0 : index
    %162 = vector.load %arg4[%c30, %c0_150] : memref<150x16xf32, #tpu.memory_space<vmem>>, vector<6x16xf32>
    %c32_151 = arith.constant 32 : index
    %c0_152 = arith.constant 0 : index
    %163 = vector.load %arg14[%c32_151, %c0_152] : memref<171x6xf32, #tpu.memory_space<vmem>>, vector<35x6xf32>
    %cst_153 = arith.constant dense<0.000000e+00> : vector<35x16xf32>
    %164 = tpu.matmul %163, %162, %cst_153 {dimension_numbers = #tpu.dot_dimension_numbers<[1], [0], [0], [1], [0, 0, 1, 1], [], []>} : vector<35x6xf32>, vector<6x16xf32>, vector<35x16xf32> -> vector<35x16xf32>
    %165 = arith.addf %161, %164 : vector<35x16xf32>
    %c36_154 = arith.constant 36 : index
    %c0_155 = arith.constant 0 : index
    %166 = vector.load %arg4[%c36_154, %c0_155] : memref<150x16xf32, #tpu.memory_space<vmem>>, vector<6x16xf32>
    %c34_156 = arith.constant 34 : index
    %c0_157 = arith.constant 0 : index
    %167 = vector.load %arg14[%c34_156, %c0_157] : memref<171x6xf32, #tpu.memory_space<vmem>>, vector<35x6xf32>
    %cst_158 = arith.constant dense<0.000000e+00> : vector<35x16xf32>
    %168 = tpu.matmul %167, %166, %cst_158 {dimension_numbers = #tpu.dot_dimension_numbers<[1], [0], [0], [1], [0, 0, 1, 1], [], []>} : vector<35x6xf32>, vector<6x16xf32>, vector<35x16xf32> -> vector<35x16xf32>
    %169 = arith.addf %165, %168 : vector<35x16xf32>
    %c42 = arith.constant 42 : index
    %c0_159 = arith.constant 0 : index
    %170 = vector.load %arg4[%c42, %c0_159] : memref<150x16xf32, #tpu.memory_space<vmem>>, vector<6x16xf32>
    %c36_160 = arith.constant 36 : index
    %c0_161 = arith.constant 0 : index
    %171 = vector.load %arg14[%c36_160, %c0_161] : memref<171x6xf32, #tpu.memory_space<vmem>>, vector<35x6xf32>
    %cst_162 = arith.constant dense<0.000000e+00> : vector<35x16xf32>
    %172 = tpu.matmul %171, %170, %cst_162 {dimension_numbers = #tpu.dot_dimension_numbers<[1], [0], [0], [1], [0, 0, 1, 1], [], []>} : vector<35x6xf32>, vector<6x16xf32>, vector<35x16xf32> -> vector<35x16xf32>
    %173 = arith.addf %169, %172 : vector<35x16xf32>
    %c48_163 = arith.constant 48 : index
    %c0_164 = arith.constant 0 : index
    %174 = vector.load %arg4[%c48_163, %c0_164] : memref<150x16xf32, #tpu.memory_space<vmem>>, vector<6x16xf32>
    %c38 = arith.constant 38 : index
    %c0_165 = arith.constant 0 : index
    %175 = vector.load %arg14[%c38, %c0_165] : memref<171x6xf32, #tpu.memory_space<vmem>>, vector<35x6xf32>
    %cst_166 = arith.constant dense<0.000000e+00> : vector<35x16xf32>
    %176 = tpu.matmul %175, %174, %cst_166 {dimension_numbers = #tpu.dot_dimension_numbers<[1], [0], [0], [1], [0, 0, 1, 1], [], []>} : vector<35x6xf32>, vector<6x16xf32>, vector<35x16xf32> -> vector<35x16xf32>
    %177 = arith.addf %173, %176 : vector<35x16xf32>
    %c54 = arith.constant 54 : index
    %c0_167 = arith.constant 0 : index
    %178 = vector.load %arg4[%c54, %c0_167] : memref<150x16xf32, #tpu.memory_space<vmem>>, vector<6x16xf32>
    %c40_168 = arith.constant 40 : index
    %c0_169 = arith.constant 0 : index
    %179 = vector.load %arg14[%c40_168, %c0_169] : memref<171x6xf32, #tpu.memory_space<vmem>>, vector<35x6xf32>
    %cst_170 = arith.constant dense<0.000000e+00> : vector<35x16xf32>
    %180 = tpu.matmul %179, %178, %cst_170 {dimension_numbers = #tpu.dot_dimension_numbers<[1], [0], [0], [1], [0, 0, 1, 1], [], []>} : vector<35x6xf32>, vector<6x16xf32>, vector<35x16xf32> -> vector<35x16xf32>
    %181 = arith.addf %177, %180 : vector<35x16xf32>
    %c60_171 = arith.constant 60 : index
    %c0_172 = arith.constant 0 : index
    %182 = vector.load %arg4[%c60_171, %c0_172] : memref<150x16xf32, #tpu.memory_space<vmem>>, vector<6x16xf32>
    %c64_173 = arith.constant 64 : index
    %c0_174 = arith.constant 0 : index
    %183 = vector.load %arg14[%c64_173, %c0_174] : memref<171x6xf32, #tpu.memory_space<vmem>>, vector<35x6xf32>
    %cst_175 = arith.constant dense<0.000000e+00> : vector<35x16xf32>
    %184 = tpu.matmul %183, %182, %cst_175 {dimension_numbers = #tpu.dot_dimension_numbers<[1], [0], [0], [1], [0, 0, 1, 1], [], []>} : vector<35x6xf32>, vector<6x16xf32>, vector<35x16xf32> -> vector<35x16xf32>
    %185 = arith.addf %181, %184 : vector<35x16xf32>
    %c66_176 = arith.constant 66 : index
    %c0_177 = arith.constant 0 : index
    %186 = vector.load %arg4[%c66_176, %c0_177] : memref<150x16xf32, #tpu.memory_space<vmem>>, vector<6x16xf32>
    %c66_178 = arith.constant 66 : index
    %c0_179 = arith.constant 0 : index
    %187 = vector.load %arg14[%c66_178, %c0_179] : memref<171x6xf32, #tpu.memory_space<vmem>>, vector<35x6xf32>
    %cst_180 = arith.constant dense<0.000000e+00> : vector<35x16xf32>
    %188 = tpu.matmul %187, %186, %cst_180 {dimension_numbers = #tpu.dot_dimension_numbers<[1], [0], [0], [1], [0, 0, 1, 1], [], []>} : vector<35x6xf32>, vector<6x16xf32>, vector<35x16xf32> -> vector<35x16xf32>
    %189 = arith.addf %185, %188 : vector<35x16xf32>
    %c72_181 = arith.constant 72 : index
    %c0_182 = arith.constant 0 : index
    %190 = vector.load %arg4[%c72_181, %c0_182] : memref<150x16xf32, #tpu.memory_space<vmem>>, vector<6x16xf32>
    %c68_183 = arith.constant 68 : index
    %c0_184 = arith.constant 0 : index
    %191 = vector.load %arg14[%c68_183, %c0_184] : memref<171x6xf32, #tpu.memory_space<vmem>>, vector<35x6xf32>
    %cst_185 = arith.constant dense<0.000000e+00> : vector<35x16xf32>
    %192 = tpu.matmul %191, %190, %cst_185 {dimension_numbers = #tpu.dot_dimension_numbers<[1], [0], [0], [1], [0, 0, 1, 1], [], []>} : vector<35x6xf32>, vector<6x16xf32>, vector<35x16xf32> -> vector<35x16xf32>
    %193 = arith.addf %189, %192 : vector<35x16xf32>
    %c78 = arith.constant 78 : index
    %c0_186 = arith.constant 0 : index
    %194 = vector.load %arg4[%c78, %c0_186] : memref<150x16xf32, #tpu.memory_space<vmem>>, vector<6x16xf32>
    %c70 = arith.constant 70 : index
    %c0_187 = arith.constant 0 : index
    %195 = vector.load %arg14[%c70, %c0_187] : memref<171x6xf32, #tpu.memory_space<vmem>>, vector<35x6xf32>
    %cst_188 = arith.constant dense<0.000000e+00> : vector<35x16xf32>
    %196 = tpu.matmul %195, %194, %cst_188 {dimension_numbers = #tpu.dot_dimension_numbers<[1], [0], [0], [1], [0, 0, 1, 1], [], []>} : vector<35x6xf32>, vector<6x16xf32>, vector<35x16xf32> -> vector<35x16xf32>
    %197 = arith.addf %193, %196 : vector<35x16xf32>
    %c84_189 = arith.constant 84 : index
    %c0_190 = arith.constant 0 : index
    %198 = vector.load %arg4[%c84_189, %c0_190] : memref<150x16xf32, #tpu.memory_space<vmem>>, vector<6x16xf32>
    %c72_191 = arith.constant 72 : index
    %c0_192 = arith.constant 0 : index
    %199 = vector.load %arg14[%c72_191, %c0_192] : memref<171x6xf32, #tpu.memory_space<vmem>>, vector<35x6xf32>
    %cst_193 = arith.constant dense<0.000000e+00> : vector<35x16xf32>
    %200 = tpu.matmul %199, %198, %cst_193 {dimension_numbers = #tpu.dot_dimension_numbers<[1], [0], [0], [1], [0, 0, 1, 1], [], []>} : vector<35x6xf32>, vector<6x16xf32>, vector<35x16xf32> -> vector<35x16xf32>
    %201 = arith.addf %197, %200 : vector<35x16xf32>
    %c90 = arith.constant 90 : index
    %c0_194 = arith.constant 0 : index
    %202 = vector.load %arg4[%c90, %c0_194] : memref<150x16xf32, #tpu.memory_space<vmem>>, vector<6x16xf32>
    %c96_195 = arith.constant 96 : index
    %c0_196 = arith.constant 0 : index
    %203 = vector.load %arg14[%c96_195, %c0_196] : memref<171x6xf32, #tpu.memory_space<vmem>>, vector<35x6xf32>
    %cst_197 = arith.constant dense<0.000000e+00> : vector<35x16xf32>
    %204 = tpu.matmul %203, %202, %cst_197 {dimension_numbers = #tpu.dot_dimension_numbers<[1], [0], [0], [1], [0, 0, 1, 1], [], []>} : vector<35x6xf32>, vector<6x16xf32>, vector<35x16xf32> -> vector<35x16xf32>
    %205 = arith.addf %201, %204 : vector<35x16xf32>
    %c96_198 = arith.constant 96 : index
    %c0_199 = arith.constant 0 : index
    %206 = vector.load %arg4[%c96_198, %c0_199] : memref<150x16xf32, #tpu.memory_space<vmem>>, vector<6x16xf32>
    %c98 = arith.constant 98 : index
    %c0_200 = arith.constant 0 : index
    %207 = vector.load %arg14[%c98, %c0_200] : memref<171x6xf32, #tpu.memory_space<vmem>>, vector<35x6xf32>
    %cst_201 = arith.constant dense<0.000000e+00> : vector<35x16xf32>
    %208 = tpu.matmul %207, %206, %cst_201 {dimension_numbers = #tpu.dot_dimension_numbers<[1], [0], [0], [1], [0, 0, 1, 1], [], []>} : vector<35x6xf32>, vector<6x16xf32>, vector<35x16xf32> -> vector<35x16xf32>
    %209 = arith.addf %205, %208 : vector<35x16xf32>
    %c102 = arith.constant 102 : index
    %c0_202 = arith.constant 0 : index
    %210 = vector.load %arg4[%c102, %c0_202] : memref<150x16xf32, #tpu.memory_space<vmem>>, vector<6x16xf32>
    %c100 = arith.constant 100 : index
    %c0_203 = arith.constant 0 : index
    %211 = vector.load %arg14[%c100, %c0_203] : memref<171x6xf32, #tpu.memory_space<vmem>>, vector<35x6xf32>
    %cst_204 = arith.constant dense<0.000000e+00> : vector<35x16xf32>
    %212 = tpu.matmul %211, %210, %cst_204 {dimension_numbers = #tpu.dot_dimension_numbers<[1], [0], [0], [1], [0, 0, 1, 1], [], []>} : vector<35x6xf32>, vector<6x16xf32>, vector<35x16xf32> -> vector<35x16xf32>
    %213 = arith.addf %209, %212 : vector<35x16xf32>
    %c108 = arith.constant 108 : index
    %c0_205 = arith.constant 0 : index
    %214 = vector.load %arg4[%c108, %c0_205] : memref<150x16xf32, #tpu.memory_space<vmem>>, vector<6x16xf32>
    %c102_206 = arith.constant 102 : index
    %c0_207 = arith.constant 0 : index
    %215 = vector.load %arg14[%c102_206, %c0_207] : memref<171x6xf32, #tpu.memory_space<vmem>>, vector<35x6xf32>
    %cst_208 = arith.constant dense<0.000000e+00> : vector<35x16xf32>
    %216 = tpu.matmul %215, %214, %cst_208 {dimension_numbers = #tpu.dot_dimension_numbers<[1], [0], [0], [1], [0, 0, 1, 1], [], []>} : vector<35x6xf32>, vector<6x16xf32>, vector<35x16xf32> -> vector<35x16xf32>
    %217 = arith.addf %213, %216 : vector<35x16xf32>
    %c114 = arith.constant 114 : index
    %c0_209 = arith.constant 0 : index
    %218 = vector.load %arg4[%c114, %c0_209] : memref<150x16xf32, #tpu.memory_space<vmem>>, vector<6x16xf32>
    %c104 = arith.constant 104 : index
    %c0_210 = arith.constant 0 : index
    %219 = vector.load %arg14[%c104, %c0_210] : memref<171x6xf32, #tpu.memory_space<vmem>>, vector<35x6xf32>
    %cst_211 = arith.constant dense<0.000000e+00> : vector<35x16xf32>
    %220 = tpu.matmul %219, %218, %cst_211 {dimension_numbers = #tpu.dot_dimension_numbers<[1], [0], [0], [1], [0, 0, 1, 1], [], []>} : vector<35x6xf32>, vector<6x16xf32>, vector<35x16xf32> -> vector<35x16xf32>
    %221 = arith.addf %217, %220 : vector<35x16xf32>
    %c120 = arith.constant 120 : index
    %c0_212 = arith.constant 0 : index
    %222 = vector.load %arg4[%c120, %c0_212] : memref<150x16xf32, #tpu.memory_space<vmem>>, vector<6x16xf32>
    %c128 = arith.constant 128 : index
    %c0_213 = arith.constant 0 : index
    %223 = vector.load %arg14[%c128, %c0_213] : memref<171x6xf32, #tpu.memory_space<vmem>>, vector<35x6xf32>
    %cst_214 = arith.constant dense<0.000000e+00> : vector<35x16xf32>
    %224 = tpu.matmul %223, %222, %cst_214 {dimension_numbers = #tpu.dot_dimension_numbers<[1], [0], [0], [1], [0, 0, 1, 1], [], []>} : vector<35x6xf32>, vector<6x16xf32>, vector<35x16xf32> -> vector<35x16xf32>
    %225 = arith.addf %221, %224 : vector<35x16xf32>
    %c126 = arith.constant 126 : index
    %c0_215 = arith.constant 0 : index
    %226 = vector.load %arg4[%c126, %c0_215] : memref<150x16xf32, #tpu.memory_space<vmem>>, vector<6x16xf32>
    %c130 = arith.constant 130 : index
    %c0_216 = arith.constant 0 : index
    %227 = vector.load %arg14[%c130, %c0_216] : memref<171x6xf32, #tpu.memory_space<vmem>>, vector<35x6xf32>
    %cst_217 = arith.constant dense<0.000000e+00> : vector<35x16xf32>
    %228 = tpu.matmul %227, %226, %cst_217 {dimension_numbers = #tpu.dot_dimension_numbers<[1], [0], [0], [1], [0, 0, 1, 1], [], []>} : vector<35x6xf32>, vector<6x16xf32>, vector<35x16xf32> -> vector<35x16xf32>
    %229 = arith.addf %225, %228 : vector<35x16xf32>
    %c132 = arith.constant 132 : index
    %c0_218 = arith.constant 0 : index
    %230 = vector.load %arg4[%c132, %c0_218] : memref<150x16xf32, #tpu.memory_space<vmem>>, vector<6x16xf32>
    %c132_219 = arith.constant 132 : index
    %c0_220 = arith.constant 0 : index
    %231 = vector.load %arg14[%c132_219, %c0_220] : memref<171x6xf32, #tpu.memory_space<vmem>>, vector<35x6xf32>
    %cst_221 = arith.constant dense<0.000000e+00> : vector<35x16xf32>
    %232 = tpu.matmul %231, %230, %cst_221 {dimension_numbers = #tpu.dot_dimension_numbers<[1], [0], [0], [1], [0, 0, 1, 1], [], []>} : vector<35x6xf32>, vector<6x16xf32>, vector<35x16xf32> -> vector<35x16xf32>
    %233 = arith.addf %229, %232 : vector<35x16xf32>
    %c138 = arith.constant 138 : index
    %c0_222 = arith.constant 0 : index
    %234 = vector.load %arg4[%c138, %c0_222] : memref<150x16xf32, #tpu.memory_space<vmem>>, vector<6x16xf32>
    %c134 = arith.constant 134 : index
    %c0_223 = arith.constant 0 : index
    %235 = vector.load %arg14[%c134, %c0_223] : memref<171x6xf32, #tpu.memory_space<vmem>>, vector<35x6xf32>
    %cst_224 = arith.constant dense<0.000000e+00> : vector<35x16xf32>
    %236 = tpu.matmul %235, %234, %cst_224 {dimension_numbers = #tpu.dot_dimension_numbers<[1], [0], [0], [1], [0, 0, 1, 1], [], []>} : vector<35x6xf32>, vector<6x16xf32>, vector<35x16xf32> -> vector<35x16xf32>
    %237 = arith.addf %233, %236 : vector<35x16xf32>
    %c144 = arith.constant 144 : index
    %c0_225 = arith.constant 0 : index
    %238 = vector.load %arg4[%c144, %c0_225] : memref<150x16xf32, #tpu.memory_space<vmem>>, vector<6x16xf32>
    %c136 = arith.constant 136 : index
    %c0_226 = arith.constant 0 : index
    %239 = vector.load %arg14[%c136, %c0_226] : memref<171x6xf32, #tpu.memory_space<vmem>>, vector<35x6xf32>
    %cst_227 = arith.constant dense<0.000000e+00> : vector<35x16xf32>
    %240 = tpu.matmul %239, %238, %cst_227 {dimension_numbers = #tpu.dot_dimension_numbers<[1], [0], [0], [1], [0, 0, 1, 1], [], []>} : vector<35x6xf32>, vector<6x16xf32>, vector<35x16xf32> -> vector<35x16xf32>
    %241 = arith.addf %237, %240 : vector<35x16xf32>
    %c0_228 = arith.constant 0 : index
    %c0_229 = arith.constant 0 : index
    %242 = vector.load %arg5[%c0_228, %c0_229] : memref<1x16xf32, #tpu.memory_space<vmem>>, vector<1x16xf32>
    %243 = vector.broadcast %242 : vector<1x16xf32> to vector<35x16xf32>
    %244 = arith.addf %241, %243 : vector<35x16xf32>
    %245 = math.tanh %244 : vector<35x16xf32>
    %c0_230 = arith.constant 0 : index
    %c0_231 = arith.constant 0 : index
    %246 = vector.load %arg7[%c0_230, %c0_231] : memref<1x120xf32, #tpu.memory_space<vmem>>, vector<1x120xf32>
    %247 = vector.extract_strided_slice %245 {offsets = [0, 0], sizes = [1, 16], strides = [1, 1]} : vector<35x16xf32> to vector<1x16xf32>
    %c0_232 = arith.constant 0 : index
    %c0_233 = arith.constant 0 : index
    %248 = vector.load %arg6[%c0_232, %c0_233] : memref<64x120xf32, #tpu.memory_space<vmem>>, vector<16x120xf32>
    %cst_234 = arith.constant dense<0.000000e+00> : vector<1x120xf32>
    %249 = tpu.matmul %247, %248, %cst_234 {dimension_numbers = #tpu.dot_dimension_numbers<[1], [0], [0], [1], [0, 0, 1, 1], [], []>} : vector<1x16xf32>, vector<16x120xf32>, vector<1x120xf32> -> vector<1x120xf32>
    %250 = arith.addf %246, %249 : vector<1x120xf32>
    %251 = vector.extract_strided_slice %245 {offsets = [2, 0], sizes = [1, 16], strides = [1, 1]} : vector<35x16xf32> to vector<1x16xf32>
    %c16_235 = arith.constant 16 : index
    %c0_236 = arith.constant 0 : index
    %252 = vector.load %arg6[%c16_235, %c0_236] : memref<64x120xf32, #tpu.memory_space<vmem>>, vector<16x120xf32>
    %cst_237 = arith.constant dense<0.000000e+00> : vector<1x120xf32>
    %253 = tpu.matmul %251, %252, %cst_237 {dimension_numbers = #tpu.dot_dimension_numbers<[1], [0], [0], [1], [0, 0, 1, 1], [], []>} : vector<1x16xf32>, vector<16x120xf32>, vector<1x120xf32> -> vector<1x120xf32>
    %254 = arith.addf %250, %253 : vector<1x120xf32>
    %255 = vector.extract_strided_slice %245 {offsets = [32, 0], sizes = [1, 16], strides = [1, 1]} : vector<35x16xf32> to vector<1x16xf32>
    %c32_238 = arith.constant 32 : index
    %c0_239 = arith.constant 0 : index
    %256 = vector.load %arg6[%c32_238, %c0_239] : memref<64x120xf32, #tpu.memory_space<vmem>>, vector<16x120xf32>
    %cst_240 = arith.constant dense<0.000000e+00> : vector<1x120xf32>
    %257 = tpu.matmul %255, %256, %cst_240 {dimension_numbers = #tpu.dot_dimension_numbers<[1], [0], [0], [1], [0, 0, 1, 1], [], []>} : vector<1x16xf32>, vector<16x120xf32>, vector<1x120xf32> -> vector<1x120xf32>
    %258 = arith.addf %254, %257 : vector<1x120xf32>
    %259 = vector.extract_strided_slice %245 {offsets = [34, 0], sizes = [1, 16], strides = [1, 1]} : vector<35x16xf32> to vector<1x16xf32>
    %c48_241 = arith.constant 48 : index
    %c0_242 = arith.constant 0 : index
    %260 = vector.load %arg6[%c48_241, %c0_242] : memref<64x120xf32, #tpu.memory_space<vmem>>, vector<16x120xf32>
    %cst_243 = arith.constant dense<0.000000e+00> : vector<1x120xf32>
    %261 = tpu.matmul %259, %260, %cst_243 {dimension_numbers = #tpu.dot_dimension_numbers<[1], [0], [0], [1], [0, 0, 1, 1], [], []>} : vector<1x16xf32>, vector<16x120xf32>, vector<1x120xf32> -> vector<1x120xf32>
    %262 = arith.addf %258, %261 : vector<1x120xf32>
    %263 = math.tanh %262 : vector<1x120xf32>
    %c0_244 = arith.constant 0 : index
    %c0_245 = arith.constant 0 : index
    %264 = vector.load %arg8[%c0_244, %c0_245] : memref<120x84xf32, #tpu.memory_space<vmem>>, vector<120x84xf32>
    %cst_246 = arith.constant dense<0.000000e+00> : vector<1x84xf32>
    %265 = tpu.matmul %263, %264, %cst_246 {dimension_numbers = #tpu.dot_dimension_numbers<[1], [0], [0], [1], [0, 0, 1, 1], [], []>} : vector<1x120xf32>, vector<120x84xf32>, vector<1x84xf32> -> vector<1x84xf32>
    %c0_247 = arith.constant 0 : index
    %c0_248 = arith.constant 0 : index
    %266 = vector.load %arg9[%c0_247, %c0_248] : memref<1x84xf32, #tpu.memory_space<vmem>>, vector<1x84xf32>
    %267 = arith.addf %265, %266 : vector<1x84xf32>
    %268 = math.tanh %267 : vector<1x84xf32>
    %c0_249 = arith.constant 0 : index
    %c0_250 = arith.constant 0 : index
    %269 = vector.load %arg10[%c0_249, %c0_250] : memref<84x10xf32, #tpu.memory_space<vmem>>, vector<84x10xf32>
    %cst_251 = arith.constant dense<0.000000e+00> : vector<1x10xf32>
    %270 = tpu.matmul %268, %269, %cst_251 {dimension_numbers = #tpu.dot_dimension_numbers<[1], [0], [0], [1], [0, 0, 1, 1], [], []>} : vector<1x84xf32>, vector<84x10xf32>, vector<1x10xf32> -> vector<1x10xf32>
    %c0_252 = arith.constant 0 : index
    %c0_253 = arith.constant 0 : index
    %271 = vector.load %arg11[%c0_252, %c0_253] : memref<1x10xf32, #tpu.memory_space<vmem>>, vector<1x10xf32>
    %272 = arith.addf %270, %271 : vector<1x10xf32>
    %c0_254 = arith.constant 0 : index
    %c0_255 = arith.constant 0 : index
    %c0_256 = arith.constant 0 : index
    %273 = vector.load %arg12[%c0_254, %c0_255, %c0_256] : memref<1x1x10xf32, #tpu.memory_space<vmem>>, vector<1x1x10xf32>
    %274 = vector.shape_cast %273 : vector<1x1x10xf32> to vector<1x10xf32>
    %275 = vector.shape_cast %272 : vector<1x10xf32> to vector<1x1x10xf32>
    tpu.vector_store %arg12[%c0_254, %c0_255, %c0_256], %275 {strides = array<i32>} : memref<1x1x10xf32, #tpu.memory_space<vmem>>, vector<1x1x10xf32>,
    return
  }
  func.func @transform_0(%arg0: i32) -> (i32, i32, i32) {
    %c0_i32 = arith.constant 0 : i32
    %c0_i32_0 = arith.constant 0 : i32
    %c0_i32_1 = arith.constant 0 : i32
    return %arg0, %c0_i32, %c0_i32_0 : i32, i32, i32
  }
  func.func @transform_1(%arg0: i32) -> (i32, i32) {
    %c0_i32 = arith.constant 0 : i32
    %c0_i32_0 = arith.constant 0 : i32
    %c0_i32_1 = arith.constant 0 : i32
    return %c0_i32, %c0_i32_0 : i32, i32
  }
  func.func @transform_2(%arg0: i32) -> (i32, i32) {
    %c0_i32 = arith.constant 0 : i32
    %c0_i32_0 = arith.constant 0 : i32
    %c0_i32_1 = arith.constant 0 : i32
    return %c0_i32, %c0_i32_0 : i32, i32
  }
  func.func @transform_3(%arg0: i32) -> (i32, i32) {
    %c0_i32 = arith.constant 0 : i32
    %c0_i32_0 = arith.constant 0 : i32
    %c0_i32_1 = arith.constant 0 : i32
    return %c0_i32, %c0_i32_0 : i32, i32
  }
  func.func @transform_4(%arg0: i32) -> (i32, i32) {
    %c0_i32 = arith.constant 0 : i32
    %c0_i32_0 = arith.constant 0 : i32
    %c0_i32_1 = arith.constant 0 : i32
    return %c0_i32, %c0_i32_0 : i32, i32
  }
  func.func @transform_5(%arg0: i32) -> (i32, i32) {
    %c0_i32 = arith.constant 0 : i32
    %c0_i32_0 = arith.constant 0 : i32
    %c0_i32_1 = arith.constant 0 : i32
    return %c0_i32, %c0_i32_0 : i32, i32
  }
  func.func @transform_6(%arg0: i32) -> (i32, i32) {
    %c0_i32 = arith.constant 0 : i32
    %c0_i32_0 = arith.constant 0 : i32
    %c0_i32_1 = arith.constant 0 : i32
    return %c0_i32, %c0_i32_0 : i32, i32
  }
  func.func @transform_7(%arg0: i32) -> (i32, i32) {
    %c0_i32 = arith.constant 0 : i32
    %c0_i32_0 = arith.constant 0 : i32
    %c0_i32_1 = arith.constant 0 : i32
    return %c0_i32, %c0_i32_0 : i32, i32
  }
  func.func @transform_8(%arg0: i32) -> (i32, i32) {
    %c0_i32 = arith.constant 0 : i32
    %c0_i32_0 = arith.constant 0 : i32
    %c0_i32_1 = arith.constant 0 : i32
    return %c0_i32, %c0_i32_0 : i32, i32
  }
  func.func @transform_9(%arg0: i32) -> (i32, i32) {
    %c0_i32 = arith.constant 0 : i32
    %c0_i32_0 = arith.constant 0 : i32
    %c0_i32_1 = arith.constant 0 : i32
    return %c0_i32, %c0_i32_0 : i32, i32
  }
  func.func @transform_10(%arg0: i32) -> (i32, i32) {
    %c0_i32 = arith.constant 0 : i32
    %c0_i32_0 = arith.constant 0 : i32
    %c0_i32_1 = arith.constant 0 : i32
    return %c0_i32, %c0_i32_0 : i32, i32
  }
  func.func @transform_11(%arg0: i32) -> (i32, i32, i32) {
    %c0_i32 = arith.constant 0 : i32
    %c0_i32_0 = arith.constant 0 : i32
    %c0_i32_1 = arith.constant 0 : i32
    return %arg0, %c0_i32, %c0_i32_0 : i32, i32, i32
  }
}

</mosaic_0001>

<bundles_post_ra>
// kernel: cnn_forward_pallas.1
= control target key start
LH: loop header
LB: loop body
LE: loop exit
PB: predicated region body
PF: predicated region fallthrough
CT: control target
= control target key end

     0   :  { %s18595_s0 = inlined_call_operand.vmem [shape: f32[2,256,4], index: 0, kind: input, shape index: {}]   ;;  %s18596_s1 = inlined_call_operand.vmem [shape: f32[100,6], index: 1, kind: input, shape index: {}]   ;;  %s18597_s2 = inlined_call_operand.vmem [shape: f32[1,6], index: 2, kind: input, shape index: {}]   ;;  %s18598_s3 = inlined_call_operand.vmem [shape: f32[150,16], index: 3, kind: input, shape index: {}]   ;;  %s18599_s4 = inlined_call_operand.vmem [shape: f32[1,16], index: 4, kind: input, shape index: {}]   ;;  %s18600_s5 = inlined_call_operand.vmem [shape: f32[64,120], index: 5, kind: input, shape index: {}]   ;;  %s18601_s6 = inlined_call_operand.vmem [shape: f32[1,120], index: 6, kind: input, shape index: {}]   ;;  %s18602_s7 = inlined_call_operand.vmem [shape: f32[120,84], index: 7, kind: input, shape index: {}]   ;;  %s18603_s8 = inlined_call_operand.vmem [shape: f32[1,84], index: 8, kind: input, shape index: {}]   ;;  %s18604_s9 = inlined_call_operand.vmem [shape: f32[84,10], index: 9, kind: input, shape index: {}]   ;;  %s18605_s10 = inlined_call_operand.vmem [shape: f32[1,10], index: 10, kind: input, shape index: {}]   ;;  %s18606_s11 = inlined_call_operand.hbm [shape: f32[2,1,10], index: 11, kind: output, shape index: {}]  }
   0x1   :  { %18694 = sst [smem:[#allocation49_spill]] %s18595_s0 }
   0x2   :  { %16 = vsyncpa [#allocation5], 0 }
   0x3   :  { %18 = vsyncpa [#allocation5 + $0x1], 0  ;;  %s15625_s17 = smov 0   ;;  %s15627_s18 = smov 0  }
   0x4   :  { %s15629_s19 = smov 0   ;;  %s15631_s20 = smov 0  }
   0x5 LB: > { %s15646_s21 = sadd.s32 4294967295, %s15559_s20   ;;  %s11695_s22 = sadd.s32 4294967294, %s15559_s20   ;;  %s15559_s20 = sphi %s15631_s20, %s18865_s20   ;;  %s15555_s19 = sphi %s15629_s19, %s18864_s19   ;;  %s15551_s18 = sphi %s15627_s18, %s18863_s18   ;;  %s15547_s17 = sphi %s15625_s17, %s18862_s17  }
   0x6   : > { %s15650_s23 = sadd.s32 1, %s15559_s20   ;;  %s267_s24 = sadd.s32 1, %s15555_s19 }
   0x7   : > { %s264_s25 = ssub.s32 %s15559_s20, %s15650_s23  ;;  %p277_p0 = scmp.ne.s32.totalorder %s15555_s19, %s15551_s18 }
   0x8   : > { %p265_p1 = scmp.eq.s32.totalorder %s264_s25, 0  ;;  %p278_p2 = scmp.eq.s32.totalorder %s15646_s21, 1 }
   0x9   : > { %p283_p3 = scmp.ne.s32.totalorder %s15551_s18, %s15547_s17  ;;  %p284_p4 = scmp.eq.s32.totalorder %s11695_s22, 1 }
   0xa   : > { %s15661_s26 = scalar_select %p265_p1, %s15555_s19, %s267_s24  }
   0xb   : > { %p15663_p5 = por %p278_p2, %p277_p0  ;;  %p15667_p6 = por %p284_p4, %p283_p3 }
   0xc   : > { %p11698_p7 = scmp.ge.s32.totalorder %s15559_s20, 1  ;;  %p340_p8 = scmp.lt.s32.totalorder %s15559_s20, 3 }
   0xe   : > { %p341_p9 = pnand %p11698_p7, %p340_p8 }
  0x10   : > { %344 = sbr.rel (%p341_p9) target bundleno = 2534 (0x9e6), region = 64 }
  0x17   : > { %vm507_vm0 = vcmask 1043456   ;;  %v2192_v0 = vld [vmem:[%s18596_s1 + $0x18] sm:$0xf]  ;;  %p379_p10 = scmp.lt.s32.totalorder %s15646_s21, 1  ;;  %v2501_v1 = vld [vmem:[%s18596_s1 + $0x1c] sm:$0xf] }
  0x18   : > { %13532 = vmatprep.subr.msk.mxu0 %vm507_vm0, %v2192_v0  ;;  %vm434_vm1 = vcmask 31744   ;;  %s18697_s0 = sld [smem:[#allocation49_spill]]  ;;  %v2810_v5 = vld [vmem:[%s18596_s1 + $0x20] sm:$0xf]  ;;  %v3119_v16 = vld [vmem:[%s18596_s1 + $0x24] sm:$0xf] }
  0x19   : > { %13533 = vmatpush3.msk.msra.mxu0 %vm507_vm0, %v2192_v0  ;;  %s380_s14 = scalar_select %p379_p10, %s15646_s21, 1  ;;  %v3428_v41 = vld [vmem:[%s18596_s1 + $0x28] sm:$0xf]  ;;  %vm8332_vm2 = vcmask 1045504   ;;  %vm15562_vm3 = vmmov 0   ;;  %vm8118_vm4 = vcmask 48128  }
  0x1a   : > { %13570 = vmatprep.subr.msk.mxu0 %vm507_vm0, %v2501_v1  ;;  %vm8142_vm5 = vcmask 44032   ;;  %vm8303_vm6 = vcmask 43008   ;;  %vm11141_vm7 = vcmask 130048   ;;  %vm11461_vm8 = vcmask 982016   ;;  %s377_s22 = sand.u32 1, %s15551_s18   ;;  %s12485_s30 = sshll.u32 %s15646_s21, 4 }
  0x1b   : > { %s12488_s15 = sshll.u32 %s380_s14, 8  ;;  %vm11548_vm9 = vcmask 687104   ;;  %s378_s12 = scalar_lea.vmem [#allocation4], %s377_s22  ;;  %vm11625_vm10 = vcmask 73728  }
  0x1c   : > { %s11640_s13 = sshll.u32 %s378_s12, 4  ;;  %s11628_s16 = scalar_lea.sflag [#allocation5], %s377_s22  ;;  %s18555_s13 = int_to_ptr.vmem [resolvable:$true] %s11640_s13 }
  0x1d   : > { %s15497_s25 = scalar_lea.vmem %s18555_s13, 16  ;;  %s15564_s21 = smov [#allocation4]  }
  0x1e   : > { %s15687_s24 = scalar_lea.vmem %s18697_s0, %s12488_s15  ;;  %s18553_s15 = scalar_lea.hbm %s18606_s11, %s12485_s30 }
  0x1f   : > { %v15690_v2 = vld [vmem:[%s15687_s24 + $0x11] sm:$0xff]  ;;  %v15693_v3 = vld [vmem:[%s15687_s24 + $0x19] sm:$0xff]  ;;  %v15696_v4 = vld [vmem:[%s15687_s24 + $0x21] sm:$0xff]  ;;  %p15498_p11 = scmp.ne.s32.totalorder %s18555_s13, %s15497_s25  ;;  %s15501_s29 = sshll.u32 %s15564_s21, 4  ;;  %s15502_s29 = int_to_ptr.vmem [resolvable:$false] %s15501_s29 }
  0x20   : > { %13534 = vmatprep.mubr.msk.f32.mxu0 %vm434_vm1, %v15690_v2  ;;  %v15709_v6 = vld [vmem:[%s15687_s24 + $0x29] sm:$0xff]  ;;  %v15712_v7 = vld [vmem:[%s15687_s24 + $0x31] sm:$0xff]  ;;  %v15720_v8 = vld [vmem:[%s15687_s24 + $0x39] sm:$0xff]  ;;  %s15503_s0 = scalar_lea.vmem %s15502_s29, 32  ;;  %p15504_p0 = scmp.lt.s32.totalorder %s18555_s13, %s15502_s29 }
  0x21   : > { %13535 = vmatmul.mubr.msk.f32.vlgmr.msra.gmra.mrb[0].mxu0 %vm434_vm1, %v15693_v3  ;;  %v15723_v9 = vld [vmem:[%s15687_s24 + $0x41] sm:$0xff]  ;;  %v15730_v10 = vld [vmem:[%s15687_s24 + $0x49] sm:$0xff]  ;;  %v15733_v11 = vld [vmem:[%s15687_s24 + $0x51] sm:$0xff]  ;;  %p15499_p12 = pnand %p15498_p11, %p15663_p5  ;;  %p15505_p1 = scmp.lt.s32.totalorder %s15503_s0, %s15497_s25 }
  0x22   : > { %13571 = vmatpush3.msk.msra.mxu0 %vm507_vm0, %v2501_v1  ;;  %13537 = vmatprep.mubr.msk.f32.mxu0 %vm434_vm1, %v15696_v4  ;;  %v15740_v12 = vld [vmem:[%s15687_s24 + $0x59] sm:$0xff]  ;;  %v15748_v15 = vld [vmem:[%s15687_s24 + $0x22] sm:$0xff]  ;;  %v15758_v17 = vld [vmem:[%s15687_s24 + $0x2a] sm:$0xff] }
  0x23   : > { %13608 = vmatprep.subr.msk.mxu0 %vm507_vm0, %v2810_v5  ;;  %v2502_v13 = vld [vmem:[%s15687_s24 + $0x12] sm:$0xff]  ;;  %v2503_v14 = vld [vmem:[%s15687_s24 + $0x1a] sm:$0xff]  ;;  %v15772_v20 = vld [vmem:[%s15687_s24 + $0x42] sm:$0xff]  ;;  %p15500_p13 = pneg %p15499_p12  ;;  %p15506_p2 = por %p15505_p1, %p15504_p0 }
  0x24   : > { %v15761_v18 = vld [vmem:[%s15687_s24 + $0x32] sm:$0xff]  ;;  %v15769_v19 = vld [vmem:[%s15687_s24 + $0x3a] sm:$0xff]  ;;  %v15779_v21 = vld [vmem:[%s15687_s24 + $0x4a] sm:$0xff] }
  0x25   : > { %13538 = vmatmul.mubr.msk.f32.gmra.mrb[2].mxu0 %vm434_vm1, %v15709_v6  ;;  %v15782_v22 = vld [vmem:[%s15687_s24 + $0x52] sm:$0xff]  ;;  %v15789_v23 = vld [vmem:[%s15687_s24 + $0x5a] sm:$0xff]  ;;  %v15792_v24 = vld [vmem:[%s15687_s24 + $0x62] sm:$0xff]  ;;  %p15507_p3 = pnand %p15506_p2, %p15500_p13 }
  0x26   : > { %13540 = vmatprep.mubr.msk.f32.mxu0 %vm434_vm1, %v15712_v7  ;;  %v15799_v25 = vld [vmem:[%s15687_s24 + $0x6a] sm:$0xff]  ;;  %v15802_v26 = vld [vmem:[%s15687_s24 + $0x72] sm:$0xff]  ;;  %v15809_v27 = vld [vmem:[%s15687_s24 + $0x7a] sm:$0xff] }
  0x27   : > { %v15812_v28 = vld [vmem:[%s15687_s24 + $0x82] sm:$0xff]  ;;  %v15819_v29 = vld [vmem:[%s15687_s24 + $0x8a] sm:$0xff]  ;;  %v15822_v30 = vld [vmem:[%s15687_s24 + $0x92] sm:$0xff] }
  0x28   : > { %v15829_v31 = vld [vmem:[%s15687_s24 + $0x9a] sm:$0xff]  ;;  %v15832_v32 = vld [vmem:[%s15687_s24 + $0xa2] sm:$0xff]  ;;  %v15839_v33 = vld [vmem:[%s15687_s24 + $0xaa] sm:$0xff] }
  0x29   : > { %13541 = vmatmul.mubr.msk.f32.gmra.mrb[4].mxu0 %vm434_vm1, %v15720_v8  ;;  %v15842_v34 = vld [vmem:[%s15687_s24 + $0xb2] sm:$0xff]  ;;  %v15849_v35 = vld [vmem:[%s15687_s24 + $0xba] sm:$0xff]  ;;  %v15852_v36 = vld [vmem:[%s15687_s24 + $0xc2] sm:$0xff] }
  0x2a   : > { %13543 = vmatprep.mubr.msk.f32.mxu0 %vm434_vm1, %v15723_v9  ;;  %v2525_v37 = vld [vmem:[%s15687_s24 + $0xca] sm:$0xf]  ;;  %v2811_v38 = vld [vmem:[%s15687_s24 + $0x13] sm:$0xff]  ;;  %v2812_v39 = vld [vmem:[%s15687_s24 + $0x1b] sm:$0xff] }
  0x2b   : > { %v15864_v40 = vld [vmem:[%s15687_s24 + $0x23] sm:$0xff]  ;;  %v15874_v42 = vld [vmem:[%s15687_s24 + $0x2b] sm:$0xff]  ;;  %v15877_v43 = vld [vmem:[%s15687_s24 + $0x33] sm:$0xff] }
  0x2c   : > { %v15885_v44 = vld [vmem:[%s15687_s24 + $0x3b] sm:$0xff]  ;;  %v15888_v45 = vld [vmem:[%s15687_s24 + $0x43] sm:$0xff]  ;;  %v15895_v46 = vld [vmem:[%s15687_s24 + $0x4b] sm:$0xff] }
  0x2d   : > { %13544 = vmatmul.mubr.msk.f32.gmra.mrb[6].mxu0 %vm434_vm1, %v15730_v10  ;;  %v15898_v47 = vld [vmem:[%s15687_s24 + $0x53] sm:$0xff]  ;;  %v15905_v48 = vld [vmem:[%s15687_s24 + $0x5b] sm:$0xff]  ;;  %v15908_v49 = vld [vmem:[%s15687_s24 + $0x63] sm:$0xff] }
  0x2e   : > { %13546 = vmatprep.mubr.msk.f32.mxu0 %vm434_vm1, %v15733_v11  ;;  %18698 = vst [vmem:[#allocation7_spill] sm:$0xff] %v15898_v47  ;;  %18699 = vst [vmem:[#allocation8_spill] sm:$0xff] %v15905_v48  ;;  %v15915_v50 = vld [vmem:[%s15687_s24 + $0x6b] sm:$0xff]  ;;  %v15918_v51 = vld [vmem:[%s15687_s24 + $0x73] sm:$0xff] }
  0x2f   : > { %18700 = vst [vmem:[#allocation9_spill] sm:$0xff] %v15908_v49  ;;  %18701 = vst [vmem:[#allocation10_spill] sm:$0xff] %v15915_v50  ;;  %v15925_v52 = vld [vmem:[%s15687_s24 + $0x7b] sm:$0xff]  ;;  %v15928_v53 = vld [vmem:[%s15687_s24 + $0x83] sm:$0xff] }
  0x30   : > { %18702 = vst [vmem:[#allocation11_spill] sm:$0xff] %v15918_v51  ;;  %18703 = vst [vmem:[#allocation12_spill] sm:$0xff] %v15925_v52  ;;  %v15935_v54 = vld [vmem:[%s15687_s24 + $0x8b] sm:$0xff]  ;;  %v15938_v55 = vld [vmem:[%s15687_s24 + $0x93] sm:$0xff] }
  0x31   : > { %13547 = vmatmul.mubr.msk.f32.gmra.mrb[8].mxu0 %vm434_vm1, %v15740_v12  ;;  %18704 = vst [vmem:[#allocation13_spill] sm:$0xff] %v15928_v53  ;;  %18705 = vst [vmem:[#allocation14_spill] sm:$0xff] %v15935_v54  ;;  %v15945_v56 = vld [vmem:[%s15687_s24 + $0x9b] sm:$0xff]  ;;  %v15948_v57 = vld [vmem:[%s15687_s24 + $0xa3] sm:$0xff] }
  0x32   : > { %13572 = vmatprep.mubr.msk.f32.mxu0 %vm434_vm1, %v2502_v13  ;;  %18706 = vst [vmem:[#allocation15_spill] sm:$0xff] %v15938_v55  ;;  %18707 = vst [vmem:[#allocation16_spill] sm:$0xff] %v15945_v56  ;;  %v15955_v58 = vld [vmem:[%s15687_s24 + $0xab] sm:$0xff]  ;;  %v15958_v59 = vld [vmem:[%s15687_s24 + $0xb3] sm:$0xff] }
  0x33   : > { %18708 = vst [vmem:[#allocation17_spill] sm:$0xff] %v15948_v57  ;;  %18709 = vst [vmem:[#allocation18_spill] sm:$0xff] %v15955_v58  ;;  %v15965_v60 = vld [vmem:[%s15687_s24 + $0xbb] sm:$0xff]  ;;  %v15968_v61 = vld [vmem:[%s15687_s24 + $0xc3] sm:$0xff] }
  0x34   : > { %18710 = vst [vmem:[#allocation19_spill] sm:$0xff] %v15958_v59  ;;  %18711 = vst [vmem:[#allocation20_spill] sm:$0xff] %v15965_v60  ;;  %v2834_v62 = vld [vmem:[%s15687_s24 + $0xcb] sm:$0xf]  ;;  %v3120_v63 = vld [vmem:[%s15687_s24 + $0x14] sm:$0xff] }
  0x35   : > { %13573 = vmatmul.mubr.msk.f32.vlgmr.msra.gmra.mrb[0].mxu0 %vm434_vm1, %v2503_v14  ;;  %18712 = vst [vmem:[#allocation21_spill] sm:$0xff] %v15968_v61  ;;  %v3121_v0 = vld [vmem:[%s15687_s24 + $0x1c] sm:$0xff]  ;;  %v15980_v1 = vld [vmem:[%s15687_s24 + $0x24] sm:$0xff]  ;;  %v15990_v13 = vld [vmem:[%s15687_s24 + $0x2c] sm:$0xff] }
  0x36   : > { %13609 = vmatpush3.msk.msra.mxu0 %vm507_vm0, %v2810_v5  ;;  %13575 = vmatprep.mubr.msk.f32.mxu0 %vm434_vm1, %v15748_v15  ;;  %18713 = vst [vmem:[#allocation22_spill] sm:$0xff] %v15980_v1  ;;  %v3737_v5 = vld [vmem:[%s18596_s1 + $0x2c] sm:$0xf]  ;;  %18714 = vst [vmem:[#allocation23_spill] sm:$0xff] %v15990_v13  ;;  %v15993_v14 = vld [vmem:[%s15687_s24 + $0x34] sm:$0xff] }
  0x37   : > { %13646 = vmatprep.subr.msk.mxu0 %vm507_vm0, %v3119_v16  ;;  %18715 = vst [vmem:[#allocation24_spill] sm:$0xff] %v15993_v14 }
  0x39   : > { %13576 = vmatmul.mubr.msk.f32.gmra.mrb[2].mxu0 %vm434_vm1, %v15758_v17 }
  0x3a   : > { %13578 = vmatprep.mubr.msk.f32.mxu0 %vm434_vm1, %v15761_v18 }
  0x3d   : > { %13579 = vmatmul.mubr.msk.f32.gmra.mrb[4].mxu0 %vm434_vm1, %v15769_v19 }
  0x3e   : > { %13581 = vmatprep.mubr.msk.f32.mxu0 %vm434_vm1, %v15772_v20 }
  0x41   : > { %13582 = vmatmul.mubr.msk.f32.gmra.mrb[6].mxu0 %vm434_vm1, %v15779_v21 }
  0x42   : > { %13584 = vmatprep.mubr.msk.f32.mxu0 %vm434_vm1, %v15782_v22 }
  0x45   : > { %13585 = vmatmul.mubr.msk.f32.gmra.mrb[8].mxu0 %vm434_vm1, %v15789_v23 }
  0x46   : > { %13587 = vmatprep.mubr.msk.f32.mxu0 %vm434_vm1, %v15792_v24 }
  0x49   : > { %13588 = vmatmul.mubr.msk.f32.gmra.mrb[10].mxu0 %vm434_vm1, %v15799_v25 }
  0x4a   : > { %13590 = vmatprep.mubr.msk.f32.mxu0 %vm434_vm1, %v15802_v26 }
  0x4d   : > { %13591 = vmatmul.mubr.msk.f32.gmra.mrb[12].mxu0 %vm434_vm1, %v15809_v27 }
  0x4e   : > { %13593 = vmatprep.mubr.msk.f32.mxu0 %vm434_vm1, %v15812_v28 }
  0x51   : > { %13594 = vmatmul.mubr.msk.f32.gmra.mrb[14].mxu0 %vm434_vm1, %v15819_v29 }
  0x52   : > { %13596 = vmatprep.mubr.msk.f32.mxu0 %vm434_vm1, %v15822_v30 }
  0x55   : > { %13597 = vmatmul.mubr.msk.f32.gmra.mrb[16].mxu0 %vm434_vm1, %v15829_v31 }
  0x56   : > { %13599 = vmatprep.mubr.msk.f32.mxu0 %vm434_vm1, %v15832_v32 }
  0x59   : > { %13600 = vmatmul.mubr.msk.f32.gmra.mrb[18].mxu0 %vm434_vm1, %v15839_v33 }
  0x5a   : > { %13602 = vmatprep.mubr.msk.f32.mxu0 %vm434_vm1, %v15842_v34 }
  0x5d   : > { %13603 = vmatmul.mubr.msk.f32.gmra.mrb[20].mxu0 %vm434_vm1, %v15849_v35 }
  0x5e   : > { %13605 = vmatprep.mubr.msk.f32.mxu0 %vm434_vm1, %v15852_v36 }
  0x61   : > { %13606 = vmatmul.mubr.msk.f32.gmra.mrb[22].mxu0 %vm434_vm1, %v2525_v37  ;;  %v16004_v37 = vld [vmem:[%s15687_s24 + $0x44] sm:$0xff] }
  0x62   : > { %13610 = vmatprep.mubr.msk.f32.mxu0 %vm434_vm1, %v2811_v38  ;;  %18717 = vst [vmem:[#allocation26_spill] sm:$0xff] %v16004_v37  ;;  %v16011_v38 = vld [vmem:[%s15687_s24 + $0x4c] sm:$0xff] }
  0x63   : > { %18718 = vst [vmem:[#allocation27_spill] sm:$0xff] %v16011_v38 }
  0x65   : > { %13611 = vmatmul.mubr.msk.f32.vlgmr.msra.gmra.mrb[0].mxu0 %vm434_vm1, %v2812_v39  ;;  %v16014_v39 = vld [vmem:[%s15687_s24 + $0x54] sm:$0xff] }
  0x66   : > { %13647 = vmatpush3.msk.msra.mxu0 %vm507_vm0, %v3119_v16  ;;  %13613 = vmatprep.mubr.msk.f32.mxu0 %vm434_vm1, %v15864_v40  ;;  %v16001_v16 = vld [vmem:[%s15687_s24 + $0x3c] sm:$0xff]  ;;  %18719 = vst [vmem:[#allocation28_spill] sm:$0xff] %v16014_v39 }
  0x67   : > { %13684 = vmatprep.subr.msk.mxu0 %vm507_vm0, %v3428_v41  ;;  %18716 = vst [vmem:[#allocation25_spill] sm:$0xff] %v16001_v16 }
  0x69   : > { %13614 = vmatmul.mubr.msk.f32.gmra.mrb[2].mxu0 %vm434_vm1, %v15874_v42 }
  0x6a   : > { %13616 = vmatprep.mubr.msk.f32.mxu0 %vm434_vm1, %v15877_v43 }
  0x6d   : > { %13617 = vmatmul.mubr.msk.f32.gmra.mrb[4].mxu0 %vm434_vm1, %v15885_v44 }
  0x6e   : > { %13619 = vmatprep.mubr.msk.f32.mxu0 %vm434_vm1, %v15888_v45 }
  0x71   : > { %13620 = vmatmul.mubr.msk.f32.gmra.mrb[6].mxu0 %vm434_vm1, %v15895_v46 }
  0x72   : > { %13622 = vmatprep.mubr.msk.f32.mxu0 %vm434_vm1, %v15898_v47  ;;  %v16220_v47 = vld [vmem:[%s15687_s24 + $0xd0] sm:$0xff] }
  0x75   : > { %13623 = vmatmul.mubr.msk.f32.gmra.mrb[8].mxu0 %vm434_vm1, %v15905_v48  ;;  %v16217_v48 = vld [vmem:[%s15687_s24 + $0xc8] sm:$0xff] }
  0x76   : > { %13625 = vmatprep.mubr.msk.f32.mxu0 %vm434_vm1, %v15908_v49  ;;  %v16205_v49 = vld [vmem:[%s15687_s24 + $0xc0] sm:$0xff] }
  0x79   : > { %13626 = vmatmul.mubr.msk.f32.gmra.mrb[10].mxu0 %vm434_vm1, %v15915_v50  ;;  %v16201_v50 = vld [vmem:[%s15687_s24 + $0xb8] sm:$0xff] }
  0x7a   : > { %13628 = vmatprep.mubr.msk.f32.mxu0 %vm434_vm1, %v15918_v51  ;;  %v411_v51 = vld [vmem:[%s15687_s24 + $0x9] sm:$0xff] }
  0x7d   : > { %13629 = vmatmul.mubr.msk.f32.gmra.mrb[12].mxu0 %vm434_vm1, %v15925_v52  ;;  %v410_v52 = vld [vmem:[%s15687_s24 + $0x1] sm:$0xff] }
  0x7e   : > { %13631 = vmatprep.mubr.msk.f32.mxu0 %vm434_vm1, %v15928_v53  ;;  %v409_v53 = vld [vmem:[%s18596_s1 + $0x4] sm:$0xf]  ;;  %13306 = vmatprep.mubr.msk.f32.mxu1 %vm434_vm1, %v410_v52  ;;  %v16331_v52 = vld [vmem:[%s15687_s24 + $0xa9] sm:$0xff] }
  0x7f   : > { %13304 = vmatprep.subr.msk.mxu1 %vm507_vm0, %v409_v53  ;;  %18738 = vst [vmem:[#allocation47_spill] sm:$0xff] %v16331_v52 }
  0x80   : > { %13305 = vmatpush3.msk.msra.mxu1 %vm507_vm0, %v409_v53  ;;  %v16334_v53 = vld [vmem:[%s15687_s24 + $0xb1] sm:$0xff] }
  0x81   : > { %13632 = vmatmul.mubr.msk.f32.gmra.mrb[14].mxu0 %vm434_vm1, %v15935_v54  ;;  %v16189_v54 = vld [vmem:[%s15687_s24 + $0xb0] sm:$0xff]  ;;  %13307 = vmatmul.mubr.msk.f32.vlgmr.msra.gmra.mrb[0].mxu1 %vm434_vm1, %v411_v51  ;;  %v16320_v51 = vld [vmem:[%s15687_s24 + $0xa1] sm:$0xff]  ;;  %18739 = vst [vmem:[#allocation48_spill] sm:$0xff] %v16334_v53 }
  0x82   : > { %13634 = vmatprep.mubr.msk.f32.mxu0 %vm434_vm1, %v15938_v55  ;;  %v16186_v55 = vld [vmem:[%s15687_s24 + $0xa8] sm:$0xff]  ;;  %13309 = vmatprep.mubr.msk.f32.mxu1 %vm434_vm1, %v15690_v2  ;;  %v3452_v2 = vld [vmem:[%s15687_s24 + $0xd8] sm:$0xf]  ;;  %18737 = vst [vmem:[#allocation46_spill] sm:$0xff] %v16320_v51 }
  0x85   : > { %13635 = vmatmul.mubr.msk.f32.gmra.mrb[16].mxu0 %vm434_vm1, %v15945_v56  ;;  %v16179_v56 = vld [vmem:[%s15687_s24 + $0xa0] sm:$0xff]  ;;  %13310 = vmatmul.mubr.msk.f32.gmra.mrb[2].mxu1 %vm434_vm1, %v15693_v3  ;;  %v16241_v3 = vld [vmem:[%s18596_s1 + $0x34] sm:$0xf] }
  0x86   : > { %13637 = vmatprep.mubr.msk.f32.mxu0 %vm434_vm1, %v15948_v57  ;;  %v16176_v57 = vld [vmem:[%s15687_s24 + $0x98] sm:$0xff]  ;;  %13312 = vmatprep.mubr.msk.f32.mxu1 %vm434_vm1, %v15696_v4 }
  0x89   : > { %13638 = vmatmul.mubr.msk.f32.gmra.mrb[18].mxu0 %vm434_vm1, %v15955_v58  ;;  %v16169_v58 = vld [vmem:[%s15687_s24 + $0x90] sm:$0xff]  ;;  %13313 = vmatmul.mubr.msk.f32.gmra.mrb[4].mxu1 %vm434_vm1, %v15709_v6 }
  0x8a   : > { %13640 = vmatprep.mubr.msk.f32.mxu0 %vm434_vm1, %v15958_v59  ;;  %v16166_v59 = vld [vmem:[%s15687_s24 + $0x88] sm:$0xff]  ;;  %13315 = vmatprep.mubr.msk.f32.mxu1 %vm434_vm1, %v15712_v7 }
  0x8d   : > { %13641 = vmatmul.mubr.msk.f32.gmra.mrb[20].mxu0 %vm434_vm1, %v15965_v60  ;;  %v16159_v60 = vld [vmem:[%s15687_s24 + $0x80] sm:$0xff]  ;;  %13316 = vmatmul.mubr.msk.f32.gmra.mrb[6].mxu1 %vm434_vm1, %v15720_v8 }
  0x8e   : > { %13643 = vmatprep.mubr.msk.f32.mxu0 %vm434_vm1, %v15968_v61  ;;  %v16156_v61 = vld [vmem:[%s15687_s24 + $0x78] sm:$0xff]  ;;  %13318 = vmatprep.mubr.msk.f32.mxu1 %vm434_vm1, %v15723_v9 }
  0x91   : > { %13644 = vmatmul.mubr.msk.f32.gmra.mrb[22].mxu0 %vm434_vm1, %v2834_v62  ;;  %v16024_v62 = vld [vmem:[%s15687_s24 + $0x64] sm:$0xff]  ;;  %13319 = vmatmul.mubr.msk.f32.gmra.mrb[8].mxu1 %vm434_vm1, %v15730_v10 }
  0x92   : > { %13648 = vmatprep.mubr.msk.f32.mxu0 %vm434_vm1, %v3120_v63  ;;  %18721 = vst [vmem:[#allocation30_spill] sm:$0xff] %v16024_v62  ;;  %v16031_v63 = vld [vmem:[%s15687_s24 + $0x6c] sm:$0xff]  ;;  %13321 = vmatprep.mubr.msk.f32.mxu1 %vm434_vm1, %v15733_v11 }
  0x93   : > { %18722 = vst [vmem:[#allocation31_spill] sm:$0xff] %v16031_v63 }
  0x95   : > { %13649 = vmatmul.mubr.msk.f32.vlgmr.msra.gmra.mrb[0].mxu0 %vm434_vm1, %v3121_v0  ;;  %v16034_v0 = vld [vmem:[%s15687_s24 + $0x74] sm:$0xff]  ;;  %13322 = vmatmul.mubr.msk.f32.gmra.mrb[10].mxu1 %vm434_vm1, %v15740_v12 }
  0x96   : > { %13685 = vmatpush3.msk.msra.mxu0 %vm507_vm0, %v3428_v41  ;;  %13651 = vmatprep.mubr.msk.f32.mxu0 %vm434_vm1, %v15980_v1  ;;  %v16021_v41 = vld [vmem:[%s15687_s24 + $0x5c] sm:$0xff]  ;;  %18723 = vst [vmem:[#allocation32_spill] sm:$0xff] %v16034_v0  ;;  %v16149_v1 = vld [vmem:[%s15687_s24 + $0x70] sm:$0xff] }
  0x97   : > { %13722 = vmatprep.subr.msk.mxu0 %vm507_vm0, %v3737_v5  ;;  %18720 = vst [vmem:[#allocation29_spill] sm:$0xff] %v16021_v41 }
  0x99   : > { %13652 = vmatmul.mubr.msk.f32.gmra.mrb[2].mxu0 %vm434_vm1, %v15990_v13  ;;  %v16146_v13 = vld [vmem:[%s15687_s24 + $0x68] sm:$0xff] }
  0x9a   : > { %13654 = vmatprep.mubr.msk.f32.mxu0 %vm434_vm1, %v15993_v14  ;;  %v16139_v14 = vld [vmem:[%s15687_s24 + $0x60] sm:$0xff] }
  0x9d   : > { %13655 = vmatmul.mubr.msk.f32.gmra.mrb[4].mxu0 %vm434_vm1, %v16001_v16  ;;  %v16136_v16 = vld [vmem:[%s15687_s24 + $0x58] sm:$0xff] }
  0x9e   : > { %13657 = vmatprep.mubr.msk.f32.mxu0 %vm434_vm1, %v16004_v37  ;;  %v16129_v37 = vld [vmem:[%s15687_s24 + $0x50] sm:$0xff] }
  0xa1   : > { %13658 = vmatmul.mubr.msk.f32.gmra.mrb[6].mxu0 %vm434_vm1, %v16011_v38  ;;  %v16044_v38 = vld [vmem:[%s15687_s24 + $0x84] sm:$0xff] }
  0xa2   : > { %13660 = vmatprep.mubr.msk.f32.mxu0 %vm434_vm1, %v16014_v39  ;;  %v16041_v39 = vld [vmem:[%s15687_s24 + $0x7c] sm:$0xff]  ;;  %18725 = vst [vmem:[#allocation34_spill] sm:$0xff] %v16044_v38 }
  0xa3   : > { %18724 = vst [vmem:[#allocation33_spill] sm:$0xff] %v16041_v39 }
  0xa5   : > { %13661 = vmatmul.mubr.msk.f32.gmra.mrb[8].mxu0 %vm434_vm1, %v16021_v41  ;;  %v16054_v41 = vld [vmem:[%s15687_s24 + $0x94] sm:$0xff] }
  0xa6   : > { %13663 = vmatprep.mubr.msk.f32.mxu0 %vm434_vm1, %v16024_v62  ;;  %v16051_v62 = vld [vmem:[%s15687_s24 + $0x8c] sm:$0xff]  ;;  %18727 = vst [vmem:[#allocation36_spill] sm:$0xff] %v16054_v41 }
  0xa7   : > { %18726 = vst [vmem:[#allocation35_spill] sm:$0xff] %v16051_v62 }
  0xa9   : > { %13664 = vmatmul.mubr.msk.f32.gmra.mrb[10].mxu0 %vm434_vm1, %v16031_v63  ;;  %v16064_v63 = vld [vmem:[%s15687_s24 + $0xa4] sm:$0xff] }
  0xaa   : > { %13666 = vmatprep.mubr.msk.f32.mxu0 %vm434_vm1, %v16034_v0  ;;  %v16061_v0 = vld [vmem:[%s15687_s24 + $0x9c] sm:$0xff]  ;;  %18729 = vst [vmem:[#allocation38_spill] sm:$0xff] %v16064_v63 }
  0xab   : > { %18728 = vst [vmem:[#allocation37_spill] sm:$0xff] %v16061_v0 }
  0xad   : > { %13667 = vmatmul.mubr.msk.f32.gmra.mrb[12].mxu0 %vm434_vm1, %v16041_v39  ;;  %v16074_v39 = vld [vmem:[%s15687_s24 + $0xb4] sm:$0xff] }
  0xae   : > { %13669 = vmatprep.mubr.msk.f32.mxu0 %vm434_vm1, %v16044_v38  ;;  %v16071_v38 = vld [vmem:[%s15687_s24 + $0xac] sm:$0xff]  ;;  %18731 = vst [vmem:[#allocation40_spill] sm:$0xff] %v16074_v39 }
  0xaf   : > { %18730 = vst [vmem:[#allocation39_spill] sm:$0xff] %v16071_v38 }
  0xb1   : > { %13670 = vmatmul.mubr.msk.f32.gmra.mrb[14].mxu0 %vm434_vm1, %v16051_v62  ;;  %v16084_v62 = vld [vmem:[%s15687_s24 + $0xc4] sm:$0xff] }
  0xb2   : > { %13672 = vmatprep.mubr.msk.f32.mxu0 %vm434_vm1, %v16054_v41  ;;  %v16081_v41 = vld [vmem:[%s15687_s24 + $0xbc] sm:$0xff]  ;;  %18733 = vst [vmem:[#allocation42_spill] sm:$0xff] %v16084_v62 }
  0xb3   : > { %18732 = vst [vmem:[#allocation41_spill] sm:$0xff] %v16081_v41 }
  0xb5   : > { %13673 = vmatmul.mubr.msk.f32.gmra.mrb[16].mxu0 %vm434_vm1, %v16061_v0  ;;  %v16092_v0 = vld [vmem:[%s15687_s24 + $0x20] sm:$0xff] }
  0xb6   : > { %13675 = vmatprep.mubr.msk.f32.mxu0 %vm434_vm1, %v16064_v63  ;;  %v3143_v63 = vld [vmem:[%s15687_s24 + $0xcc] sm:$0xf] }
  0xb9   : > { %13676 = vmatmul.mubr.msk.f32.gmra.mrb[18].mxu0 %vm434_vm1, %v16071_v38  ;;  %v16101_v38 = vld [vmem:[%s15687_s24 + $0x30] sm:$0xff] }
  0xba   : > { %13678 = vmatprep.mubr.msk.f32.mxu0 %vm434_vm1, %v16074_v39  ;;  %v16098_v39 = vld [vmem:[%s15687_s24 + $0x28] sm:$0xff] }
  0xbd   : > { %13679 = vmatmul.mubr.msk.f32.gmra.mrb[20].mxu0 %vm434_vm1, %v16081_v41  ;;  %v16117_v41 = vld [vmem:[%s15687_s24 + $0x40] sm:$0xff] }
  0xbe   : > { %13681 = vmatprep.mubr.msk.f32.mxu0 %vm434_vm1, %v16084_v62  ;;  %v16106_v62 = vld [vmem:[%s18596_s1 + $0x30] sm:$0xf] }
  0xc1   : > { %13682 = vmatmul.mubr.msk.f32.gmra.mrb[22].mxu0 %vm434_vm1, %v3143_v63  ;;  %v16114_v63 = vld [vmem:[%s15687_s24 + $0x38] sm:$0xff] }
  0xc2   : > { %13686 = vmatprep.mubr.msk.f32.mxu0 %vm434_vm1, %v16092_v0 }
  0xc5   : > { %13687 = vmatmul.mubr.msk.f32.vlgmr.msra.gmra.mrb[0].mxu0 %vm434_vm1, %v16098_v39 }
  0xc6   : > { %13723 = vmatpush3.msk.msra.mxu0 %vm507_vm0, %v3737_v5  ;;  %13689 = vmatprep.mubr.msk.f32.mxu0 %vm434_vm1, %v16101_v38  ;;  %v16126_v5 = vld [vmem:[%s15687_s24 + $0x48] sm:$0xff] }
  0xc7   : > { %13760 = vmatprep.subr.msk.mxu0 %vm507_vm0, %v16106_v62 }
  0xc9   : > { %13690 = vmatmul.mubr.msk.f32.gmra.mrb[2].mxu0 %vm434_vm1, %v16114_v63 }
  0xca   : > { %13692 = vmatprep.mubr.msk.f32.mxu0 %vm434_vm1, %v16117_v41 }
  0xcd   : > { %13693 = vmatmul.mubr.msk.f32.gmra.mrb[4].mxu0 %vm434_vm1, %v16126_v5 }
  0xce   : > { %13695 = vmatprep.mubr.msk.f32.mxu0 %vm434_vm1, %v16129_v37 }
  0xd1   : > { %13696 = vmatmul.mubr.msk.f32.gmra.mrb[6].mxu0 %vm434_vm1, %v16136_v16 }
  0xd2   : > { %13698 = vmatprep.mubr.msk.f32.mxu0 %vm434_vm1, %v16139_v14 }
  0xd5   : > { %13699 = vmatmul.mubr.msk.f32.gmra.mrb[8].mxu0 %vm434_vm1, %v16146_v13 }
  0xd6   : > { %13701 = vmatprep.mubr.msk.f32.mxu0 %vm434_vm1, %v16149_v1 }
  0xd9   : > { %13702 = vmatmul.mubr.msk.f32.gmra.mrb[10].mxu0 %vm434_vm1, %v16156_v61 }
  0xda   : > { %13704 = vmatprep.mubr.msk.f32.mxu0 %vm434_vm1, %v16159_v60 }
  0xdd   : > { %13705 = vmatmul.mubr.msk.f32.gmra.mrb[12].mxu0 %vm434_vm1, %v16166_v59 }
  0xde   : > { %13707 = vmatprep.mubr.msk.f32.mxu0 %vm434_vm1, %v16169_v58 }
  0xe1   : > { %13708 = vmatmul.mubr.msk.f32.gmra.mrb[14].mxu0 %vm434_vm1, %v16176_v57 }
  0xe2   : > { %13710 = vmatprep.mubr.msk.f32.mxu0 %vm434_vm1, %v16179_v56 }
  0xe5   : > { %13711 = vmatmul.mubr.msk.f32.gmra.mrb[16].mxu0 %vm434_vm1, %v16186_v55 }
  0xe6   : > { %13713 = vmatprep.mubr.msk.f32.mxu0 %vm434_vm1, %v16189_v54 }
  0xe9   : > { %13714 = vmatmul.mubr.msk.f32.gmra.mrb[18].mxu0 %vm434_vm1, %v16201_v50 }
  0xea   : > { %13716 = vmatprep.mubr.msk.f32.mxu0 %vm434_vm1, %v16205_v49 }
  0xed   : > { %13717 = vmatmul.mubr.msk.f32.gmra.mrb[20].mxu0 %vm434_vm1, %v16217_v48 }
  0xee   : > { %13719 = vmatprep.mubr.msk.f32.mxu0 %vm434_vm1, %v16220_v47 }
  0xf1   : > { %13720 = vmatmul.mubr.msk.f32.gmra.mrb[22].mxu0 %vm434_vm1, %v3452_v2  ;;  %v384_v2 = vld [vmem:[%s18596_s1] sm:$0xf] }
  0xf2   : > { %13724 = vmatprep.mubr.msk.f32.mxu0 %vm434_vm1, %v15696_v4  ;;  %v16264_v4 = vld [vmem:[%s15687_s24 + $0x61] sm:$0xff]  ;;  %13342 = vmatprep.subr.msk.mxu1 %vm507_vm0, %v384_v2 }
  0xf3   : > { %13324 = vmatprep.mubr.msk.f32.mxu1 %vm434_vm1, %v16264_v4  ;;  %13343 = vmatpush3.msk.msra.mxu1 %vm507_vm0, %v384_v2  ;;  %v16381_v2 = vld [vmem:[%s15687_s24 + $0xd1] sm:$0xff] }
  0xf5   : > { %13725 = vmatmul.mubr.msk.f32.vlgmr.msra.gmra.mrb[0].mxu0 %vm434_vm1, %v15709_v6  ;;  %v16275_v6 = vld [vmem:[%s15687_s24 + $0x69] sm:$0xff] }
  0xf6   : > { %13761 = vmatpush3.msk.msra.mxu0 %vm507_vm0, %v16106_v62  ;;  %13727 = vmatprep.mubr.msk.f32.mxu0 %vm434_vm1, %v15712_v7  ;;  %v16278_v7 = vld [vmem:[%s15687_s24 + $0x71] sm:$0xff]  ;;  %v433_v62 = vld [vmem:[%s15687_s24 + $0xb9] sm:$0xf] }
  0xf7   : > { %13798 = vmatprep.subr.msk.mxu0 %vm507_vm0, %v16241_v3  ;;  %13325 = vmatmul.mubr.msk.f32.gmra.mrb[12].mxu1 %vm434_vm1, %v16275_v6 }
  0xf8   : > { %13327 = vmatprep.mubr.msk.f32.mxu1 %vm434_vm1, %v16278_v7 }
  0xf9   : > { %13728 = vmatmul.mubr.msk.f32.gmra.mrb[2].mxu0 %vm434_vm1, %v15720_v8  ;;  %v16289_v8 = vld [vmem:[%s15687_s24 + $0x79] sm:$0xff] }
  0xfa   : > { %13730 = vmatprep.mubr.msk.f32.mxu0 %vm434_vm1, %v15723_v9  ;;  %v16292_v9 = vld [vmem:[%s15687_s24 + $0x81] sm:$0xff] }
  0xfb   : > { %13328 = vmatmul.mubr.msk.f32.gmra.mrb[14].mxu1 %vm434_vm1, %v16289_v8 }
  0xfc   : > { %13330 = vmatprep.mubr.msk.f32.mxu1 %vm434_vm1, %v16292_v9 }
  0xfd   : > { %13731 = vmatmul.mubr.msk.f32.gmra.mrb[4].mxu0 %vm434_vm1, %v15730_v10  ;;  %v16303_v10 = vld [vmem:[%s15687_s24 + $0x89] sm:$0xff] }
  0xfe   : > { %13733 = vmatprep.mubr.msk.f32.mxu0 %vm434_vm1, %v15733_v11  ;;  %18734 = vst [vmem:[#allocation43_spill] sm:$0xff] %v16303_v10  ;;  %v16306_v11 = vld [vmem:[%s15687_s24 + $0x91] sm:$0xff] }
  0xff   : > { %18735 = vst [vmem:[#allocation44_spill] sm:$0xff] %v16306_v11  ;;  %13331 = vmatmul.mubr.msk.f32.gmra.mrb[16].mxu1 %vm434_vm1, %v16303_v10 }
 0x100   : > { %13333 = vmatprep.mubr.msk.f32.mxu1 %vm434_vm1, %v16306_v11 }
 0x101   : > { %13734 = vmatmul.mubr.msk.f32.gmra.mrb[6].mxu0 %vm434_vm1, %v15740_v12  ;;  %v16317_v12 = vld [vmem:[%s15687_s24 + $0x99] sm:$0xff] }
 0x102   : > { %13736 = vmatprep.mubr.msk.f32.mxu0 %vm434_vm1, %v16264_v4  ;;  %18736 = vst [vmem:[#allocation45_spill] sm:$0xff] %v16317_v12 }
 0x103   : > { %13334 = vmatmul.mubr.msk.f32.gmra.mrb[18].mxu1 %vm434_vm1, %v16317_v12 }
 0x104   : > { %13336 = vmatprep.mubr.msk.f32.mxu1 %vm434_vm1, %v16320_v51 }
 0x105   : > { %13737 = vmatmul.mubr.msk.f32.gmra.mrb[8].mxu0 %vm434_vm1, %v16275_v6 }
 0x106   : > { %13739 = vmatprep.mubr.msk.f32.mxu0 %vm434_vm1, %v16278_v7 }
 0x107   : > { %13337 = vmatmul.mubr.msk.f32.gmra.mrb[20].mxu1 %vm434_vm1, %v16331_v52 }
 0x108   : > { %13339 = vmatprep.mubr.msk.f32.mxu1 %vm434_vm1, %v16334_v53 }
 0x109   : > { %13740 = vmatmul.mubr.msk.f32.gmra.mrb[10].mxu0 %vm434_vm1, %v16289_v8 }
 0x10a   : > { %13742 = vmatprep.mubr.msk.f32.mxu0 %vm434_vm1, %v16292_v9 }
 0x10b   : > { %13340 = vmatmul.mubr.msk.f32.gmra.mrb[22].mxu1 %vm434_vm1, %v433_v62  ;;  %v16360_v62 = vld [vmem:[%s15687_s24 + $0xc1] sm:$0xff] }
 0x10d   : > { %13743 = vmatmul.mubr.msk.f32.gmra.mrb[12].mxu0 %vm434_vm1, %v16303_v10  ;;  %v16356_v10 = vld [vmem:[%s15687_s24 + $0xb9] sm:$0xff] }
 0x10e   : > { %13745 = vmatprep.mubr.msk.f32.mxu0 %vm434_vm1, %v16306_v11  ;;  %v386_v11 = vld [vmem:[%s15687_s24 + $0x8] sm:$0xff] }
 0x111   : > { %13746 = vmatmul.mubr.msk.f32.gmra.mrb[14].mxu0 %vm434_vm1, %v16317_v12  ;;  %v385_v12 = vld [vmem:[%s15687_s24] sm:$0xff] }
 0x112   : > { %13748 = vmatprep.mubr.msk.f32.mxu0 %vm434_vm1, %v16320_v51  ;;  %13344 = vmatprep.mubr.msk.f32.mxu1 %vm434_vm1, %v385_v12  ;;  %v16371_v51 = vld [vmem:[%s15687_s24 + $0x18] sm:$0xff] }
 0x113   : > { %13345 = vmatmul.mubr.msk.f32.vlgmr.msra.gmra.mrb[0].mxu1 %vm434_vm1, %v386_v11  ;;  %v3761_v11 = vld [vmem:[%s15687_s24 + $0xd9] sm:$0xf] }
 0x114   : > { %v16402_v12 = vld [vmem:[%s18596_s1 + $0x38] sm:$0xf] }
 0x115   : > { %13749 = vmatmul.mubr.msk.f32.gmra.mrb[16].mxu0 %vm434_vm1, %v16331_v52  ;;  %v16368_v52 = vld [vmem:[%s15687_s24 + $0x10] sm:$0xff] }
 0x116   : > { %13751 = vmatprep.mubr.msk.f32.mxu0 %vm434_vm1, %v16334_v53  ;;  %v16376_v53 = vld [vmem:[%s15687_s24 + $0xc9] sm:$0xff]  ;;  %13347 = vmatprep.mubr.msk.f32.mxu1 %vm434_vm1, %v16368_v52 }
 0x117   : > { %13348 = vmatmul.mubr.msk.f32.gmra.mrb[2].mxu1 %vm434_vm1, %v16371_v51 }
 0x118   : > { %13350 = vmatprep.mubr.msk.f32.mxu1 %vm434_vm1, %v16092_v0  ;;  %v16596_v0 = vld [vmem:[%s15687_s24 + $0x8a] sm:$0xff] }
 0x119   : > { %13752 = vmatmul.mubr.msk.f32.gmra.mrb[18].mxu0 %vm434_vm1, %v16356_v10 }
 0x11a   : > { %13754 = vmatprep.mubr.msk.f32.mxu0 %vm434_vm1, %v16360_v62 }
 0x11b   : > { %13351 = vmatmul.mubr.msk.f32.gmra.mrb[4].mxu1 %vm434_vm1, %v16098_v39  ;;  %v16593_v39 = vld [vmem:[%s15687_s24 + $0x82] sm:$0xff] }
 0x11c   : > { %13353 = vmatprep.mubr.msk.f32.mxu1 %vm434_vm1, %v16101_v38 }
 0x11d   : > { %13755 = vmatmul.mubr.msk.f32.gmra.mrb[20].mxu0 %vm434_vm1, %v16376_v53 }
 0x11e   : > { %13757 = vmatprep.mubr.msk.f32.mxu0 %vm434_vm1, %v16381_v2 }
 0x11f   : > { %13354 = vmatmul.mubr.msk.f32.gmra.mrb[6].mxu1 %vm434_vm1, %v16114_v63 }
 0x120   : > { %13356 = vmatprep.mubr.msk.f32.mxu1 %vm434_vm1, %v16117_v41 }
 0x121   : > { %13758 = vmatmul.mubr.msk.f32.gmra.mrb[22].mxu0 %vm434_vm1, %v3761_v11  ;;  %v16605_v11 = vld [vmem:[%s15687_s24 + $0x92] sm:$0xff] }
 0x122   : > { %13762 = vmatprep.mubr.msk.f32.mxu0 %vm434_vm1, %v15748_v15  ;;  %v408_v15 = vld [vmem:[%s15687_s24 + $0xb8] sm:$0xf] }
 0x123   : > { %13357 = vmatmul.mubr.msk.f32.gmra.mrb[8].mxu1 %vm434_vm1, %v16126_v5 }
 0x124   : > { %13359 = vmatprep.mubr.msk.f32.mxu1 %vm434_vm1, %v16129_v37 }
 0x125   : > { %13763 = vmatmul.mubr.msk.f32.vlgmr.msra.gmra.mrb[0].mxu0 %vm434_vm1, %v15758_v17  ;;  %v956_v17 = vld [vmem:[%s18596_s1 + $0x8] sm:$0xf] }
 0x126   : > { %13799 = vmatpush3.msk.msra.mxu0 %vm507_vm0, %v16241_v3  ;;  %13765 = vmatprep.mubr.msk.f32.mxu0 %vm434_vm1, %v15761_v18  ;;  %v957_v18 = vld [vmem:[%s15687_s24 + $0x2] sm:$0xff]  ;;  %v18745_v3 = vld [vmem:[#allocation12_spill] sm:$0xff] }
 0x127   : > { %13836 = vmatprep.subr.msk.mxu0 %vm507_vm0, %v16402_v12  ;;  %13360 = vmatmul.mubr.msk.f32.gmra.mrb[10].mxu1 %vm434_vm1, %v16136_v16 }
 0x128   : > { %13362 = vmatprep.mubr.msk.f32.mxu1 %vm434_vm1, %v16139_v14  ;;  %13380 = vmatprep.subr.msk.mxu1 %vm507_vm0, %v956_v17 }
 0x129   : > { %13766 = vmatmul.mubr.msk.f32.gmra.mrb[2].mxu0 %vm434_vm1, %v15769_v19  ;;  %v958_v19 = vld [vmem:[%s15687_s24 + $0xa] sm:$0xff]  ;;  %13381 = vmatpush3.msk.msra.mxu1 %vm507_vm0, %v956_v17 }
 0x12a   : > { %13768 = vmatprep.mubr.msk.f32.mxu0 %vm434_vm1, %v15772_v20  ;;  %v959_v20 = vld [vmem:[%s15687_s24 + $0x12] sm:$0xff]  ;;  %v18747_v17 = vld [vmem:[#allocation14_spill] sm:$0xff] }
 0x12b   : > { %13363 = vmatmul.mubr.msk.f32.gmra.mrb[12].mxu1 %vm434_vm1, %v16146_v13 }
 0x12c   : > { %13365 = vmatprep.mubr.msk.f32.mxu1 %vm434_vm1, %v16149_v1 }
 0x12d   : > { %13769 = vmatmul.mubr.msk.f32.gmra.mrb[4].mxu0 %vm434_vm1, %v15779_v21  ;;  %v960_v21 = vld [vmem:[%s15687_s24 + $0x1a] sm:$0xff] }
 0x12e   : > { %13771 = vmatprep.mubr.msk.f32.mxu0 %vm434_vm1, %v15782_v22  ;;  %v16494_v22 = vld [vmem:[%s15687_s24 + $0xca] sm:$0xff] }
 0x12f   : > { %13366 = vmatmul.mubr.msk.f32.gmra.mrb[14].mxu1 %vm434_vm1, %v16156_v61 }
 0x130   : > { %13368 = vmatprep.mubr.msk.f32.mxu1 %vm434_vm1, %v16159_v60 }
 0x131   : > { %13772 = vmatmul.mubr.msk.f32.gmra.mrb[6].mxu0 %vm434_vm1, %v15789_v23  ;;  %v16498_v23 = vld [vmem:[%s15687_s24 + $0xd2] sm:$0xff] }
 0x132   : > { %13774 = vmatprep.mubr.msk.f32.mxu0 %vm434_vm1, %v15792_v24  ;;  %v961_v24 = vld [vmem:[%s15687_s24 + $0x22] sm:$0xff] }
 0x133   : > { %13369 = vmatmul.mubr.msk.f32.gmra.mrb[16].mxu1 %vm434_vm1, %v16166_v59 }
 0x134   : > { %13371 = vmatprep.mubr.msk.f32.mxu1 %vm434_vm1, %v16169_v58 }
 0x135   : > { %13775 = vmatmul.mubr.msk.f32.gmra.mrb[8].mxu0 %vm434_vm1, %v15799_v25  ;;  %v962_v25 = vld [vmem:[%s15687_s24 + $0x2a] sm:$0xff] }
 0x136   : > { %13777 = vmatprep.mubr.msk.f32.mxu0 %vm434_vm1, %v15802_v26  ;;  %v4070_v26 = vld [vmem:[%s15687_s24 + $0xda] sm:$0xf] }
 0x137   : > { %13372 = vmatmul.mubr.msk.f32.gmra.mrb[18].mxu1 %vm434_vm1, %v16176_v57 }
 0x138   : > { %13374 = vmatprep.mubr.msk.f32.mxu1 %vm434_vm1, %v16179_v56 }
 0x139   : > { %13778 = vmatmul.mubr.msk.f32.gmra.mrb[10].mxu0 %vm434_vm1, %v15809_v27  ;;  %v16512_v27 = vld [vmem:[%s15687_s24 + $0x32] sm:$0xff] }
 0x13a   : > { %13780 = vmatprep.mubr.msk.f32.mxu0 %vm434_vm1, %v15812_v28  ;;  %v16515_v28 = vld [vmem:[%s15687_s24 + $0x3a] sm:$0xff] }
 0x13b   : > { %13375 = vmatmul.mubr.msk.f32.gmra.mrb[20].mxu1 %vm434_vm1, %v16186_v55 }
 0x13c   : > { %13377 = vmatprep.mubr.msk.f32.mxu1 %vm434_vm1, %v16189_v54 }
 0x13d   : > { %13781 = vmatmul.mubr.msk.f32.gmra.mrb[12].mxu0 %vm434_vm1, %v15819_v29  ;;  %v16524_v29 = vld [vmem:[%s18596_s1 + $0x3c] sm:$0xf] }
 0x13e   : > { %13783 = vmatprep.mubr.msk.f32.mxu0 %vm434_vm1, %v15822_v30  ;;  %v16531_v30 = vld [vmem:[%s15687_s24 + $0x42] sm:$0xff] }
 0x13f   : > { %13378 = vmatmul.mubr.msk.f32.gmra.mrb[22].mxu1 %vm434_vm1, %v408_v15  ;;  %v18746_v15 = vld [vmem:[#allocation13_spill] sm:$0xff] }
 0x140   : > { %13382 = vmatprep.mubr.msk.f32.mxu1 %vm434_vm1, %v957_v18  ;;  %v16619_v18 = vld [vmem:[%s15687_s24 + $0xa2] sm:$0xff] }
 0x141   : > { %13784 = vmatmul.mubr.msk.f32.gmra.mrb[14].mxu0 %vm434_vm1, %v15829_v31  ;;  %v16534_v31 = vld [vmem:[%s15687_s24 + $0x4a] sm:$0xff] }
 0x142   : > { %13786 = vmatprep.mubr.msk.f32.mxu0 %vm434_vm1, %v15832_v32  ;;  %v16549_v32 = vld [vmem:[%s15687_s24 + $0x52] sm:$0xff] }
 0x143   : > { %13383 = vmatmul.mubr.msk.f32.vlgmr.msra.gmra.mrb[0].mxu1 %vm434_vm1, %v958_v19  ;;  %v16622_v19 = vld [vmem:[%s15687_s24 + $0xaa] sm:$0xff] }
 0x144   : > { %13385 = vmatprep.mubr.msk.f32.mxu1 %vm434_vm1, %v959_v20  ;;  %v18748_v20 = vld [vmem:[#allocation15_spill] sm:$0xff] }
 0x145   : > { %13787 = vmatmul.mubr.msk.f32.gmra.mrb[16].mxu0 %vm434_vm1, %v15839_v33  ;;  %v16552_v33 = vld [vmem:[%s15687_s24 + $0x5a] sm:$0xff] }
 0x146   : > { %13789 = vmatprep.mubr.msk.f32.mxu0 %vm434_vm1, %v15842_v34  ;;  %v16563_v34 = vld [vmem:[%s15687_s24 + $0x62] sm:$0xff] }
 0x147   : > { %13386 = vmatmul.mubr.msk.f32.gmra.mrb[2].mxu1 %vm434_vm1, %v960_v21  ;;  %v18749_v21 = vld [vmem:[#allocation16_spill] sm:$0xff] }
 0x148   : > { %13388 = vmatprep.mubr.msk.f32.mxu1 %vm434_vm1, %v961_v24  ;;  %v16633_v24 = vld [vmem:[%s15687_s24 + $0xb2] sm:$0xff] }
 0x149   : > { %13790 = vmatmul.mubr.msk.f32.gmra.mrb[18].mxu0 %vm434_vm1, %v15849_v35  ;;  %v16566_v35 = vld [vmem:[%s15687_s24 + $0x6a] sm:$0xff] }
 0x14a   : > { %13792 = vmatprep.mubr.msk.f32.mxu0 %vm434_vm1, %v15852_v36  ;;  %v18740_v36 = vld [vmem:[#allocation7_spill] sm:$0xff] }
 0x14b   : > { %13389 = vmatmul.mubr.msk.f32.gmra.mrb[4].mxu1 %vm434_vm1, %v962_v25  ;;  %v980_v25 = vld [vmem:[%s15687_s24 + $0xba] sm:$0xf] }
 0x14c   : > { %13391 = vmatprep.mubr.msk.f32.mxu1 %vm434_vm1, %v16512_v27 }
 0x14d   : > { %13793 = vmatmul.mubr.msk.f32.gmra.mrb[20].mxu0 %vm434_vm1, %v16494_v22 }
 0x14e   : > { %13795 = vmatprep.mubr.msk.f32.mxu0 %vm434_vm1, %v16498_v23 }
 0x14f   : > { %13392 = vmatmul.mubr.msk.f32.gmra.mrb[6].mxu1 %vm434_vm1, %v16515_v28 }
 0x150   : > { %13394 = vmatprep.mubr.msk.f32.mxu1 %vm434_vm1, %v16531_v30 }
 0x151   : > { %13796 = vmatmul.mubr.msk.f32.gmra.mrb[22].mxu0 %vm434_vm1, %v4070_v26  ;;  %v18750_v26 = vld [vmem:[#allocation17_spill] sm:$0xff] }
 0x152   : > { %13800 = vmatprep.mubr.msk.f32.mxu0 %vm434_vm1, %v15864_v40  ;;  %v18741_v40 = vld [vmem:[#allocation8_spill] sm:$0xff] }
 0x153   : > { %13395 = vmatmul.mubr.msk.f32.gmra.mrb[8].mxu1 %vm434_vm1, %v16534_v31 }
 0x154   : > { %13397 = vmatprep.mubr.msk.f32.mxu1 %vm434_vm1, %v16549_v32 }
 0x155   : > { %13801 = vmatmul.mubr.msk.f32.vlgmr.msra.gmra.mrb[0].mxu0 %vm434_vm1, %v15874_v42  ;;  %v16577_v42 = vld [vmem:[%s15687_s24 + $0x72] sm:$0xff] }
 0x156   : > { %13837 = vmatpush3.msk.msra.mxu0 %vm507_vm0, %v16402_v12  ;;  %13803 = vmatprep.mubr.msk.f32.mxu0 %vm434_vm1, %v15877_v43  ;;  %v16580_v43 = vld [vmem:[%s15687_s24 + $0x7a] sm:$0xff] }
 0x157   : > { %13874 = vmatprep.subr.msk.mxu0 %vm507_vm0, %v16524_v29  ;;  %13398 = vmatmul.mubr.msk.f32.gmra.mrb[10].mxu1 %vm434_vm1, %v16552_v33  ;;  %v16608_v12 = vld [vmem:[%s15687_s24 + $0x9a] sm:$0xff] }
 0x158   : > { %13400 = vmatprep.mubr.msk.f32.mxu1 %vm434_vm1, %v16563_v34 }
 0x159   : > { %13804 = vmatmul.mubr.msk.f32.gmra.mrb[2].mxu0 %vm434_vm1, %v15885_v44  ;;  %v18742_v44 = vld [vmem:[#allocation9_spill] sm:$0xff] }
 0x15a   : > { %13806 = vmatprep.mubr.msk.f32.mxu0 %vm434_vm1, %v15888_v45  ;;  %v18743_v45 = vld [vmem:[#allocation10_spill] sm:$0xff] }
 0x15b   : > { %13401 = vmatmul.mubr.msk.f32.gmra.mrb[12].mxu1 %vm434_vm1, %v16566_v35 }
 0x15c   : > { %13403 = vmatprep.mubr.msk.f32.mxu1 %vm434_vm1, %v16577_v42 }
 0x15d   : > { %13807 = vmatmul.mubr.msk.f32.gmra.mrb[4].mxu0 %vm434_vm1, %v15895_v46  ;;  %v18744_v46 = vld [vmem:[#allocation11_spill] sm:$0xff] }
 0x15e   : > { %13809 = vmatprep.mubr.msk.f32.mxu0 %vm434_vm1, %v18740_v36  ;;  %v18751_v36 = vld [vmem:[#allocation18_spill] sm:$0xff] }
 0x15f   : > { %13404 = vmatmul.mubr.msk.f32.gmra.mrb[14].mxu1 %vm434_vm1, %v16580_v43 }
 0x160   : > { %13406 = vmatprep.mubr.msk.f32.mxu1 %vm434_vm1, %v16593_v39 }
 0x161   : > { %13810 = vmatmul.mubr.msk.f32.gmra.mrb[6].mxu0 %vm434_vm1, %v18741_v40  ;;  %v1265_v40 = vld [vmem:[%s18596_s1 + $0xc] sm:$0xf] }
 0x162   : > { %13812 = vmatprep.mubr.msk.f32.mxu0 %vm434_vm1, %v18742_v44  ;;  %v1266_v44 = vld [vmem:[%s15687_s24 + $0x3] sm:$0xff]  ;;  %13418 = vmatprep.subr.msk.mxu1 %vm507_vm0, %v1265_v40 }
 0x163   : > { %13407 = vmatmul.mubr.msk.f32.gmra.mrb[16].mxu1 %vm434_vm1, %v16596_v0 }
 0x164   : > { %13409 = vmatprep.mubr.msk.f32.mxu1 %vm434_vm1, %v16605_v11  ;;  %13419 = vmatpush3.msk.msra.mxu1 %vm507_vm0, %v1265_v40  ;;  %v4379_v40 = vld [vmem:[%s15687_s24 + $0xdb] sm:$0xf] }
 0x165   : > { %13813 = vmatmul.mubr.msk.f32.gmra.mrb[8].mxu0 %vm434_vm1, %v18743_v45  ;;  %v1267_v45 = vld [vmem:[%s15687_s24 + $0xb] sm:$0xff] }
 0x166   : > { %13815 = vmatprep.mubr.msk.f32.mxu0 %vm434_vm1, %v18744_v46  ;;  %v18752_v46 = vld [vmem:[#allocation19_spill] sm:$0xff] }
 0x167   : > { %13410 = vmatmul.mubr.msk.f32.gmra.mrb[18].mxu1 %vm434_vm1, %v16608_v12 }
 0x168   : > { %13412 = vmatprep.mubr.msk.f32.mxu1 %vm434_vm1, %v16619_v18 }
 0x169   : > { %13816 = vmatmul.mubr.msk.f32.gmra.mrb[10].mxu0 %vm434_vm1, %v18745_v3  ;;  %v18753_v3 = vld [vmem:[#allocation20_spill] sm:$0xff] }
 0x16a   : > { %13818 = vmatprep.mubr.msk.f32.mxu0 %vm434_vm1, %v18746_v15  ;;  %v1268_v15 = vld [vmem:[%s15687_s24 + $0x13] sm:$0xff] }
 0x16b   : > { %13413 = vmatmul.mubr.msk.f32.gmra.mrb[20].mxu1 %vm434_vm1, %v16622_v19 }
 0x16c   : > { %13415 = vmatprep.mubr.msk.f32.mxu1 %vm434_vm1, %v16633_v24 }
 0x16d   : > { %13819 = vmatmul.mubr.msk.f32.gmra.mrb[12].mxu0 %vm434_vm1, %v18747_v17  ;;  %v1269_v17 = vld [vmem:[%s15687_s24 + $0x1b] sm:$0xff] }
 0x16e   : > { %13821 = vmatprep.mubr.msk.f32.mxu0 %vm434_vm1, %v18748_v20  ;;  %v18754_v20 = vld [vmem:[#allocation21_spill] sm:$0xff] }
 0x16f   : > { %13416 = vmatmul.mubr.msk.f32.gmra.mrb[22].mxu1 %vm434_vm1, %v980_v25  ;;  %v16665_v25 = vld [vmem:[%s15687_s24 + $0xd3] sm:$0xff] }
 0x170   : > { %13420 = vmatprep.mubr.msk.f32.mxu1 %vm434_vm1, %v1266_v44  ;;  %18756 = vst [vmem:[#allocation8_spill] sm:$0xff] %v16665_v25  ;;  %v16679_v44 = vld [vmem:[%s15687_s24 + $0x33] sm:$0xff] }
 0x171   : > { %13822 = vmatmul.mubr.msk.f32.gmra.mrb[14].mxu0 %vm434_vm1, %v18749_v21  ;;  %v16661_v21 = vld [vmem:[%s15687_s24 + $0xcb] sm:$0xff] }
 0x172   : > { %13824 = vmatprep.mubr.msk.f32.mxu0 %vm434_vm1, %v18750_v26  ;;  %18755 = vst [vmem:[#allocation7_spill] sm:$0xff] %v16661_v21  ;;  %v1270_v26 = vld [vmem:[%s15687_s24 + $0x23] sm:$0xff] }
 0x173   : > { %13421 = vmatmul.mubr.msk.f32.vlgmr.msra.gmra.mrb[0].mxu1 %vm434_vm1, %v1267_v45  ;;  %v16682_v45 = vld [vmem:[%s15687_s24 + $0x3b] sm:$0xff] }
 0x174   : > { %13423 = vmatprep.mubr.msk.f32.mxu1 %vm434_vm1, %v1268_v15  ;;  %v18758_v15 = vld [vmem:[#allocation23_spill] sm:$0xff] }
 0x175   : > { %13825 = vmatmul.mubr.msk.f32.gmra.mrb[16].mxu0 %vm434_vm1, %v18751_v36  ;;  %v1271_v36 = vld [vmem:[%s15687_s24 + $0x2b] sm:$0xff] }
 0x176   : > { %13827 = vmatprep.mubr.msk.f32.mxu0 %vm434_vm1, %v18752_v46  ;;  %v18757_v46 = vld [vmem:[#allocation22_spill] sm:$0xff] }
 0x177   : > { %13424 = vmatmul.mubr.msk.f32.gmra.mrb[2].mxu1 %vm434_vm1, %v1269_v17  ;;  %v16698_v17 = vld [vmem:[%s15687_s24 + $0x43] sm:$0xff] }
 0x178   : > { %13426 = vmatprep.mubr.msk.f32.mxu1 %vm434_vm1, %v1270_v26  ;;  %v18760_v26 = vld [vmem:[#allocation24_spill] sm:$0xff] }
 0x179   : > { %13828 = vmatmul.mubr.msk.f32.gmra.mrb[18].mxu0 %vm434_vm1, %v18753_v3  ;;  %v16691_v3 = vld [vmem:[%s18596_s1 + $0x40] sm:$0xf] }
 0x17a   : > { %13830 = vmatprep.mubr.msk.f32.mxu0 %vm434_vm1, %v18754_v20  ;;  %v16701_v20 = vld [vmem:[%s15687_s24 + $0x4b] sm:$0xff] }
 0x17b   : > { %13427 = vmatmul.mubr.msk.f32.gmra.mrb[4].mxu1 %vm434_vm1, %v1271_v36  ;;  %18759 = vst [vmem:[#allocation9_spill] sm:$0xff] %v16701_v20  ;;  %v18761_v36 = vld [vmem:[#allocation25_spill] sm:$0xff] }
 0x17c   : > { %13429 = vmatprep.mubr.msk.f32.mxu1 %vm434_vm1, %v16679_v44 }
 0x17d   : > { %13831 = vmatmul.mubr.msk.f32.gmra.mrb[20].mxu0 %vm434_vm1, %v16661_v21  ;;  %v16744_v21 = vld [vmem:[%s15687_s24 + $0x73] sm:$0xff] }
 0x17e   : > { %13833 = vmatprep.mubr.msk.f32.mxu0 %vm434_vm1, %v16665_v25  ;;  %v18768_v25 = vld [vmem:[#allocation28_spill] sm:$0xff]  ;;  %18770 = vst [vmem:[#allocation14_spill] sm:$0xff] %v16744_v21 }
 0x17f   : > { %13430 = vmatmul.mubr.msk.f32.gmra.mrb[6].mxu1 %vm434_vm1, %v16682_v45 }
 0x180   : > { %13432 = vmatprep.mubr.msk.f32.mxu1 %vm434_vm1, %v16698_v17 }
 0x181   : > { %13834 = vmatmul.mubr.msk.f32.gmra.mrb[22].mxu0 %vm434_vm1, %v4379_v40  ;;  %v16716_v40 = vld [vmem:[%s15687_s24 + $0x53] sm:$0xff] }
 0x182   : > { %13838 = vmatprep.mubr.msk.f32.mxu0 %vm434_vm1, %v18757_v46  ;;  %18762 = vst [vmem:[#allocation10_spill] sm:$0xff] %v16716_v40  ;;  %v18764_v46 = vld [vmem:[#allocation26_spill] sm:$0xff] }
 0x183   : > { %13433 = vmatmul.mubr.msk.f32.gmra.mrb[8].mxu1 %vm434_vm1, %v16701_v20  ;;  %v16832_v20 = vld [vmem:[%s15687_s24 + $0xd4] sm:$0xff] }
 0x184   : > { %13435 = vmatprep.mubr.msk.f32.mxu1 %vm434_vm1, %v16716_v40  ;;  %v18789_v40 = vld [vmem:[#allocation40_spill] sm:$0xff] }
 0x185   : > { %13839 = vmatmul.mubr.msk.f32.vlgmr.msra.gmra.mrb[0].mxu0 %vm434_vm1, %v18758_v15  ;;  %v18765_v15 = vld [vmem:[#allocation27_spill] sm:$0xff] }
 0x186   : > { %13875 = vmatpush3.msk.msra.mxu0 %vm507_vm0, %v16524_v29  ;;  %13841 = vmatprep.mubr.msk.f32.mxu0 %vm434_vm1, %v18760_v26  ;;  %v16719_v29 = vld [vmem:[%s15687_s24 + $0x5b] sm:$0xff]  ;;  %v16730_v26 = vld [vmem:[%s15687_s24 + $0x63] sm:$0xff] }
 0x187   : > { %13912 = vmatprep.subr.msk.mxu0 %vm507_vm0, %v16691_v3  ;;  %18763 = vst [vmem:[#allocation11_spill] sm:$0xff] %v16719_v29  ;;  %13436 = vmatmul.mubr.msk.f32.gmra.mrb[10].mxu1 %vm434_vm1, %v16719_v29  ;;  %18766 = vst [vmem:[#allocation12_spill] sm:$0xff] %v16730_v26  ;;  %v18772_v29 = vld [vmem:[#allocation30_spill] sm:$0xff] }
 0x188   : > { %13438 = vmatprep.mubr.msk.f32.mxu1 %vm434_vm1, %v16730_v26  ;;  %v16763_v26 = vld [vmem:[%s15687_s24 + $0x8b] sm:$0xff] }
 0x189   : > { %13842 = vmatmul.mubr.msk.f32.gmra.mrb[2].mxu0 %vm434_vm1, %v18761_v36  ;;  %v16733_v36 = vld [vmem:[%s15687_s24 + $0x6b] sm:$0xff]  ;;  %18776 = vst [vmem:[#allocation17_spill] sm:$0xff] %v16763_v26 }
 0x18a   : > { %13844 = vmatprep.mubr.msk.f32.mxu0 %vm434_vm1, %v18764_v46  ;;  %18767 = vst [vmem:[#allocation13_spill] sm:$0xff] %v16733_v36  ;;  %v18769_v46 = vld [vmem:[#allocation29_spill] sm:$0xff] }
 0x18b   : > { %13439 = vmatmul.mubr.msk.f32.gmra.mrb[12].mxu1 %vm434_vm1, %v16733_v36  ;;  %v18774_v36 = vld [vmem:[#allocation32_spill] sm:$0xff] }
 0x18c   : > { %13441 = vmatprep.mubr.msk.f32.mxu1 %vm434_vm1, %v16744_v21  ;;  %v18784_v21 = vld [vmem:[#allocation36_spill] sm:$0xff] }
 0x18d   : > { %13845 = vmatmul.mubr.msk.f32.gmra.mrb[4].mxu0 %vm434_vm1, %v18765_v15  ;;  %v16747_v15 = vld [vmem:[%s15687_s24 + $0x7b] sm:$0xff] }
 0x18e   : > { %13847 = vmatprep.mubr.msk.f32.mxu0 %vm434_vm1, %v18768_v25  ;;  %18771 = vst [vmem:[#allocation15_spill] sm:$0xff] %v16747_v15  ;;  %v18773_v25 = vld [vmem:[#allocation31_spill] sm:$0xff] }
 0x18f   : > { %13442 = vmatmul.mubr.msk.f32.gmra.mrb[14].mxu1 %vm434_vm1, %v16747_v15  ;;  %v16772_v15 = vld [vmem:[%s15687_s24 + $0x93] sm:$0xff] }
 0x190   : > { %18778 = vst [vmem:[#allocation18_spill] sm:$0xff] %v16772_v15 }
 0x191   : > { %13848 = vmatmul.mubr.msk.f32.gmra.mrb[6].mxu0 %vm434_vm1, %v18769_v46  ;;  %v16760_v46 = vld [vmem:[%s15687_s24 + $0x83] sm:$0xff] }
 0x192   : > { %13850 = vmatprep.mubr.msk.f32.mxu0 %vm434_vm1, %v18772_v29  ;;  %18775 = vst [vmem:[#allocation16_spill] sm:$0xff] %v16760_v46  ;;  %13444 = vmatprep.mubr.msk.f32.mxu1 %vm434_vm1, %v16760_v46  ;;  %v18777_v29 = vld [vmem:[#allocation33_spill] sm:$0xff]  ;;  %v18781_v46 = vld [vmem:[#allocation35_spill] sm:$0xff] }
 0x193   : > { %13445 = vmatmul.mubr.msk.f32.gmra.mrb[16].mxu1 %vm434_vm1, %v16763_v26  ;;  %v16786_v26 = vld [vmem:[%s15687_s24 + $0xa3] sm:$0xff] }
 0x194   : > { %13447 = vmatprep.mubr.msk.f32.mxu1 %vm434_vm1, %v16772_v15  ;;  %18782 = vst [vmem:[#allocation20_spill] sm:$0xff] %v16786_v26  ;;  %v18787_v15 = vld [vmem:[#allocation38_spill] sm:$0xff] }
 0x195   : > { %13851 = vmatmul.mubr.msk.f32.gmra.mrb[8].mxu0 %vm434_vm1, %v18773_v25  ;;  %v16775_v25 = vld [vmem:[%s15687_s24 + $0x9b] sm:$0xff] }
 0x196   : > { %13853 = vmatprep.mubr.msk.f32.mxu0 %vm434_vm1, %v18774_v36  ;;  %18779 = vst [vmem:[#allocation19_spill] sm:$0xff] %v16775_v25  ;;  %v18780_v36 = vld [vmem:[#allocation34_spill] sm:$0xff] }
 0x197   : > { %13448 = vmatmul.mubr.msk.f32.gmra.mrb[18].mxu1 %vm434_vm1, %v16775_v25  ;;  %v16800_v25 = vld [vmem:[%s15687_s24 + $0xb3] sm:$0xff] }
 0x198   : > { %13450 = vmatprep.mubr.msk.f32.mxu1 %vm434_vm1, %v16786_v26  ;;  %18786 = vst [vmem:[#allocation22_spill] sm:$0xff] %v16800_v25  ;;  %v1576_v26 = vld [vmem:[%s15687_s24 + $0xc] sm:$0xff] }
 0x199   : > { %13854 = vmatmul.mubr.msk.f32.gmra.mrb[10].mxu0 %vm434_vm1, %v18777_v29  ;;  %v16789_v29 = vld [vmem:[%s15687_s24 + $0xab] sm:$0xff] }
 0x19a   : > { %13856 = vmatprep.mubr.msk.f32.mxu0 %vm434_vm1, %v18780_v36  ;;  %18783 = vst [vmem:[#allocation21_spill] sm:$0xff] %v16789_v29  ;;  %v18785_v36 = vld [vmem:[#allocation37_spill] sm:$0xff] }
 0x19b   : > { %13451 = vmatmul.mubr.msk.f32.gmra.mrb[20].mxu1 %vm434_vm1, %v16789_v29  ;;  %v1575_v29 = vld [vmem:[%s15687_s24 + $0x4] sm:$0xff] }
 0x19c   : > { %13453 = vmatprep.mubr.msk.f32.mxu1 %vm434_vm1, %v16800_v25  ;;  %v18791_v25 = vld [vmem:[#allocation42_spill] sm:$0xff] }
 0x19d   : > { %13857 = vmatmul.mubr.msk.f32.gmra.mrb[12].mxu0 %vm434_vm1, %v18781_v46  ;;  %v1289_v46 = vld [vmem:[%s15687_s24 + $0xbb] sm:$0xf] }
 0x19e   : > { %13859 = vmatprep.mubr.msk.f32.mxu0 %vm434_vm1, %v18784_v21  ;;  %v18788_v21 = vld [vmem:[#allocation39_spill] sm:$0xff] }
 0x19f   : > { %13454 = vmatmul.mubr.msk.f32.gmra.mrb[22].mxu1 %vm434_vm1, %v1289_v46  ;;  %v1577_v46 = vld [vmem:[%s15687_s24 + $0x14] sm:$0xff] }
 0x1a0   : > { %13458 = vmatprep.mubr.msk.f32.mxu1 %vm434_vm1, %v1575_v29  ;;  %v1580_v29 = vld [vmem:[%s15687_s24 + $0x2c] sm:$0xff] }
 0x1a1   : > { %13860 = vmatmul.mubr.msk.f32.gmra.mrb[14].mxu0 %vm434_vm1, %v18785_v36  ;;  %v1574_v36 = vld [vmem:[%s18596_s1 + $0x10] sm:$0xf] }
 0x1a2   : > { %13862 = vmatprep.mubr.msk.f32.mxu0 %vm434_vm1, %v18787_v15  ;;  %13456 = vmatprep.subr.msk.mxu1 %vm507_vm0, %v1574_v36  ;;  %v18790_v15 = vld [vmem:[#allocation41_spill] sm:$0xff] }
 0x1a3   : > { %13457 = vmatpush3.msk.msra.mxu1 %vm507_vm0, %v1574_v36  ;;  %v4688_v36 = vld [vmem:[%s15687_s24 + $0xdc] sm:$0xf] }
 0x1a4   : > { %13459 = vmatmul.mubr.msk.f32.vlgmr.msra.gmra.mrb[0].mxu1 %vm434_vm1, %v1576_v26  ;;  %v1579_v26 = vld [vmem:[%s15687_s24 + $0x24] sm:$0xff] }
 0x1a5   : > { %13863 = vmatmul.mubr.msk.f32.gmra.mrb[16].mxu0 %vm434_vm1, %v18788_v21  ;;  %v1578_v21 = vld [vmem:[%s15687_s24 + $0x1c] sm:$0xff]  ;;  %13461 = vmatprep.mubr.msk.f32.mxu1 %vm434_vm1, %v1577_v46  ;;  %v16858_v46 = vld [vmem:[%s18596_s1 + $0x44] sm:$0xf] }
 0x1a6   : > { %13865 = vmatprep.mubr.msk.f32.mxu0 %vm434_vm1, %v18789_v40  ;;  %v16828_v40 = vld [vmem:[%s15687_s24 + $0xcc] sm:$0xff] }
 0x1a8   : > { %13462 = vmatmul.mubr.msk.f32.gmra.mrb[2].mxu1 %vm434_vm1, %v1578_v21  ;;  %v16865_v21 = vld [vmem:[%s15687_s24 + $0x44] sm:$0xff] }
 0x1a9   : > { %13866 = vmatmul.mubr.msk.f32.gmra.mrb[18].mxu0 %vm434_vm1, %v18790_v15  ;;  %13464 = vmatprep.mubr.msk.f32.mxu1 %vm434_vm1, %v1579_v26  ;;  %v16849_v15 = vld [vmem:[%s15687_s24 + $0x3c] sm:$0xff]  ;;  %v16868_v26 = vld [vmem:[%s15687_s24 + $0x4c] sm:$0xff] }
 0x1aa   : > { %13868 = vmatprep.mubr.msk.f32.mxu0 %vm434_vm1, %v18791_v25  ;;  %v16846_v25 = vld [vmem:[%s15687_s24 + $0x34] sm:$0xff] }
 0x1ac   : > { %13465 = vmatmul.mubr.msk.f32.gmra.mrb[4].mxu1 %vm434_vm1, %v1580_v29  ;;  %v17019_v29 = vld [vmem:[%s15687_s24 + $0x40] sm:$0xff] }
 0x1ad   : > { %13869 = vmatmul.mubr.msk.f32.gmra.mrb[20].mxu0 %vm434_vm1, %v16828_v40  ;;  %13467 = vmatprep.mubr.msk.f32.mxu1 %vm434_vm1, %v16846_v25 }
 0x1ae   : > { %13871 = vmatprep.mubr.msk.f32.mxu0 %vm434_vm1, %v16832_v20 }
 0x1b0   : > { %13468 = vmatmul.mubr.msk.f32.gmra.mrb[6].mxu1 %vm434_vm1, %v16849_v15 }
 0x1b1   : > { %13872 = vmatmul.mubr.msk.f32.gmra.mrb[22].mxu0 %vm434_vm1, %v4688_v36  ;;  %13470 = vmatprep.mubr.msk.f32.mxu1 %vm434_vm1, %v16865_v21  ;;  %v17022_v36 = vld [vmem:[%s15687_s24 + $0x48] sm:$0xff] }
 0x1b2   : > { %13876 = vmatprep.mubr.msk.f32.mxu0 %vm434_vm1, %v16101_v38  ;;  %v16883_v38 = vld [vmem:[%s15687_s24 + $0x54] sm:$0xff] }
 0x1b4   : > { %13471 = vmatmul.mubr.msk.f32.gmra.mrb[8].mxu1 %vm434_vm1, %v16868_v26 }
 0x1b5   : > { %13877 = vmatmul.mubr.msk.f32.vlgmr.msra.gmra.mrb[0].mxu0 %vm434_vm1, %v16114_v63  ;;  %v16886_v63 = vld [vmem:[%s15687_s24 + $0x5c] sm:$0xff]  ;;  %13473 = vmatprep.mubr.msk.f32.mxu1 %vm434_vm1, %v16883_v38 }
 0x1b6   : > { %13913 = vmatpush3.msk.msra.mxu0 %vm507_vm0, %v16691_v3  ;;  %13879 = vmatprep.mubr.msk.f32.mxu0 %vm434_vm1, %v16117_v41  ;;  %v16897_v41 = vld [vmem:[%s15687_s24 + $0x64] sm:$0xff]  ;;  %v16956_v3 = vld [vmem:[%s15687_s24 + $0xac] sm:$0xff] }
 0x1b7   : > { %13950 = vmatprep.subr.msk.mxu0 %vm507_vm0, %v16858_v46 }
 0x1b8   : > { %13474 = vmatmul.mubr.msk.f32.gmra.mrb[10].mxu1 %vm434_vm1, %v16886_v63 }
 0x1b9   : > { %13880 = vmatmul.mubr.msk.f32.gmra.mrb[2].mxu0 %vm434_vm1, %v16126_v5  ;;  %v16900_v5 = vld [vmem:[%s15687_s24 + $0x6c] sm:$0xff]  ;;  %13476 = vmatprep.mubr.msk.f32.mxu1 %vm434_vm1, %v16897_v41 }
 0x1ba   : > { %13882 = vmatprep.mubr.msk.f32.mxu0 %vm434_vm1, %v16129_v37  ;;  %v16911_v37 = vld [vmem:[%s15687_s24 + $0x74] sm:$0xff] }
 0x1bc   : > { %13477 = vmatmul.mubr.msk.f32.gmra.mrb[12].mxu1 %vm434_vm1, %v16900_v5 }
 0x1bd   : > { %13883 = vmatmul.mubr.msk.f32.gmra.mrb[4].mxu0 %vm434_vm1, %v16136_v16  ;;  %v16914_v16 = vld [vmem:[%s15687_s24 + $0x7c] sm:$0xff]  ;;  %13479 = vmatprep.mubr.msk.f32.mxu1 %vm434_vm1, %v16911_v37 }
 0x1be   : > { %13885 = vmatprep.mubr.msk.f32.mxu0 %vm434_vm1, %v16139_v14  ;;  %v16930_v14 = vld [vmem:[%s15687_s24 + $0x8c] sm:$0xff] }
 0x1c0   : > { %13480 = vmatmul.mubr.msk.f32.gmra.mrb[14].mxu1 %vm434_vm1, %v16914_v16 }
 0x1c1   : > { %13886 = vmatmul.mubr.msk.f32.gmra.mrb[6].mxu0 %vm434_vm1, %v16146_v13  ;;  %v16927_v13 = vld [vmem:[%s15687_s24 + $0x84] sm:$0xff] }
 0x1c2   : > { %13888 = vmatprep.mubr.msk.f32.mxu0 %vm434_vm1, %v16149_v1  ;;  %13482 = vmatprep.mubr.msk.f32.mxu1 %vm434_vm1, %v16927_v13  ;;  %v16939_v1 = vld [vmem:[%s15687_s24 + $0x94] sm:$0xff] }
 0x1c4   : > { %13483 = vmatmul.mubr.msk.f32.gmra.mrb[16].mxu1 %vm434_vm1, %v16930_v14 }
 0x1c5   : > { %13889 = vmatmul.mubr.msk.f32.gmra.mrb[8].mxu0 %vm434_vm1, %v16156_v61  ;;  %v16942_v61 = vld [vmem:[%s15687_s24 + $0x9c] sm:$0xff]  ;;  %13485 = vmatprep.mubr.msk.f32.mxu1 %vm434_vm1, %v16939_v1 }
 0x1c6   : > { %13891 = vmatprep.mubr.msk.f32.mxu0 %vm434_vm1, %v16159_v60  ;;  %v16953_v60 = vld [vmem:[%s15687_s24 + $0xa4] sm:$0xff] }
 0x1c8   : > { %13486 = vmatmul.mubr.msk.f32.gmra.mrb[18].mxu1 %vm434_vm1, %v16942_v61 }
 0x1c9   : > { %13892 = vmatmul.mubr.msk.f32.gmra.mrb[10].mxu0 %vm434_vm1, %v16166_v59  ;;  %13488 = vmatprep.mubr.msk.f32.mxu1 %vm434_vm1, %v16953_v60  ;;  %v17004_v59 = vld [vmem:[%s15687_s24 + $0xe0] sm:$0xff] }
 0x1ca   : > { %13894 = vmatprep.mubr.msk.f32.mxu0 %vm434_vm1, %v16169_v58  ;;  %v16967_v58 = vld [vmem:[%s15687_s24 + $0xb4] sm:$0xff]  ;;  %18793 = vst [vmem:[#allocation24_spill] sm:$0xff] %v17004_v59 }
 0x1cc   : > { %13489 = vmatmul.mubr.msk.f32.gmra.mrb[20].mxu1 %vm434_vm1, %v16956_v3 }
 0x1cd   : > { %13895 = vmatmul.mubr.msk.f32.gmra.mrb[12].mxu0 %vm434_vm1, %v16176_v57  ;;  %v1598_v57 = vld [vmem:[%s15687_s24 + $0xbc] sm:$0xf]  ;;  %13491 = vmatprep.mubr.msk.f32.mxu1 %vm434_vm1, %v16967_v58 }
 0x1ce   : > { %13897 = vmatprep.mubr.msk.f32.mxu0 %vm434_vm1, %v16179_v56  ;;  %v17000_v56 = vld [vmem:[%s15687_s24 + $0xd8] sm:$0xff] }
 0x1cf   : > { %18792 = vst [vmem:[#allocation23_spill] sm:$0xff] %v17000_v56 }
 0x1d0   : > { %13492 = vmatmul.mubr.msk.f32.gmra.mrb[22].mxu1 %vm434_vm1, %v1598_v57  ;;  %v5284_v57 = vld [vmem:[%s15687_s24 + $0x39] sm:$0xff] }
 0x1d1   : > { %13898 = vmatmul.mubr.msk.f32.gmra.mrb[14].mxu0 %vm434_vm1, %v16186_v55  ;;  %v1883_v55 = vld [vmem:[%s18596_s1 + $0x14] sm:$0xf]  ;;  %13496 = vmatprep.mubr.msk.f32.mxu1 %vm434_vm1, %v16368_v52 }
 0x1d2   : > { %13900 = vmatprep.mubr.msk.f32.mxu0 %vm434_vm1, %v16189_v54  ;;  %13494 = vmatprep.subr.msk.mxu1 %vm507_vm0, %v1883_v55  ;;  %v1887_v54 = vld [vmem:[%s15687_s24 + $0x28] sm:$0xff]  ;;  %v5283_v52 = vld [vmem:[%s15687_s24 + $0x31] sm:$0xff] }
 0x1d3   : > { %13495 = vmatpush3.msk.msra.mxu1 %vm507_vm0, %v1883_v55  ;;  %v17029_v55 = vld [vmem:[%s15687_s24 + $0x41] sm:$0xff] }
 0x1d4   : > { %13497 = vmatmul.mubr.msk.f32.vlgmr.msra.gmra.mrb[0].mxu1 %vm434_vm1, %v16371_v51  ;;  %v1889_v51 = vld [vmem:[%s15687_s24 + $0x38] sm:$0xff]  ;;  %18794 = vst [vmem:[#allocation25_spill] sm:$0xff] %v17029_v55 }
 0x1d5   : > { %13901 = vmatmul.mubr.msk.f32.gmra.mrb[16].mxu0 %vm434_vm1, %v16201_v50  ;;  %v15496_v50 = vld [vmem:[%s18596_s1 + $0x18] sm:$0xf] }
 0x1d6   : > { %13903 = vmatprep.mubr.msk.f32.mxu0 %vm434_vm1, %v16205_v49  ;;  %14813 = vmatprep.subr.msk.mxu1 %vm507_vm0, %v15496_v50  ;;  %v1886_v49 = vld [vmem:[%s15687_s24 + $0x20] sm:$0xff] }
 0x1d7   : > { %14814 = vmatpush3.msk.msra.mxu1 %vm507_vm0, %v15496_v50  ;;  %13499 = vmatprep.mubr.msk.f32.mxu1 %vm434_vm1, %v1886_v49  ;;  %v17034_v50 = vld [vmem:[%s18596_s1 + $0x48] sm:$0xf]  ;;  %v17040_v49 = vld [vmem:[%s15687_s24 + $0x50] sm:$0xff] }
 0x1d8   : > { %13500 = vmatmul.mubr.msk.f32.gmra.mrb[2].mxu1 %vm434_vm1, %v1887_v54  ;;  %v17043_v54 = vld [vmem:[%s15687_s24 + $0x58] sm:$0xff] }
 0x1d9   : > { %13904 = vmatmul.mubr.msk.f32.gmra.mrb[18].mxu0 %vm434_vm1, %v16217_v48  ;;  %v1888_v48 = vld [vmem:[%s15687_s24 + $0x30] sm:$0xff] }
 0x1da   : > { %13906 = vmatprep.mubr.msk.f32.mxu0 %vm434_vm1, %v16220_v47  ;;  %v4997_v47 = vld [vmem:[%s15687_s24 + $0xe8] sm:$0xf]  ;;  %13502 = vmatprep.mubr.msk.f32.mxu1 %vm434_vm1, %v1888_v48 }
 0x1db   : > { %v17050_v48 = vld [vmem:[%s15687_s24 + $0x49] sm:$0xff] }
 0x1dc   : > { %13503 = vmatmul.mubr.msk.f32.gmra.mrb[4].mxu1 %vm434_vm1, %v1889_v51  ;;  %18795 = vst [vmem:[#allocation26_spill] sm:$0xff] %v17050_v48  ;;  %v17053_v51 = vld [vmem:[%s15687_s24 + $0x51] sm:$0xff] }
 0x1dd   : > { %13907 = vmatmul.mubr.msk.f32.gmra.mrb[20].mxu0 %vm434_vm1, %v17000_v56  ;;  %13505 = vmatprep.mubr.msk.f32.mxu1 %vm434_vm1, %v17019_v29  ;;  %18796 = vst [vmem:[#allocation27_spill] sm:$0xff] %v17053_v51  ;;  %v17137_v56 = vld [vmem:[%s15687_s24 + $0xb0] sm:$0xff] }
 0x1de   : > { %13909 = vmatprep.mubr.msk.f32.mxu0 %vm434_vm1, %v17004_v59  ;;  %v18803_v59 = vld [vmem:[#allocation45_spill] sm:$0xff] }
 0x1e0   : > { %13506 = vmatmul.mubr.msk.f32.gmra.mrb[6].mxu1 %vm434_vm1, %v17022_v36 }
 0x1e1   : > { %13910 = vmatmul.mubr.msk.f32.gmra.mrb[22].mxu0 %vm434_vm1, %v4997_v47  ;;  %13508 = vmatprep.mubr.msk.f32.mxu1 %vm434_vm1, %v17040_v49  ;;  %v17067_v47 = vld [vmem:[%s15687_s24 + $0x68] sm:$0xff] }
 0x1e2   : > { %13914 = vmatprep.mubr.msk.f32.mxu0 %vm434_vm1, %v5283_v52  ;;  %v17072_v52 = vld [vmem:[%s15687_s24 + $0x59] sm:$0xff] }
 0x1e3   : > { %18797 = vst [vmem:[#allocation28_spill] sm:$0xff] %v17072_v52 }
 0x1e4   : > { %13509 = vmatmul.mubr.msk.f32.gmra.mrb[8].mxu1 %vm434_vm1, %v17043_v54 }
 0x1e5   : > { %13915 = vmatmul.mubr.msk.f32.vlgmr.msra.gmra.mrb[0].mxu0 %vm434_vm1, %v5284_v57  ;;  %v17081_v57 = vld [vmem:[%s15687_s24 + $0x70] sm:$0xff] }
 0x1e6   : > { %13951 = vmatpush3.msk.msra.mxu0 %vm507_vm0, %v16858_v46  ;;  %13917 = vmatprep.mubr.msk.f32.mxu0 %vm434_vm1, %v17029_v55  ;;  %v17064_v46 = vld [vmem:[%s15687_s24 + $0x60] sm:$0xff] }
 0x1e7   : > { %13988 = vmatprep.subr.msk.mxu0 %vm507_vm0, %v17034_v50  ;;  %13511 = vmatprep.mubr.msk.f32.mxu1 %vm434_vm1, %v17064_v46  ;;  %v17123_v55 = vld [vmem:[%s15687_s24 + $0xa0] sm:$0xff] }
 0x1e8   : > { %13512 = vmatmul.mubr.msk.f32.gmra.mrb[10].mxu1 %vm434_vm1, %v17067_v47  ;;  %18800 = vst [vmem:[#allocation30_spill] sm:$0xff] %v17123_v55 }
 0x1e9   : > { %13918 = vmatmul.mubr.msk.f32.gmra.mrb[2].mxu0 %vm434_vm1, %v17050_v48  ;;  %v17084_v48 = vld [vmem:[%s15687_s24 + $0x78] sm:$0xff]  ;;  %13514 = vmatprep.mubr.msk.f32.mxu1 %vm434_vm1, %v17081_v57 }
 0x1ea   : > { %13920 = vmatprep.mubr.msk.f32.mxu0 %vm434_vm1, %v17053_v51  ;;  %v17095_v51 = vld [vmem:[%s15687_s24 + $0x80] sm:$0xff] }
 0x1ec   : > { %13515 = vmatmul.mubr.msk.f32.gmra.mrb[12].mxu1 %vm434_vm1, %v17084_v48 }
 0x1ed   : > { %13921 = vmatmul.mubr.msk.f32.gmra.mrb[4].mxu0 %vm434_vm1, %v17072_v52  ;;  %v17098_v52 = vld [vmem:[%s15687_s24 + $0x88] sm:$0xff]  ;;  %13517 = vmatprep.mubr.msk.f32.mxu1 %vm434_vm1, %v17095_v51 }
 0x1ee   : > { %13923 = vmatprep.mubr.msk.f32.mxu0 %vm434_vm1, %v16264_v4  ;;  %v17111_v4 = vld [vmem:[%s15687_s24 + $0x90] sm:$0xff] }
 0x1f0   : > { %13518 = vmatmul.mubr.msk.f32.gmra.mrb[14].mxu1 %vm434_vm1, %v17098_v52 }
 0x1f1   : > { %13924 = vmatmul.mubr.msk.f32.gmra.mrb[6].mxu0 %vm434_vm1, %v16275_v6  ;;  %v17114_v6 = vld [vmem:[%s15687_s24 + $0x98] sm:$0xff]  ;;  %13520 = vmatprep.mubr.msk.f32.mxu1 %vm434_vm1, %v17111_v4 }
 0x1f2   : > { %13926 = vmatprep.mubr.msk.f32.mxu0 %vm434_vm1, %v16278_v7  ;;  %18798 = vst [vmem:[#allocation29_spill] sm:$0xff] %v17114_v6  ;;  %v18799_v7 = vld [vmem:[#allocation43_spill] sm:$0xff] }
 0x1f4   : > { %13521 = vmatmul.mubr.msk.f32.gmra.mrb[16].mxu1 %vm434_vm1, %v17114_v6  ;;  %v18804_v6 = vld [vmem:[#allocation46_spill] sm:$0xff] }
 0x1f5   : > { %13927 = vmatmul.mubr.msk.f32.gmra.mrb[8].mxu0 %vm434_vm1, %v16289_v8  ;;  %v17126_v8 = vld [vmem:[%s15687_s24 + $0xa8] sm:$0xff]  ;;  %13523 = vmatprep.mubr.msk.f32.mxu1 %vm434_vm1, %v17123_v55  ;;  %v18806_v55 = vld [vmem:[#allocation48_spill] sm:$0xff] }
 0x1f6   : > { %13929 = vmatprep.mubr.msk.f32.mxu0 %vm434_vm1, %v16292_v9  ;;  %18801 = vst [vmem:[#allocation31_spill] sm:$0xff] %v17126_v8  ;;  %v18802_v9 = vld [vmem:[#allocation44_spill] sm:$0xff] }
 0x1f8   : > { %13524 = vmatmul.mubr.msk.f32.gmra.mrb[18].mxu1 %vm434_vm1, %v17126_v8  ;;  %v1907_v8 = vld [vmem:[%s15687_s24 + $0xc8] sm:$0xf] }
 0x1f9   : > { %13930 = vmatmul.mubr.msk.f32.gmra.mrb[10].mxu0 %vm434_vm1, %v18799_v7  ;;  %v17140_v7 = vld [vmem:[%s15687_s24 + $0xb8] sm:$0xff]  ;;  %13526 = vmatprep.mubr.msk.f32.mxu1 %vm434_vm1, %v17137_v56 }
 0x1fa   : > { %13932 = vmatprep.mubr.msk.f32.mxu0 %vm434_vm1, %v18802_v9  ;;  %v18805_v9 = vld [vmem:[#allocation47_spill] sm:$0xff] }
 0x1fc   : > { %13527 = vmatmul.mubr.msk.f32.gmra.mrb[20].mxu1 %vm434_vm1, %v17140_v7 }
 0x1fd   : > { %13933 = vmatmul.mubr.msk.f32.gmra.mrb[12].mxu0 %vm434_vm1, %v18803_v59  ;;  %v17151_v59 = vld [vmem:[%s15687_s24 + $0xc0] sm:$0xff] }
 0x1fe   : > { %13935 = vmatprep.mubr.msk.f32.mxu0 %vm434_vm1, %v18804_v6  ;;  %13529 = vmatprep.mubr.msk.f32.mxu1 %vm434_vm1, %v17151_v59  ;;  %v17162_v6 = vld [vmem:[%s15687_s24 + $0x61] sm:$0xff] }
 0x200   : > { %13530 = vmatmul.mubr.msk.f32.gmra.mrb[22].mxu1 %vm434_vm1, %v1907_v8  ;;  %v17184_v8 = vld [vmem:[%s15687_s24 + $0xd9] sm:$0xff] }
 0x201   : > { %13936 = vmatmul.mubr.msk.f32.gmra.mrb[14].mxu0 %vm434_vm1, %v18805_v9  ;;  %v17165_v9 = vld [vmem:[%s15687_s24 + $0x69] sm:$0xff]  ;;  %13549 = vmatprep.mubr.msk.f32.mxu1 %vm434_vm1, %v17162_v6  ;;  %18809 = vst [vmem:[#allocation34_spill] sm:$0xff] %v17184_v8 }
 0x202   : > { %13938 = vmatprep.mubr.msk.f32.mxu0 %vm434_vm1, %v18806_v55  ;;  %18807 = vst [vmem:[#allocation32_spill] sm:$0xff] %v17165_v9  ;;  %v17179_v55 = vld [vmem:[%s15687_s24 + $0x79] sm:$0xff] }
 0x203   : > { %18808 = vst [vmem:[#allocation33_spill] sm:$0xff] %v17179_v55 }
 0x204   : > { %13550 = vmatmul.mubr.msk.f32.vlgmr.msra.gmra.mrb[10].mxu1 %vm434_vm1, %v17165_v9  ;;  %v17199_v9 = vld [vmem:[%s15687_s24 + $0x89] sm:$0xff] }
 0x205   : > { %13939 = vmatmul.mubr.msk.f32.gmra.mrb[16].mxu0 %vm434_vm1, %v16356_v10  ;;  %v17176_v10 = vld [vmem:[%s15687_s24 + $0x71] sm:$0xff]  ;;  %18811 = vst [vmem:[#allocation36_spill] sm:$0xff] %v17199_v9 }
 0x206   : > { %13941 = vmatprep.mubr.msk.f32.mxu0 %vm434_vm1, %v16360_v62  ;;  %13552 = vmatprep.mubr.msk.f32.mxu1 %vm434_vm1, %v17176_v10  ;;  %v17189_v62 = vld [vmem:[%s15687_s24 + $0xe1] sm:$0xff] }
 0x207   : > { %18810 = vst [vmem:[#allocation35_spill] sm:$0xff] %v17189_v62 }
 0x208   : > { %13553 = vmatmul.mubr.msk.f32.gmra.mrb[12].mxu1 %vm434_vm1, %v17179_v55  ;;  %v17210_v55 = vld [vmem:[%s15687_s24 + $0x91] sm:$0xff] }
 0x209   : > { %13942 = vmatmul.mubr.msk.f32.gmra.mrb[18].mxu0 %vm434_vm1, %v16376_v53  ;;  %v17196_v53 = vld [vmem:[%s15687_s24 + $0x81] sm:$0xff] }
 0x20a   : > { %13944 = vmatprep.mubr.msk.f32.mxu0 %vm434_vm1, %v16381_v2  ;;  %v5306_v2 = vld [vmem:[%s15687_s24 + $0xe9] sm:$0xf]  ;;  %13555 = vmatprep.mubr.msk.f32.mxu1 %vm434_vm1, %v17196_v53 }
 0x20c   : > { %13556 = vmatmul.mubr.msk.f32.gmra.mrb[14].mxu1 %vm434_vm1, %v17199_v9  ;;  %v17230_v9 = vld [vmem:[%s15687_s24 + $0xa9] sm:$0xff] }
 0x20d   : > { %13945 = vmatmul.mubr.msk.f32.gmra.mrb[20].mxu0 %vm434_vm1, %v17184_v8  ;;  %v17213_v8 = vld [vmem:[%s15687_s24 + $0x99] sm:$0xff]  ;;  %13558 = vmatprep.mubr.msk.f32.mxu1 %vm434_vm1, %v17210_v55 }
 0x20e   : > { %13947 = vmatprep.mubr.msk.f32.mxu0 %vm434_vm1, %v17189_v62  ;;  %v6209_v62 = vld [vmem:[%s18596_s1 + $0x4c] sm:$0xf] }
 0x210   : > { %13559 = vmatmul.mubr.msk.f32.gmra.mrb[16].mxu1 %vm434_vm1, %v17213_v8 }
 0x211   : > { %13948 = vmatmul.mubr.msk.f32.gmra.mrb[22].mxu0 %vm434_vm1, %v5306_v2  ;;  %v17227_v2 = vld [vmem:[%s15687_s24 + $0xa1] sm:$0xff] }
 0x212   : > { %13952 = vmatprep.mubr.msk.f32.mxu0 %vm434_vm1, %v16512_v27  ;;  %13561 = vmatprep.mubr.msk.f32.mxu1 %vm434_vm1, %v17227_v2  ;;  %v17244_v27 = vld [vmem:[%s15687_s24 + $0xb1] sm:$0xff] }
 0x214   : > { %13562 = vmatmul.mubr.msk.f32.gmra.mrb[18].mxu1 %vm434_vm1, %v17230_v9 }
 0x215   : > { %13953 = vmatmul.mubr.msk.f32.vlgmr.msra.gmra.mrb[0].mxu0 %vm434_vm1, %v16515_v28  ;;  %v17247_v28 = vld [vmem:[%s15687_s24 + $0xb9] sm:$0xff]  ;;  %13564 = vmatprep.mubr.msk.f32.mxu1 %vm434_vm1, %v17244_v27 }
 0x216   : > { %13989 = vmatpush3.msk.msra.mxu0 %vm507_vm0, %v17034_v50  ;;  %13955 = vmatprep.mubr.msk.f32.mxu0 %vm434_vm1, %v16531_v30  ;;  %v17258_v30 = vld [vmem:[%s15687_s24 + $0xc1] sm:$0xff] }
 0x217   : > { %14026 = vmatprep.subr.msk.mxu0 %vm507_vm0, %v6209_v62  ;;  %v18820_v50 = vld [vmem:[#allocation17_spill] sm:$0xff] }
 0x218   : > { %13565 = vmatmul.mubr.msk.f32.gmra.mrb[20].mxu1 %vm434_vm1, %v17247_v28 }
 0x219   : > { %13956 = vmatmul.mubr.msk.f32.gmra.mrb[2].mxu0 %vm434_vm1, %v16534_v31  ;;  %v2216_v31 = vld [vmem:[%s15687_s24 + $0xc9] sm:$0xf]  ;;  %13567 = vmatprep.mubr.msk.f32.mxu1 %vm434_vm1, %v17258_v30 }
 0x21a   : > { %13958 = vmatprep.mubr.msk.f32.mxu0 %vm434_vm1, %v16549_v32  ;;  %v17287_v32 = vld [vmem:[%s15687_s24 + $0xba] sm:$0xff] }
 0x21c   : > { %13568 = vmatmul.mubr.msk.f32.gmra.mrb[22].mxu1 %vm434_vm1, %v2216_v31  ;;  %v18822_v31 = vld [vmem:[#allocation19_spill] sm:$0xff] }
 0x21d   : > { %13959 = vmatmul.mubr.msk.f32.gmra.mrb[4].mxu0 %vm434_vm1, %v16552_v33  ;;  %v17290_v33 = vld [vmem:[%s15687_s24 + $0xc2] sm:$0xff] }
 0x21e   : > { %13961 = vmatprep.mubr.msk.f32.mxu0 %vm434_vm1, %v16563_v34  ;;  %v17301_v34 = vld [vmem:[%s15687_s24 + $0xda] sm:$0xff] }
 0x221   : > { %13962 = vmatmul.mubr.msk.f32.gmra.mrb[6].mxu0 %vm434_vm1, %v16566_v35  ;;  %v17304_v35 = vld [vmem:[%s15687_s24 + $0xe2] sm:$0xff] }
 0x222   : > { %13964 = vmatprep.mubr.msk.f32.mxu0 %vm434_vm1, %v16577_v42  ;;  %v5615_v42 = vld [vmem:[%s15687_s24 + $0xea] sm:$0xf] }
 0x225   : > { %13965 = vmatmul.mubr.msk.f32.gmra.mrb[8].mxu0 %vm434_vm1, %v16580_v43  ;;  %v18813_v43 = vld [vmem:[#allocation10_spill] sm:$0xff] }
 0x226   : > { %13967 = vmatprep.mubr.msk.f32.mxu0 %vm434_vm1, %v16593_v39  ;;  %v18814_v39 = vld [vmem:[#allocation11_spill] sm:$0xff] }
 0x229   : > { %13968 = vmatmul.mubr.msk.f32.gmra.mrb[10].mxu0 %vm434_vm1, %v16596_v0  ;;  %v18815_v0 = vld [vmem:[#allocation12_spill] sm:$0xff] }
 0x22a   : > { %13970 = vmatprep.mubr.msk.f32.mxu0 %vm434_vm1, %v16605_v11  ;;  %v18816_v11 = vld [vmem:[#allocation13_spill] sm:$0xff] }
 0x22d   : > { %13971 = vmatmul.mubr.msk.f32.gmra.mrb[12].mxu0 %vm434_vm1, %v16608_v12  ;;  %v18817_v12 = vld [vmem:[#allocation14_spill] sm:$0xff] }
 0x22e   : > { %13973 = vmatprep.mubr.msk.f32.mxu0 %vm434_vm1, %v16619_v18 }
 0x231   : > { %13974 = vmatmul.mubr.msk.f32.gmra.mrb[14].mxu0 %vm434_vm1, %v16622_v19 }
 0x232   : > { %13976 = vmatprep.mubr.msk.f32.mxu0 %vm434_vm1, %v16633_v24 }
 0x235   : > { %13977 = vmatmul.mubr.msk.f32.gmra.mrb[16].mxu0 %vm434_vm1, %v17287_v32 }
 0x236   : > { %13979 = vmatprep.mubr.msk.f32.mxu0 %vm434_vm1, %v17290_v33 }
 0x239   : > { %13980 = vmatmul.mubr.msk.f32.gmra.mrb[18].mxu0 %vm434_vm1, %v16494_v22  ;;  %v6518_v22 = vld [vmem:[%s18596_s1 + $0x50] sm:$0xf] }
 0x23a   : > { %13982 = vmatprep.mubr.msk.f32.mxu0 %vm434_vm1, %v16498_v23  ;;  %v18812_v23 = vld [vmem:[#allocation9_spill] sm:$0xff] }
 0x23d   : > { %13983 = vmatmul.mubr.msk.f32.gmra.mrb[20].mxu0 %vm434_vm1, %v17301_v34 }
 0x23e   : > { %13985 = vmatprep.mubr.msk.f32.mxu0 %vm434_vm1, %v17304_v35 }
 0x241   : > { %13986 = vmatmul.mubr.msk.f32.gmra.mrb[22].mxu0 %vm434_vm1, %v5615_v42  ;;  %v18823_v42 = vld [vmem:[#allocation20_spill] sm:$0xff] }
 0x242   : > { %13990 = vmatprep.mubr.msk.f32.mxu0 %vm434_vm1, %v16679_v44  ;;  %v18818_v44 = vld [vmem:[#allocation15_spill] sm:$0xff] }
 0x245   : > { %13991 = vmatmul.mubr.msk.f32.vlgmr.msra.gmra.mrb[0].mxu0 %vm434_vm1, %v16682_v45  ;;  %v18819_v45 = vld [vmem:[#allocation16_spill] sm:$0xff] }
 0x246   : > { %14027 = vmatpush3.msk.msra.mxu0 %vm507_vm0, %v6209_v62  ;;  %13993 = vmatprep.mubr.msk.f32.mxu0 %vm434_vm1, %v16698_v17  ;;  %v18821_v62 = vld [vmem:[#allocation18_spill] sm:$0xff] }
 0x247   : > { %14064 = vmatprep.subr.msk.mxu0 %vm507_vm0, %v6518_v22 }
 0x249   : > { %13994 = vmatmul.mubr.msk.f32.gmra.mrb[2].mxu0 %vm434_vm1, %v18812_v23 }
 0x24a   : > { %13996 = vmatprep.mubr.msk.f32.mxu0 %vm434_vm1, %v18813_v43 }
 0x24d   : > { %13997 = vmatmul.mubr.msk.f32.gmra.mrb[4].mxu0 %vm434_vm1, %v18814_v39 }
 0x24e   : > { %13999 = vmatprep.mubr.msk.f32.mxu0 %vm434_vm1, %v18815_v0 }
 0x251   : > { %14000 = vmatmul.mubr.msk.f32.gmra.mrb[6].mxu0 %vm434_vm1, %v18816_v11  ;;  %v17355_v11 = vld [vmem:[%s15687_s24 + $0xc3] sm:$0xff] }
 0x252   : > { %14002 = vmatprep.mubr.msk.f32.mxu0 %vm434_vm1, %v18817_v12  ;;  %v18824_v12 = vld [vmem:[#allocation21_spill] sm:$0xff] }
 0x255   : > { %14003 = vmatmul.mubr.msk.f32.gmra.mrb[8].mxu0 %vm434_vm1, %v18818_v44  ;;  %v18825_v44 = vld [vmem:[#allocation22_spill] sm:$0xff] }
 0x256   : > { %14005 = vmatprep.mubr.msk.f32.mxu0 %vm434_vm1, %v18819_v45  ;;  %v17352_v45 = vld [vmem:[%s15687_s24 + $0xbb] sm:$0xff] }
 0x257   : > { %18826 = vst [vmem:[#allocation37_spill] sm:$0xff] %v17352_v45 }
 0x259   : > { %14006 = vmatmul.mubr.msk.f32.gmra.mrb[10].mxu0 %vm434_vm1, %v18820_v50 }
 0x25a   : > { %14008 = vmatprep.mubr.msk.f32.mxu0 %vm434_vm1, %v18821_v62  ;;  %v17369_v62 = vld [vmem:[%s15687_s24 + $0xe3] sm:$0xff] }
 0x25d   : > { %14009 = vmatmul.mubr.msk.f32.gmra.mrb[12].mxu0 %vm434_vm1, %v18822_v31  ;;  %v18827_v31 = vld [vmem:[#allocation7_spill] sm:$0xff] }
 0x25e   : > { %14011 = vmatprep.mubr.msk.f32.mxu0 %vm434_vm1, %v18823_v42  ;;  %v18828_v42 = vld [vmem:[#allocation8_spill] sm:$0xff] }
 0x261   : > { %14012 = vmatmul.mubr.msk.f32.gmra.mrb[14].mxu0 %vm434_vm1, %v18824_v12  ;;  %v17366_v12 = vld [vmem:[%s15687_s24 + $0xdb] sm:$0xff] }
 0x262   : > { %14014 = vmatprep.mubr.msk.f32.mxu0 %vm434_vm1, %v18825_v44 }
 0x265   : > { %14015 = vmatmul.mubr.msk.f32.gmra.mrb[16].mxu0 %vm434_vm1, %v17352_v45  ;;  %v5924_v45 = vld [vmem:[%s15687_s24 + $0xeb] sm:$0xf] }
 0x266   : > { %14017 = vmatprep.mubr.msk.f32.mxu0 %vm434_vm1, %v17355_v11 }
 0x269   : > { %14018 = vmatmul.mubr.msk.f32.gmra.mrb[18].mxu0 %vm434_vm1, %v18827_v31  ;;  %v6827_v31 = vld [vmem:[%s18596_s1 + $0x54] sm:$0xf] }
 0x26a   : > { %14020 = vmatprep.mubr.msk.f32.mxu0 %vm434_vm1, %v18828_v42  ;;  %v6233_v42 = vld [vmem:[%s15687_s24 + $0xec] sm:$0xf] }
 0x26d   : > { %14021 = vmatmul.mubr.msk.f32.gmra.mrb[20].mxu0 %vm434_vm1, %v17366_v12 }
 0x26e   : > { %14023 = vmatprep.mubr.msk.f32.mxu0 %vm434_vm1, %v17369_v62 }
 0x271   : > { %14024 = vmatmul.mubr.msk.f32.gmra.mrb[22].mxu0 %vm434_vm1, %v5924_v45  ;;  %v17434_v45 = vld [vmem:[%s15687_s24 + $0xe4] sm:$0xff] }
 0x272   : > { %14028 = vmatprep.mubr.msk.f32.mxu0 %vm434_vm1, %v16846_v25  ;;  %v17417_v25 = vld [vmem:[%s15687_s24 + $0xbc] sm:$0xff] }
 0x275   : > { %14029 = vmatmul.mubr.msk.f32.vlgmr.msra.gmra.mrb[0].mxu0 %vm434_vm1, %v16849_v15  ;;  %v17420_v15 = vld [vmem:[%s15687_s24 + $0xc4] sm:$0xff] }
 0x276   : > { %14065 = vmatpush3.msk.msra.mxu0 %vm507_vm0, %v6518_v22  ;;  %14031 = vmatprep.mubr.msk.f32.mxu0 %vm434_vm1, %v16865_v21  ;;  %v17431_v22 = vld [vmem:[%s15687_s24 + $0xdc] sm:$0xff] }
 0x277   : > { %14102 = vmatprep.subr.msk.mxu0 %vm507_vm0, %v6827_v31 }
 0x279   : > { %14032 = vmatmul.mubr.msk.f32.gmra.mrb[2].mxu0 %vm434_vm1, %v16868_v26 }
 0x27a   : > { %14034 = vmatprep.mubr.msk.f32.mxu0 %vm434_vm1, %v16883_v38 }
 0x27d   : > { %14035 = vmatmul.mubr.msk.f32.gmra.mrb[4].mxu0 %vm434_vm1, %v16886_v63 }
 0x27e   : > { %14037 = vmatprep.mubr.msk.f32.mxu0 %vm434_vm1, %v16897_v41 }
 0x281   : > { %14038 = vmatmul.mubr.msk.f32.gmra.mrb[6].mxu0 %vm434_vm1, %v16900_v5 }
 0x282   : > { %14040 = vmatprep.mubr.msk.f32.mxu0 %vm434_vm1, %v16911_v37 }
 0x285   : > { %14041 = vmatmul.mubr.msk.f32.gmra.mrb[8].mxu0 %vm434_vm1, %v16914_v16 }
 0x286   : > { %14043 = vmatprep.mubr.msk.f32.mxu0 %vm434_vm1, %v16927_v13 }
 0x289   : > { %14044 = vmatmul.mubr.msk.f32.gmra.mrb[10].mxu0 %vm434_vm1, %v16930_v14 }
 0x28a   : > { %14046 = vmatprep.mubr.msk.f32.mxu0 %vm434_vm1, %v16939_v1 }
 0x28d   : > { %14047 = vmatmul.mubr.msk.f32.gmra.mrb[12].mxu0 %vm434_vm1, %v16942_v61 }
 0x28e   : > { %14049 = vmatprep.mubr.msk.f32.mxu0 %vm434_vm1, %v16953_v60 }
 0x291   : > { %14050 = vmatmul.mubr.msk.f32.gmra.mrb[14].mxu0 %vm434_vm1, %v16956_v3 }
 0x292   : > { %14052 = vmatprep.mubr.msk.f32.mxu0 %vm434_vm1, %v16967_v58 }
 0x295   : > { %14053 = vmatmul.mubr.msk.f32.gmra.mrb[16].mxu0 %vm434_vm1, %v17417_v25 }
 0x296   : > { %14055 = vmatprep.mubr.msk.f32.mxu0 %vm434_vm1, %v17420_v15 }
 0x299   : > { %14056 = vmatmul.mubr.msk.f32.gmra.mrb[18].mxu0 %vm434_vm1, %v16828_v40  ;;  %v18829_v40 = vld [vmem:[#allocation29_spill] sm:$0xff] }
 0x29a   : > { %14058 = vmatprep.mubr.msk.f32.mxu0 %vm434_vm1, %v16832_v20  ;;  %v7136_v20 = vld [vmem:[%s18596_s1 + $0x58] sm:$0xf] }
 0x29d   : > { %14059 = vmatmul.mubr.msk.f32.gmra.mrb[20].mxu0 %vm434_vm1, %v17431_v22 }
 0x29e   : > { %14061 = vmatprep.mubr.msk.f32.mxu0 %vm434_vm1, %v17434_v45 }
 0x2a1   : > { %14062 = vmatmul.mubr.msk.f32.gmra.mrb[22].mxu0 %vm434_vm1, %v6233_v42 }
 0x2a2   : > { %14066 = vmatprep.mubr.msk.f32.mxu0 %vm434_vm1, %v17019_v29  ;;  %v18830_v29 = vld [vmem:[#allocation30_spill] sm:$0xff] }
 0x2a5   : > { %14067 = vmatmul.mubr.msk.f32.vlgmr.msra.gmra.mrb[0].mxu0 %vm434_vm1, %v17022_v36  ;;  %v18831_v36 = vld [vmem:[#allocation31_spill] sm:$0xff] }
 0x2a6   : > { %14103 = vmatpush3.msk.msra.mxu0 %vm507_vm0, %v6827_v31  ;;  %14069 = vmatprep.mubr.msk.f32.mxu0 %vm434_vm1, %v17040_v49  ;;  %v6536_v49 = vld [vmem:[%s15687_s24 + $0xc8] sm:$0xff] }
 0x2a7   : > { %14140 = vmatprep.subr.msk.mxu0 %vm507_vm0, %v7136_v20 }
 0x2a9   : > { %14070 = vmatmul.mubr.msk.f32.gmra.mrb[2].mxu0 %vm434_vm1, %v17043_v54  ;;  %v6537_v54 = vld [vmem:[%s15687_s24 + $0xd0] sm:$0xff] }
 0x2aa   : > { %14072 = vmatprep.mubr.msk.f32.mxu0 %vm434_vm1, %v17064_v46  ;;  %v18832_v46 = vld [vmem:[#allocation23_spill] sm:$0xff] }
 0x2ad   : > { %14073 = vmatmul.mubr.msk.f32.gmra.mrb[4].mxu0 %vm434_vm1, %v17067_v47  ;;  %v18833_v47 = vld [vmem:[#allocation24_spill] sm:$0xff] }
 0x2ae   : > { %14075 = vmatprep.mubr.msk.f32.mxu0 %vm434_vm1, %v17081_v57 }
 0x2b1   : > { %14076 = vmatmul.mubr.msk.f32.gmra.mrb[6].mxu0 %vm434_vm1, %v17084_v48  ;;  %v17484_v48 = vpop.f32.mrb[0].mxu1 }
 0x2b2   : > { %14078 = vmatprep.mubr.msk.f32.mxu0 %vm434_vm1, %v17095_v51  ;;  %v17487_v51 = vpop.f32.mrb[1].mxu1 }
 0x2b5   : > { %14079 = vmatmul.mubr.msk.f32.gmra.mrb[8].mxu0 %vm434_vm1, %v17098_v52  ;;  %v6540_v52 = vld [vmem:[%s15687_s24 + $0xe8] sm:$0xff] }
 0x2b6   : > { %14081 = vmatprep.mubr.msk.f32.mxu0 %vm434_vm1, %v17111_v4  ;;  %v6541_v4 = vld [vmem:[%s15687_s24 + $0xf0] sm:$0xff] }
 0x2b9   : > { %14082 = vmatmul.mubr.msk.f32.gmra.mrb[10].mxu0 %vm434_vm1, %v18829_v40  ;;  %v18834_v40 = vld [vmem:[#allocation25_spill] sm:$0xff] }
 0x2ba   : > { %14084 = vmatprep.mubr.msk.f32.mxu0 %vm434_vm1, %v18830_v29 }
 0x2bd   : > { %14085 = vmatmul.mubr.msk.f32.gmra.mrb[12].mxu0 %vm434_vm1, %v18831_v36  ;;  %v7445_v36 = vld [vmem:[%s18596_s1 + $0x5c] sm:$0xf] }
 0x2be   : > { %14087 = vmatprep.mubr.msk.f32.mxu0 %vm434_vm1, %v17137_v56  ;;  %v17491_v56 = vpop.f32.mrb[2].mxu1 }
 0x2bf   : > { %v17496_v57 = vpop.f32.mrb[3].mxu1 }
 0x2c1   : > { %14088 = vmatmul.mubr.msk.f32.gmra.mrb[14].mxu0 %vm434_vm1, %v17140_v7  ;;  %v17500_v7 = vpop.f32.mrb[4].mxu1 }
 0x2c2   : > { %14090 = vmatprep.mubr.msk.f32.mxu0 %vm434_vm1, %v17151_v59  ;;  %v6542_v59 = vld [vmem:[%s15687_s24 + $0xf8] sm:$0xf]  ;;  %v17504_v31 = vpop.f32.mrb[5].mxu1 }
 0x2c3   : > { %v17507_v42 = vpop.f32.mrb[6].mxu1 }
 0x2c4   : > { %v17511_v29 = vpop.f32.mrb[7].mxu1 }
 0x2c5   : > { %14091 = vmatmul.mubr.msk.f32.gmra.mrb[16].mxu0 %vm434_vm1, %v6536_v49  ;;  %v18835_v49 = vld [vmem:[#allocation26_spill] sm:$0xff] }
 0x2c6   : > { %14093 = vmatprep.mubr.msk.f32.mxu0 %vm434_vm1, %v6537_v54  ;;  %v17518_v54 = vpop.f32.mrb[8].mxu1 }
 0x2c9   : > { %14094 = vmatmul.mubr.msk.f32.gmra.mrb[18].mxu0 %vm434_vm1, %v18832_v46  ;;  %v18836_v46 = vld [vmem:[#allocation27_spill] sm:$0xff] }
 0x2ca   : > { %14096 = vmatprep.mubr.msk.f32.mxu0 %vm434_vm1, %v18833_v47  ;;  %v17523_v47 = vpop.f32.mrb[9].mxu1 }
 0x2cd   : > { %14097 = vmatmul.mubr.msk.f32.gmra.mrb[20].mxu0 %vm434_vm1, %v6540_v52  ;;  %v18837_v52 = vld [vmem:[#allocation28_spill] sm:$0xff] }
 0x2ce   : > { %14099 = vmatprep.mubr.msk.f32.mxu0 %vm434_vm1, %v6541_v4 }
 0x2d1   : > { %14100 = vmatmul.mubr.msk.f32.gmra.mrb[22].mxu0 %vm434_vm1, %v6542_v59 }
 0x2d2   : > { %14104 = vmatprep.mubr.msk.f32.mxu0 %vm434_vm1, %v18834_v40  ;;  %v18839_v40 = vld [vmem:[#allocation32_spill] sm:$0xff] }
 0x2d5   : > { %14105 = vmatmul.mubr.msk.f32.vlgmr.msra.gmra.mrb[0].mxu0 %vm434_vm1, %v18835_v49 }
 0x2d6   : > { %14141 = vmatpush3.msk.msra.mxu0 %vm507_vm0, %v7136_v20  ;;  %14107 = vmatprep.mubr.msk.f32.mxu0 %vm434_vm1, %v18836_v46  ;;  %v18840_v46 = vld [vmem:[#allocation33_spill] sm:$0xff] }
 0x2d7   : > { %14178 = vmatprep.subr.msk.mxu0 %vm507_vm0, %v7445_v36  ;;  %v17530_v4 = vpop.f32.mrb[10].mxu1 }
 0x2d8   : > { %v17532_v59 = vpop.f32.mrb[11].mxu1 }
 0x2d9   : > { %14108 = vmatmul.mubr.msk.f32.gmra.mrb[2].mxu0 %vm434_vm1, %v18837_v52  ;;  %18838 = vst [vmem:[#allocation38_spill] sm:$0xff] %v17532_v59  ;;  %v18841_v59 = vld [vmem:[#allocation36_spill] sm:$0xff] }
 0x2da   : > { %14110 = vmatprep.mubr.msk.f32.mxu0 %vm434_vm1, %v17162_v6 }
 0x2db   : > { %v17538_v20 = vpop.f32.mrb[12].mxu1 }
 0x2dc   : > { %v17540_v49 = vpop.f32.mrb[13].mxu1 }
 0x2dd   : > { %14111 = vmatmul.mubr.msk.f32.gmra.mrb[4].mxu0 %vm434_vm1, %v18839_v40 }
 0x2de   : > { %14113 = vmatprep.mubr.msk.f32.mxu0 %vm434_vm1, %v17176_v10 }
 0x2df   : > { %v17546_v6 = vpop.f32.mrb[14].mxu1 }
 0x2e0   : > { %v17548_v52 = vpop.f32.mrb[15].mxu1 }
 0x2e1   : > { %14114 = vmatmul.mubr.msk.f32.gmra.mrb[6].mxu0 %vm434_vm1, %v18840_v46 }
 0x2e2   : > { %14116 = vmatprep.mubr.msk.f32.mxu0 %vm434_vm1, %v17196_v53 }
 0x2e3   : > { %v17554_v10 = vpop.f32.mrb[16].mxu1 }
 0x2e4   : > { %v17556_v40 = vpop.f32.mrb[17].mxu1 }
 0x2e5   : > { %14117 = vmatmul.mubr.msk.f32.gmra.mrb[8].mxu0 %vm434_vm1, %v18841_v59 }
 0x2e6   : > { %14119 = vmatprep.mubr.msk.f32.mxu0 %vm434_vm1, %v17210_v55 }
 0x2e7   : > { %v17562_v53 = vpop.f32.mrb[18].mxu1 }
 0x2e8   : > { %v17564_v46 = vpop.f32.mrb[19].mxu1 }
 0x2e9   : > { %14120 = vmatmul.mubr.msk.f32.gmra.mrb[10].mxu0 %vm434_vm1, %v17213_v8  ;;  %18842 = vst [vmem:[#allocation39_spill] sm:$0xff] %v17564_v46  ;;  %v6845_v8 = vld [vmem:[%s15687_s24 + $0xc9] sm:$0xff] }
 0x2ea   : > { %14122 = vmatprep.mubr.msk.f32.mxu0 %vm434_vm1, %v17227_v2  ;;  %v6846_v2 = vld [vmem:[%s15687_s24 + $0xd1] sm:$0xff] }
 0x2eb   : > { %v17570_v55 = vpop.f32.mrb[20].mxu1 }
 0x2ec   : > { %v17572_v59 = vpop.f32.mrb[21].mxu1 }
 0x2ed   : > { %14123 = vmatmul.mubr.msk.f32.gmra.mrb[12].mxu0 %vm434_vm1, %v17230_v9  ;;  %18843 = vst [vmem:[#allocation40_spill] sm:$0xff] %v17572_v59  ;;  %v18847_v59 = vld [vmem:[#allocation35_spill] sm:$0xff] }
 0x2ee   : > { %14125 = vmatprep.mubr.msk.f32.mxu0 %vm434_vm1, %v17244_v27  ;;  %v18846_v27 = vld [vmem:[#allocation34_spill] sm:$0xff] }
 0x2ef   : > { %v17580_v9 = vpop.f32.mrb[22].mxu1 }
 0x2f0   : > { %18844 = vst [vmem:[#allocation41_spill] sm:$0xff] %v17580_v9  ;;  %v17582_v46 = vpop.f32.mrb[23].mxu1  ;;  %v7147_v9 = vld [vmem:[%s15687_s24 + $0x92] sm:$0xff] }
 0x2f1   : > { %14126 = vmatmul.mubr.msk.f32.gmra.mrb[14].mxu0 %vm434_vm1, %v17247_v28  ;;  %18845 = vst [vmem:[#allocation42_spill] sm:$0xff] %v17582_v46  ;;  %v6849_v28 = vld [vmem:[%s15687_s24 + $0xe9] sm:$0xff]  ;;  %v6851_v46 = vld [vmem:[%s15687_s24 + $0xf9] sm:$0xf] }
 0x2f2   : > { %14128 = vmatprep.mubr.msk.f32.mxu0 %vm434_vm1, %v17258_v30  ;;  %v6850_v30 = vld [vmem:[%s15687_s24 + $0xf1] sm:$0xff] }
 0x2f5   : > { %14129 = vmatmul.mubr.msk.f32.gmra.mrb[16].mxu0 %vm434_vm1, %v6845_v8  ;;  %v7137_v8 = vld [vmem:[%s15687_s24 + $0x42] sm:$0xff] }
 0x2f6   : > { %14131 = vmatprep.mubr.msk.f32.mxu0 %vm434_vm1, %v6846_v2  ;;  %v7138_v2 = vld [vmem:[%s15687_s24 + $0x4a] sm:$0xff] }
 0x2f9   : > { %14132 = vmatmul.mubr.msk.f32.gmra.mrb[18].mxu0 %vm434_vm1, %v18846_v27  ;;  %v7139_v27 = vld [vmem:[%s15687_s24 + $0x52] sm:$0xff] }
 0x2fa   : > { %14134 = vmatprep.mubr.msk.f32.mxu0 %vm434_vm1, %v18847_v59  ;;  %v7754_v59 = vld [vmem:[%s18596_s1 + $0x60] sm:$0xf] }
 0x2fd   : > { %14135 = vmatmul.mubr.msk.f32.gmra.mrb[20].mxu0 %vm434_vm1, %v6849_v28  ;;  %v7140_v28 = vld [vmem:[%s15687_s24 + $0x5a] sm:$0xff] }
 0x2fe   : > { %14137 = vmatprep.mubr.msk.f32.mxu0 %vm434_vm1, %v6850_v30  ;;  %v7142_v30 = vld [vmem:[%s15687_s24 + $0x6a] sm:$0xff] }
 0x301   : > { %14138 = vmatmul.mubr.msk.f32.gmra.mrb[22].mxu0 %vm434_vm1, %v6851_v46  ;;  %v7141_v46 = vld [vmem:[%s15687_s24 + $0x62] sm:$0xff] }
 0x302   : > { %14142 = vmatprep.mubr.msk.f32.mxu0 %vm434_vm1, %v7137_v8  ;;  %v7143_v8 = vld [vmem:[%s15687_s24 + $0x72] sm:$0xff] }
 0x305   : > { %14143 = vmatmul.mubr.msk.f32.vlgmr.msra.gmra.mrb[0].mxu0 %vm434_vm1, %v7138_v2  ;;  %v7145_v2 = vld [vmem:[%s15687_s24 + $0x82] sm:$0xff] }
 0x306   : > { %14179 = vmatpush3.msk.msra.mxu0 %vm507_vm0, %v7445_v36  ;;  %14145 = vmatprep.mubr.msk.f32.mxu0 %vm434_vm1, %v7139_v27  ;;  %v7144_v36 = vld [vmem:[%s15687_s24 + $0x7a] sm:$0xff]  ;;  %v7146_v27 = vld [vmem:[%s15687_s24 + $0x8a] sm:$0xff] }
 0x307   : > { %14216 = vmatprep.subr.msk.mxu0 %vm507_vm0, %v7754_v59 }
 0x309   : > { %14146 = vmatmul.mubr.msk.f32.gmra.mrb[2].mxu0 %vm434_vm1, %v7140_v28  ;;  %v7148_v28 = vld [vmem:[%s15687_s24 + $0x9a] sm:$0xff] }
 0x30a   : > { %14148 = vmatprep.mubr.msk.f32.mxu0 %vm434_vm1, %v7141_v46  ;;  %v7155_v46 = vld [vmem:[%s15687_s24 + $0xd2] sm:$0xff] }
 0x30d   : > { %14149 = vmatmul.mubr.msk.f32.gmra.mrb[4].mxu0 %vm434_vm1, %v7142_v30  ;;  %v7467_v30 = vld [vmem:[%s15687_s24 + $0xeb] sm:$0xff] }
 0x30e   : > { %14151 = vmatprep.mubr.msk.f32.mxu0 %vm434_vm1, %v7143_v8  ;;  %v7469_v8 = vld [vmem:[%s15687_s24 + $0xfb] sm:$0xf] }
 0x311   : > { %14152 = vmatmul.mubr.msk.f32.gmra.mrb[6].mxu0 %vm434_vm1, %v7144_v36 }
 0x312   : > { %14154 = vmatprep.mubr.msk.f32.mxu0 %vm434_vm1, %v7145_v2 }
 0x315   : > { %14155 = vmatmul.mubr.msk.f32.gmra.mrb[8].mxu0 %vm434_vm1, %v7146_v27 }
 0x316   : > { %14157 = vmatprep.mubr.msk.f32.mxu0 %vm434_vm1, %v7147_v9  ;;  %v7154_v9 = vld [vmem:[%s15687_s24 + $0xca] sm:$0xff] }
 0x319   : > { %14158 = vmatmul.mubr.msk.f32.gmra.mrb[10].mxu0 %vm434_vm1, %v7148_v28 }
 0x31a   : > { %14160 = vmatprep.mubr.msk.f32.mxu0 %vm434_vm1, %v16619_v18  ;;  %v7158_v18 = vld [vmem:[%s15687_s24 + $0xea] sm:$0xff] }
 0x31d   : > { %14161 = vmatmul.mubr.msk.f32.gmra.mrb[12].mxu0 %vm434_vm1, %v16622_v19  ;;  %v7159_v19 = vld [vmem:[%s15687_s24 + $0xf2] sm:$0xff] }
 0x31e   : > { %14163 = vmatprep.mubr.msk.f32.mxu0 %vm434_vm1, %v16633_v24  ;;  %v7160_v24 = vld [vmem:[%s15687_s24 + $0xfa] sm:$0xf] }
 0x321   : > { %14164 = vmatmul.mubr.msk.f32.gmra.mrb[14].mxu0 %vm434_vm1, %v17287_v32  ;;  %v18848_v32 = vld [vmem:[#allocation13_spill] sm:$0xff] }
 0x322   : > { %14166 = vmatprep.mubr.msk.f32.mxu0 %vm434_vm1, %v17290_v33  ;;  %v18850_v33 = vld [vmem:[#allocation15_spill] sm:$0xff] }
 0x325   : > { %14167 = vmatmul.mubr.msk.f32.gmra.mrb[16].mxu0 %vm434_vm1, %v7154_v9 }
 0x326   : > { %14169 = vmatprep.mubr.msk.f32.mxu0 %vm434_vm1, %v7155_v46 }
 0x329   : > { %14170 = vmatmul.mubr.msk.f32.gmra.mrb[18].mxu0 %vm434_vm1, %v17301_v34  ;;  %v18851_v34 = vld [vmem:[#allocation16_spill] sm:$0xff] }
 0x32a   : > { %14172 = vmatprep.mubr.msk.f32.mxu0 %vm434_vm1, %v17304_v35  ;;  %v18852_v35 = vld [vmem:[#allocation18_spill] sm:$0xff] }
 0x32d   : > { %14173 = vmatmul.mubr.msk.f32.gmra.mrb[20].mxu0 %vm434_vm1, %v7158_v18 }
 0x32e   : > { %14175 = vmatprep.mubr.msk.f32.mxu0 %vm434_vm1, %v7159_v19 }
 0x331   : > { %14176 = vmatmul.mubr.msk.f32.gmra.mrb[22].mxu0 %vm434_vm1, %v7160_v24 }
 0x332   : > { %14180 = vmatprep.mubr.msk.f32.mxu0 %vm434_vm1, %v16698_v17  ;;  %v18849_v17 = vld [vmem:[#allocation14_spill] sm:$0xff] }
 0x335   : > { %14181 = vmatmul.mubr.msk.f32.vlgmr.msra.gmra.mrb[0].mxu0 %vm434_vm1, %v18812_v23  ;;  %v18853_v23 = vld [vmem:[#allocation19_spill] sm:$0xff] }
 0x336   : > { %14217 = vmatpush3.msk.msra.mxu0 %vm507_vm0, %v7754_v59  ;;  %14183 = vmatprep.mubr.msk.f32.mxu0 %vm434_vm1, %v18813_v43  ;;  %v18854_v43 = vld [vmem:[#allocation20_spill] sm:$0xff] }
 0x337   : > { %v7464_v59 = vld [vmem:[%s15687_s24 + $0xd3] sm:$0xff] }
 0x339   : > { %14184 = vmatmul.mubr.msk.f32.gmra.mrb[2].mxu0 %vm434_vm1, %v18814_v39  ;;  %v18855_v39 = vld [vmem:[#allocation21_spill] sm:$0xff] }
 0x33a   : > { %14186 = vmatprep.mubr.msk.f32.mxu0 %vm434_vm1, %v18815_v0  ;;  %v18856_v0 = vld [vmem:[#allocation37_spill] sm:$0xff] }
 0x33d   : > { %14187 = vmatmul.mubr.msk.f32.gmra.mrb[4].mxu0 %vm434_vm1, %v18848_v32 }
 0x33e   : > { %14189 = vmatprep.mubr.msk.f32.mxu0 %vm434_vm1, %v18849_v17 }
 0x341   : > { %14190 = vmatmul.mubr.msk.f32.gmra.mrb[6].mxu0 %vm434_vm1, %v18850_v33 }
 0x342   : > { %14192 = vmatprep.mubr.msk.f32.mxu0 %vm434_vm1, %v18851_v34 }
 0x345   : > { %14193 = vmatmul.mubr.msk.f32.gmra.mrb[8].mxu0 %vm434_vm1, %v18820_v50  ;;  %v7463_v50 = vld [vmem:[%s15687_s24 + $0xcb] sm:$0xff] }
 0x346   : > { %14195 = vmatprep.mubr.msk.f32.mxu0 %vm434_vm1, %v18852_v35 }
 0x349   : > { %14196 = vmatmul.mubr.msk.f32.gmra.mrb[10].mxu0 %vm434_vm1, %v18853_v23 }
 0x34a   : > { %14198 = vmatprep.mubr.msk.f32.mxu0 %vm434_vm1, %v18854_v43 }
 0x34d   : > { %14199 = vmatmul.mubr.msk.f32.gmra.mrb[12].mxu0 %vm434_vm1, %v18855_v39 }
 0x34e   : > { %14201 = vmatprep.mubr.msk.f32.mxu0 %vm434_vm1, %v18825_v44  ;;  %v7468_v44 = vld [vmem:[%s15687_s24 + $0xf3] sm:$0xff] }
 0x351   : > { %14202 = vmatmul.mubr.msk.f32.gmra.mrb[14].mxu0 %vm434_vm1, %v18856_v0 }
 0x352   : > { %14204 = vmatprep.mubr.msk.f32.mxu0 %vm434_vm1, %v17355_v11 }
 0x355   : > { %14205 = vmatmul.mubr.msk.f32.gmra.mrb[16].mxu0 %vm434_vm1, %v7463_v50 }
 0x356   : > { %14207 = vmatprep.mubr.msk.f32.mxu0 %vm434_vm1, %v7464_v59 }
 0x359   : > { %14208 = vmatmul.mubr.msk.f32.gmra.mrb[18].mxu0 %vm434_vm1, %v17366_v12 }
 0x35a   : > { %14210 = vmatprep.mubr.msk.f32.mxu0 %vm434_vm1, %v17369_v62 }
 0x35d   : > { %14211 = vmatmul.mubr.msk.f32.gmra.mrb[20].mxu0 %vm434_vm1, %v7467_v30 }
 0x35e   : > { %14213 = vmatprep.mubr.msk.f32.mxu0 %vm434_vm1, %v7468_v44 }
 0x361   : > { %14214 = vmatmul.mubr.msk.f32.gmra.mrb[22].mxu0 %vm434_vm1, %v7469_v8 }
 0x362   : > { %14218 = vmatprep.mubr.msk.f32.mxu0 %vm434_vm1, %v16865_v21  ;;  %v7772_v21 = vld [vmem:[%s15687_s24 + $0xcc] sm:$0xff] }
 0x365   : > { %14219 = vmatmul.mubr.msk.f32.vlgmr.msra.gmra.mrb[0].mxu0 %vm434_vm1, %v16868_v26  ;;  %v7773_v26 = vld [vmem:[%s15687_s24 + $0xd4] sm:$0xff] }
 0x366   : > { %14221 = vmatprep.mubr.msk.f32.mxu0 %vm434_vm1, %v16883_v38  ;;  %v7776_v38 = vld [vmem:[%s15687_s24 + $0xec] sm:$0xff] }
 0x369   : > { %14222 = vmatmul.mubr.msk.f32.gmra.mrb[2].mxu0 %vm434_vm1, %v16886_v63  ;;  %v7777_v63 = vld [vmem:[%s15687_s24 + $0xf4] sm:$0xff] }
 0x36a   : > { %14224 = vmatprep.mubr.msk.f32.mxu0 %vm434_vm1, %v16897_v41  ;;  %v7778_v41 = vld [vmem:[%s15687_s24 + $0xfc] sm:$0xf] }
 0x36d   : > { %14225 = vmatmul.mubr.msk.f32.gmra.mrb[4].mxu0 %vm434_vm1, %v16900_v5  ;;  %v15561_v5 = vmov 0.0  }
 0x36e   : > { %14227 = vmatprep.mubr.msk.f32.mxu0 %vm434_vm1, %v16911_v37  ;;  %14254 = vmatprep.subr.mxu1 %v15561_v5  ;;  %v8311_v37 = vld [vmem:[%s18598_s3 + $0x6] sm:$0x3f] }
 0x36f   : > { %14255 = vmatpush3.msk.msra.mxu1 %vm8332_vm2, %v8311_v37  ;;  %14256 = vmatprep.mubr.msk.f32.mxu1 %vm15562_vm3, %v15561_v5 }
 0x370   : > { %14271 = vmatprep.subr.mxu1 %v15561_v5 }
 0x371   : > { %14228 = vmatmul.mubr.msk.f32.gmra.mrb[6].mxu0 %vm434_vm1, %v16914_v16 }
 0x372   : > { %14230 = vmatprep.mubr.msk.f32.mxu0 %vm434_vm1, %v16927_v13  ;;  %v17757_v13 = vld [vmem:[%s18597_s2] ss:$0 sm:$0xff] }
 0x375   : > { %14231 = vmatmul.mubr.msk.f32.gmra.mrb[8].mxu0 %vm434_vm1, %v16930_v14 }
 0x376   : > { %14233 = vmatprep.mubr.msk.f32.mxu0 %vm434_vm1, %v16939_v1 }
 0x379   : > { %14234 = vmatmul.mubr.msk.f32.gmra.mrb[10].mxu0 %vm434_vm1, %v16942_v61 }
 0x37a   : > { %14236 = vmatprep.mubr.msk.f32.mxu0 %vm434_vm1, %v16953_v60 }
 0x37d   : > { %14237 = vmatmul.mubr.msk.f32.gmra.mrb[12].mxu0 %vm434_vm1, %v16956_v3 }
 0x37e   : > { %14239 = vmatprep.mubr.msk.f32.mxu0 %vm434_vm1, %v16967_v58 }
 0x381   : > { %14240 = vmatmul.mubr.msk.f32.gmra.mrb[14].mxu0 %vm434_vm1, %v17417_v25 }
 0x382   : > { %14242 = vmatprep.mubr.msk.f32.mxu0 %vm434_vm1, %v17420_v15 }
 0x385   : > { %14243 = vmatmul.mubr.msk.f32.gmra.mrb[16].mxu0 %vm434_vm1, %v7772_v21 }
 0x386   : > { %14245 = vmatprep.mubr.msk.f32.mxu0 %vm434_vm1, %v7773_v26 }
 0x389   : > { %14246 = vmatmul.mubr.msk.f32.gmra.mrb[18].mxu0 %vm434_vm1, %v17431_v22 }
 0x38a   : > { %14248 = vmatprep.mubr.msk.f32.mxu0 %vm434_vm1, %v17434_v45 }
 0x38d   : > { %14249 = vmatmul.mubr.msk.f32.gmra.mrb[20].mxu0 %vm434_vm1, %v7776_v38 }
 0x38e   : > { %14251 = vmatprep.mubr.msk.f32.mxu0 %vm434_vm1, %v7777_v63 }
 0x391   : > { %14252 = vmatmul.mubr.msk.f32.gmra.mrb[22].mxu0 %vm434_vm1, %v7778_v41 }
 0x438   : > { %v14220_v16 = vpop.f32.mrb[0].mxu0 }
 0x439   : > { %v14815_v14 = vadd.f32 %v14220_v16, %v17484_v48  ;;  %v7920_v1 = vpop.f32.mrb[1].mxu0 }
 0x43a   : > { %v14816_v61 = vadd.f32 %v7920_v1, %v17487_v51 }
 0x43b   : > { %v8071_v60 = vadd.f32 %v14815_v14, %v17757_v13 }
 0x43c   : > { %v8070_v3 = vadd.f32 %v14816_v61, %v17757_v13  ;;  %v14223_v58 = vpop.f32.mrb[2].mxu0 }
 0x43d   : > { %15440 = vtanh.f32 %v8071_v60  ;;  %v14817_v11 = vadd.f32 %v14223_v58, %v17491_v56  ;;  %v7930_v12 = vpop.f32.mrb[3].mxu0 }
 0x43e   : > { %15442 = vtanh.f32 %v8070_v3  ;;  %v14818_v62 = vadd.f32 %v7930_v12, %v17496_v57 }
 0x43f   : > { %v8073_v25 = vadd.f32 %v14817_v11, %v17757_v13 }
 0x440   : > { %v8072_v15 = vadd.f32 %v14818_v62, %v17757_v13  ;;  %v14226_v22 = vpop.f32.mrb[4].mxu0 }
 0x441   : > { %15444 = vtanh.f32 %v8073_v25  ;;  %v14819_v45 = vadd.f32 %v14226_v22, %v17500_v7  ;;  %v7940_v48 = vpop.f32.mrb[5].mxu0 }
 0x442   : > { %15446 = vtanh.f32 %v8072_v15  ;;  %v14820_v51 = vadd.f32 %v7940_v48, %v17504_v31 }
 0x443   : > { %v8075_v36 = vadd.f32 %v14819_v45, %v17757_v13 }
 0x444   : > { %v8074_v56 = vadd.f32 %v14820_v51, %v17757_v13  ;;  %v14229_v2 = vpop.f32.mrb[6].mxu0 }
 0x445   : > { %15448 = vtanh.f32 %v8075_v36  ;;  %v14821_v57 = vadd.f32 %v14229_v2, %v17507_v42  ;;  %v7950_v27 = vpop.f32.mrb[7].mxu0 }
 0x446   : > { %15450 = vtanh.f32 %v8074_v56  ;;  %v14822_v28 = vadd.f32 %v7950_v27, %v17511_v29 }
 0x447   : > { %v15441_v9 = vpop.eup %15440  ;;  %v8077_v7 = vadd.f32 %v14821_v57, %v17757_v13 }
 0x448   : > { %v15443_v46 = vpop.eup %15442  ;;  %8120 = vst.msk [vmem:[#allocation2 + $0x8] sm:$0xff] %vm8118_vm4, %v15441_v9  ;;  %v8076_v31 = vadd.f32 %v14822_v28, %v17757_v13  ;;  %v14232_v18 = vpop.f32.mrb[8].mxu0 }
 0x449   : > { %8119 = vst.msk [vmem:[#allocation2] sm:$0xff] %vm8118_vm4, %v15443_v46  ;;  %15452 = vtanh.f32 %v8077_v7  ;;  %v14823_v19 = vadd.f32 %v14232_v18, %v17518_v54  ;;  %v7960_v24 = vpop.f32.mrb[9].mxu0  ;;  %v18857_v54 = vld [vmem:[#allocation38_spill] sm:$0xff] }
 0x44a   : > { %15454 = vtanh.f32 %v8076_v31  ;;  %v14824_v42 = vadd.f32 %v7960_v24, %v17523_v47 }
 0x44b   : > { %v15445_v32 = vpop.eup %15444  ;;  %v8079_v29 = vadd.f32 %v14823_v19, %v17757_v13 }
 0x44c   : > { %v15447_v17 = vpop.eup %15446  ;;  %8122 = vst.msk [vmem:[#allocation2 + $0x18] sm:$0xff] %vm8118_vm4, %v15445_v32  ;;  %v8078_v33 = vadd.f32 %v14824_v42, %v17757_v13  ;;  %v14235_v34 = vpop.f32.mrb[10].mxu0 }
 0x44d   : > { %8121 = vst.msk [vmem:[#allocation2 + $0x10] sm:$0xff] %vm8118_vm4, %v15447_v17  ;;  %15456 = vtanh.f32 %v8079_v29  ;;  %v14825_v35 = vadd.f32 %v14235_v34, %v17530_v4  ;;  %v7970_v23 = vpop.f32.mrb[11].mxu0 }
 0x44e   : > { %15458 = vtanh.f32 %v8078_v33  ;;  %v14826_v43 = vadd.f32 %v7970_v23, %v18857_v54 }
 0x44f   : > { %v15449_v39 = vpop.eup %15448  ;;  %v8081_v47 = vadd.f32 %v14825_v35, %v17757_v13  ;;  %v8145_v37 = vld [vmem:[#allocation2 + $0x8] sm:$0xff] }
 0x450   : > { %v15451_v0 = vpop.eup %15450  ;;  %v8144_v50 = vld [vmem:[#allocation2] sm:$0xff]  ;;  %8124 = vst.msk [vmem:[#allocation2 + $0x28] sm:$0xff] %vm8118_vm4, %v15449_v39  ;;  %v8080_v30 = vadd.f32 %v14826_v43, %v17757_v13  ;;  %v14238_v44 = vpop.f32.mrb[12].mxu0  ;;  %v18858_v39 = vld [vmem:[#allocation39_spill] sm:$0xff] }
 0x451   : > { %v8166_v59 = vld [vmem:[#allocation2 + $0x1] sm:$0xff]  ;;  %8123 = vst.msk [vmem:[#allocation2 + $0x20] sm:$0xff] %vm8118_vm4, %v15451_v0  ;;  %15460 = vtanh.f32 %v8081_v47  ;;  %v14827_v4 = vadd.f32 %v14238_v44, %v17538_v20  ;;  %v7980_v8 = vpop.f32.mrb[13].mxu0 }
 0x452   : > { %15462 = vtanh.f32 %v8080_v30  ;;  %v14828_v21 = vadd.f32 %v7980_v8, %v17540_v49  ;;  %v8188_v63 = vadd.f32 %v8166_v59, %v8144_v50 }
 0x453   : > { %v15453_v26 = vpop.eup %15452  ;;  %v8083_v38 = vadd.f32 %v14827_v4, %v17757_v13  ;;  %v8147_v12 = vld [vmem:[#allocation2 + $0x18] sm:$0xff] }
 0x454   : > { %v15455_v41 = vpop.eup %15454  ;;  %v8167_v16 = vld [vmem:[#allocation2 + $0x9] sm:$0xff]  ;;  %8126 = vst.msk [vmem:[#allocation2 + $0x38] sm:$0xff] %vm8118_vm4, %v15453_v26  ;;  %v8082_v14 = vadd.f32 %v14828_v21, %v17757_v13  ;;  %v14241_v1 = vpop.f32.mrb[14].mxu0  ;;  %v8168_v49 = vld [vmem:[#allocation2 + $0x11] sm:$0xff] }
 0x455   : > { %v8146_v61 = vld [vmem:[#allocation2 + $0x10] sm:$0xff]  ;;  %8125 = vst.msk [vmem:[#allocation2 + $0x30] sm:$0xff] %vm8118_vm4, %v15455_v41  ;;  %15464 = vtanh.f32 %v8083_v38  ;;  %v14829_v20 = vadd.f32 %v14241_v1, %v17546_v6  ;;  %v7990_v60 = vpop.f32.mrb[15].mxu0  ;;  %v8189_v3 = vadd.f32 %v8167_v16, %v8145_v37 }
 0x456   : > { %v8213_v58 = vadd.f32 %v8188_v63, %v8146_v61  ;;  %15466 = vtanh.f32 %v8082_v14  ;;  %v14830_v11 = vadd.f32 %v7990_v60, %v17548_v52  ;;  %v8190_v56 = vadd.f32 %v8168_v49, %v8146_v61  ;;  %v18859_v61 = vld [vmem:[#allocation40_spill] sm:$0xff] }
 0x457   : > { %v15457_v62 = vpop.eup %15456  ;;  %v8085_v25 = vadd.f32 %v14829_v20, %v17757_v13  ;;  %v8214_v15 = vadd.f32 %v8189_v3, %v8147_v12  ;;  %v8149_v17 = vld [vmem:[#allocation2 + $0x28] sm:$0xff] }
 0x458   : > { %v8238_v22 = vadd.f32 %v8213_v58, %v8168_v49  ;;  %v15459_v45 = vpop.eup %15458  ;;  %8128 = vst.msk [vmem:[#allocation2 + $0x48] sm:$0xff] %vm8118_vm4, %v15457_v62  ;;  %v8084_v48 = vadd.f32 %v14830_v11, %v17757_v13  ;;  %v14244_v51 = vpop.f32.mrb[16].mxu0  ;;  %v8169_v6 = vld [vmem:[#allocation2 + $0x19] sm:$0xff]  ;;  %v8170_v28 = vld [vmem:[#allocation2 + $0x21] sm:$0xff] }
 0x459   : > { %v8148_v36 = vld [vmem:[#allocation2 + $0x20] sm:$0xff]  ;;  %8127 = vst.msk [vmem:[#allocation2 + $0x40] sm:$0xff] %vm8118_vm4, %v15459_v45  ;;  %15468 = vtanh.f32 %v8085_v25  ;;  %v14831_v52 = vadd.f32 %v14244_v51, %v17554_v10  ;;  %v8000_v2 = vpop.f32.mrb[17].mxu0  ;;  %v8239_v57 = vadd.f32 %v8214_v15, %v8169_v6  ;;  %v8191_v19 = vadd.f32 %v8169_v6, %v8147_v12 }
 0x45a   : > { %v8260_v27 = vmul.f32 0.25, %v8238_v22  ;;  %15470 = vtanh.f32 %v8084_v48  ;;  %v14832_v9 = vadd.f32 %v8000_v2, %v17556_v40  ;;  %v8215_v7 = vadd.f32 %v8190_v56, %v8148_v36  ;;  %v8305_v12 = vld [vmem:[%s18598_s3] sm:$0x3f] }
 0x45b   : > { %v15461_v46 = vpop.eup %15460  ;;  %v8087_v31 = vadd.f32 %v14831_v52, %v17757_v13  ;;  %v8261_v18 = vmul.f32 0.25, %v8239_v57  ;;  %v8192_v32 = vadd.f32 %v8170_v28, %v8148_v36  ;;  %v8216_v54 = vadd.f32 %v8191_v19, %v8149_v17  ;;  %v8151_v50 = vld [vmem:[#allocation2 + $0x38] sm:$0xff]  ;;  %v18860_v36 = vld [vmem:[#allocation41_spill] sm:$0xff] }
 0x45c   : > { %8282 = vst.msk [vmem:[#allocation3] sm:$0xff] %vm8118_vm4, %v8260_v27  ;;  %v15463_v24 = vpop.eup %15462  ;;  %8130 = vst.msk [vmem:[#allocation2 + $0x58] sm:$0xff] %vm8118_vm4, %v15461_v46  ;;  %v8086_v10 = vadd.f32 %v14832_v9, %v17757_v13  ;;  %v14247_v42 = vpop.f32.mrb[18].mxu0  ;;  %v8240_v29 = vadd.f32 %v8215_v7, %v8170_v28  ;;  %v8171_v33 = vld [vmem:[#allocation2 + $0x29] sm:$0xff]  ;;  %v8172_v43 = vld [vmem:[#allocation2 + $0x31] sm:$0xff] }
 0x45d   : > { %v8150_v34 = vld [vmem:[#allocation2 + $0x30] sm:$0xff]  ;;  %8129 = vst.msk [vmem:[#allocation2 + $0x50] sm:$0xff] %vm8118_vm4, %v15463_v24  ;;  %15472 = vtanh.f32 %v8087_v31  ;;  %v14833_v40 = vadd.f32 %v14247_v42, %v17562_v53  ;;  %v8010_v35 = vpop.f32.mrb[19].mxu0  ;;  %8283 = vst.msk [vmem:[#allocation3 + $0x8] sm:$0xff] %vm8118_vm4, %v8261_v18  ;;  %v8193_v23 = vadd.f32 %v8171_v33, %v8149_v17  ;;  %v8241_v44 = vadd.f32 %v8216_v54, %v8171_v33 }
 0x45e   : > { %15474 = vtanh.f32 %v8086_v10  ;;  %v14834_v47 = vadd.f32 %v8010_v35, %v18858_v39  ;;  %v8262_v0 = vmul.f32 0.25, %v8240_v29  ;;  %v8217_v4 = vadd.f32 %v8192_v32, %v8150_v34  ;;  %v18861_v9 = vld [vmem:[#allocation42_spill] sm:$0xff] }
 0x45f   : > { %v15465_v59 = vpop.eup %15464  ;;  %v8089_v30 = vadd.f32 %v14833_v40, %v17757_v13  ;;  %v8218_v8 = vadd.f32 %v8193_v23, %v8151_v50  ;;  %v8194_v38 = vadd.f32 %v8172_v43, %v8150_v34  ;;  %v8263_v14 = vmul.f32 0.25, %v8241_v44  ;;  %v8153_v25 = vld [vmem:[#allocation2 + $0x48] sm:$0xff] }
 0x460   : > { %v15467_v21 = vpop.eup %15466  ;;  %8132 = vst.msk [vmem:[#allocation2 + $0x68] sm:$0xff] %vm8118_vm4, %v15465_v59  ;;  %v8088_v53 = vadd.f32 %v14834_v47, %v17757_v13  ;;  %v14250_v26 = vpop.f32.mrb[20].mxu0  ;;  %8284 = vst.msk [vmem:[#allocation3 + $0x10] sm:$0xff] %vm8118_vm4, %v8262_v0  ;;  %v8173_v63 = vld [vmem:[#allocation2 + $0x39] sm:$0xff]  ;;  %v8242_v1 = vadd.f32 %v8217_v4, %v8172_v43  ;;  %v8174_v3 = vld [vmem:[#allocation2 + $0x41] sm:$0xff] }
 0x461   : > { %v8152_v41 = vld [vmem:[#allocation2 + $0x40] sm:$0xff]  ;;  %8131 = vst.msk [vmem:[#allocation2 + $0x60] sm:$0xff] %vm8118_vm4, %v15467_v21  ;;  %15476 = vtanh.f32 %v8089_v30  ;;  %v14835_v37 = vadd.f32 %v14250_v26, %v17570_v55  ;;  %v8020_v16 = vpop.f32.mrb[21].mxu0  ;;  %v8195_v60 = vadd.f32 %v8173_v63, %v8151_v50  ;;  %v8243_v49 = vadd.f32 %v8218_v8, %v8173_v63  ;;  %8285 = vst.msk [vmem:[#allocation3 + $0x18] sm:$0xff] %vm8118_vm4, %v8263_v14 }
 0x462   : > { %15478 = vtanh.f32 %v8088_v53  ;;  %v14836_v20 = vadd.f32 %v8020_v16, %v18859_v61  ;;  %v8264_v62 = vmul.f32 0.25, %v8242_v1  ;;  %v8219_v55 = vadd.f32 %v8194_v38, %v8152_v41 }
 0x463   : > { %v15469_v58 = vpop.eup %15468  ;;  %v8091_v11 = vadd.f32 %v14835_v37, %v17757_v13  ;;  %v8265_v51 = vmul.f32 0.25, %v8243_v49  ;;  %v8220_v6 = vadd.f32 %v8195_v60, %v8153_v25  ;;  %v8196_v2 = vadd.f32 %v8174_v3, %v8152_v41  ;;  %v8155_v29 = vld [vmem:[#allocation2 + $0x58] sm:$0xff] }
 0x464   : > { %v15471_v15 = vpop.eup %15470  ;;  %8134 = vst.msk [vmem:[#allocation2 + $0x78] sm:$0xff] %vm8118_vm4, %v15469_v58  ;;  %v8090_v22 = vadd.f32 %v14836_v20, %v17757_v13  ;;  %v14253_v45 = vpop.f32.mrb[22].mxu0  ;;  %v8312_v48 = vld [vmem:[#allocation3 + $0x2] sm:$0xff]  ;;  %8286 = vst.msk [vmem:[#allocation3 + $0x20] sm:$0xff] %vm8118_vm4, %v8264_v62  ;;  %v8244_v57 = vadd.f32 %v8219_v55, %v8174_v3  ;;  %v8154_v28 = vld [vmem:[#allocation2 + $0x50] sm:$0xff] }
 0x465   : > { %8133 = vst.msk [vmem:[#allocation2 + $0x70] sm:$0xff] %vm8118_vm4, %v15471_v15  ;;  %15480 = vtanh.f32 %v8091_v11  ;;  %v14837_v56 = vadd.f32 %v14253_v45, %v18860_v36  ;;  %v8030_v52 = vpop.f32.mrb[23].mxu0  ;;  %14257 = vmatmul.mubr.msk.f32.vlgmr.msra.gmra.mrb[24].mxu1 %vm8118_vm4, %v8312_v48  ;;  %v8175_v27 = vld [vmem:[#allocation2 + $0x49] sm:$0xff]  ;;  %8287 = vst.msk [vmem:[#allocation3 + $0x28] sm:$0xff] %vm8118_vm4, %v8265_v51  ;;  %v8176_v18 = vld [vmem:[#allocation2 + $0x51] sm:$0xff]  ;;  %v8221_v32 = vadd.f32 %v8196_v2, %v8154_v28 }
 0x466   : > { %15482 = vtanh.f32 %v8090_v22  ;;  %v14838_v7 = vadd.f32 %v8030_v52, %v18861_v9  ;;  %14272 = vmatpush3.msk.msra.mxu1 %vm8332_vm2, %v8305_v12  ;;  %14259 = vmatprep.mubr.msk.f32.mxu1 %vm15562_vm3, %v15561_v5  ;;  %v8197_v46 = vadd.f32 %v8175_v27, %v8153_v25  ;;  %v8245_v31 = vadd.f32 %v8220_v6, %v8175_v27  ;;  %v8528_v12 = vld [vmem:[%s18598_s3 + $0xc] sm:$0x3f]  ;;  %v8306_v55 = vld [vmem:[#allocation3] sm:$0xff] }
 0x467   : > { %v15473_v19 = vpop.eup %15472  ;;  %v8093_v24 = vadd.f32 %v14837_v56, %v17757_v13  ;;  %14288 = vmatprep.subr.mxu1 %v15561_v5  ;;  %v8266_v10 = vmul.f32 0.25, %v8244_v57  ;;  %v8198_v42 = vadd.f32 %v8176_v18, %v8154_v28  ;;  %v8313_v34 = vld [vmem:[#allocation3 + $0xa] sm:$0xff]  ;;  %v8246_v43 = vadd.f32 %v8221_v32, %v8176_v18 }
 0x468   : > { %v15475_v17 = vpop.eup %15474  ;;  %8136 = vst.msk [vmem:[#allocation2 + $0x88] sm:$0xff] %vm8118_vm4, %v15473_v19  ;;  %v8092_v33 = vadd.f32 %v14838_v7, %v17757_v13  ;;  %v8267_v40 = vmul.f32 0.25, %v8245_v31  ;;  %v8177_v35 = vld [vmem:[#allocation2 + $0x59] sm:$0xff]  ;;  %v8222_v23 = vadd.f32 %v8197_v46, %v8155_v29  ;;  %v8178_v47 = vld [vmem:[#allocation2 + $0x61] sm:$0xff] }
 0x469   : > { %v8156_v54 = vld [vmem:[#allocation2 + $0x60] sm:$0xff]  ;;  %8135 = vst.msk [vmem:[#allocation2 + $0x80] sm:$0xff] %vm8118_vm4, %v15475_v17  ;;  %15484 = vtanh.f32 %v8093_v24  ;;  %14260 = vmatmul.mubr.msk.f32.gmra.mrb[26].mxu1 %vm8118_vm4, %v8313_v34  ;;  %8288 = vst.msk [vmem:[#allocation3 + $0x30] sm:$0xff] %vm8118_vm4, %v8266_v10  ;;  %v8268_v50 = vmul.f32 0.25, %v8246_v43  ;;  %v8314_v44 = vld [vmem:[#allocation3 + $0x12] sm:$0xff]  ;;  %v8199_v4 = vadd.f32 %v8177_v35, %v8155_v29 }
 0x46a   : > { %v8223_v39 = vadd.f32 %v8198_v42, %v8156_v54  ;;  %15486 = vtanh.f32 %v8092_v33  ;;  %14262 = vmatprep.mubr.msk.f32.mxu1 %vm15562_vm3, %v15561_v5  ;;  %8289 = vst.msk [vmem:[#allocation3 + $0x38] sm:$0xff] %vm8118_vm4, %v8267_v40  ;;  %v8247_v13 = vadd.f32 %v8222_v23, %v8177_v35  ;;  %v8157_v26 = vld [vmem:[#allocation2 + $0x68] sm:$0xff]  ;;  %v8200_v16 = vadd.f32 %v8178_v47, %v8156_v54 }
 0x46b   : > { %v15477_v0 = vpop.eup %15476  ;;  %8290 = vst.msk [vmem:[#allocation3 + $0x40] sm:$0xff] %vm8118_vm4, %v8268_v50  ;;  %v8315_v63 = vld [vmem:[#allocation3 + $0x1a] sm:$0xff]  ;;  %v8224_v41 = vadd.f32 %v8199_v4, %v8157_v26  ;;  %v8316_v20 = vld [vmem:[#allocation3 + $0x22] sm:$0x7]  ;;  %v17869_v22 = vld [vmem:[#allocation3 + $0x8] sm:$0xff] }
 0x46c   : > { %v8248_v59 = vadd.f32 %v8223_v39, %v8178_v47  ;;  %v15479_v30 = vpop.eup %15478  ;;  %8138 = vst.msk [vmem:[#allocation2 + $0x98] sm:$0xff] %vm8118_vm4, %v15477_v0  ;;  %v8269_v8 = vmul.f32 0.25, %v8247_v13  ;;  %v8179_v14 = vld [vmem:[#allocation2 + $0x69] sm:$0xff]  ;;  %v8159_v11 = vld [vmem:[#allocation2 + $0x78] sm:$0xff] }
 0x46d   : > { %8137 = vst.msk [vmem:[#allocation2 + $0x90] sm:$0xff] %vm8118_vm4, %v15479_v30  ;;  %14263 = vmatmul.mubr.msk.f32.gmra.mrb[28].mxu1 %vm8118_vm4, %v8314_v44  ;;  %v8158_v1 = vld [vmem:[#allocation2 + $0x70] sm:$0xff]  ;;  %v8201_v60 = vadd.f32 %v8179_v14, %v8157_v26  ;;  %v8249_v49 = vadd.f32 %v8224_v41, %v8179_v14 }
 0x46e   : > { %v8270_v21 = vmul.f32 0.25, %v8248_v59  ;;  %14265 = vmatprep.mubr.msk.f32.mxu1 %vm15562_vm3, %v15561_v5  ;;  %8291 = vst.msk [vmem:[#allocation3 + $0x48] sm:$0xff] %vm8118_vm4, %v8269_v8  ;;  %v8225_v3 = vadd.f32 %v8200_v16, %v8158_v1  ;;  %v8180_v25 = vld [vmem:[#allocation2 + $0x71] sm:$0xff] }
 0x46f   : > { %v15481_v53 = vpop.eup %15480  ;;  %v8271_v58 = vmul.f32 0.25, %v8249_v49  ;;  %v8226_v62 = vadd.f32 %v8201_v60, %v8159_v11  ;;  %v8202_v45 = vadd.f32 %v8180_v25, %v8158_v1  ;;  %v8161_v27 = vld [vmem:[#allocation2 + $0x88] sm:$0xff]  ;;  %v17878_v47 = vld [vmem:[#allocation3 + $0x10] sm:$0xff] }
 0x470   : > { %8292 = vst.msk [vmem:[#allocation3 + $0x50] sm:$0xff] %vm8118_vm4, %v8270_v21  ;;  %v15483_v38 = vpop.eup %15482  ;;  %8140 = vst.msk [vmem:[#allocation2 + $0xa8] sm:$0xff] %vm8118_vm4, %v15481_v53  ;;  %v8250_v15 = vadd.f32 %v8225_v3, %v8180_v25  ;;  %v8181_v48 = vld [vmem:[#allocation2 + $0x79] sm:$0xff]  ;;  %v8182_v57 = vld [vmem:[#allocation2 + $0x81] sm:$0xff] }
 0x471   : > { %8139 = vst.msk [vmem:[#allocation2 + $0xa0] sm:$0xff] %vm8118_vm4, %v15483_v38  ;;  %14266 = vmatmul.mubr.msk.f32.gmra.mrb[30].mxu1 %vm8118_vm4, %v8315_v63  ;;  %8293 = vst.msk [vmem:[#allocation3 + $0x58] sm:$0xff] %vm8118_vm4, %v8271_v58  ;;  %v8203_v56 = vadd.f32 %v8181_v48, %v8159_v11  ;;  %v8251_v52 = vadd.f32 %v8226_v62, %v8181_v48  ;;  %v8160_v2 = vld [vmem:[#allocation2 + $0x80] sm:$0xff]  ;;  %v8531_v25 = vld [vmem:[#allocation3 + $0x14] sm:$0xff] }
 0x472   : > { %14268 = vmatprep.mubr.msk.f32.mxu1 %vm15562_vm3, %v15561_v5  ;;  %v8272_v36 = vmul.f32 0.25, %v8250_v15  ;;  %v8204_v28 = vadd.f32 %v8182_v57, %v8160_v2  ;;  %v8227_v9 = vadd.f32 %v8202_v45, %v8160_v2  ;;  %v8310_v11 = vld [vmem:[#allocation3 + $0x20] sm:$0x7]  ;;  %v8529_v62 = vld [vmem:[#allocation3 + $0x4] sm:$0xff]  ;;  %v8754_v48 = vld [vmem:[%s18598_s3 + $0x18] sm:$0x3f] }
 0x473   : > { %v15485_v37 = vpop.eup %15484  ;;  %v8273_v18 = vmul.f32 0.25, %v8251_v52  ;;  %v8228_v24 = vadd.f32 %v8203_v56, %v8161_v27  ;;  %v8163_v42 = vld [vmem:[#allocation2 + $0x98] sm:$0xff]  ;;  %v8533_v45 = vld [vmem:[#allocation3 + $0x24] sm:$0x7] }
 0x474   : > { %v15487_v61 = vpop.eup %15486  ;;  %8143 = vst.msk [vmem:[#allocation2 + $0xb8] sm:$0xf] %vm8142_vm5, %v15485_v37  ;;  %v8183_v7 = vld [vmem:[#allocation2 + $0x89] sm:$0xff]  ;;  %v8184_v31 = vld [vmem:[#allocation2 + $0x91] sm:$0xff]  ;;  %v8252_v17 = vadd.f32 %v8227_v9, %v8182_v57  ;;  %v8532_v15 = vld [vmem:[#allocation3 + $0x1c] sm:$0xff] }
 0x475   : > { %8141 = vst.msk [vmem:[#allocation2 + $0xb0] sm:$0xff] %vm8118_vm4, %v15487_v61  ;;  %14269 = vmatmul.mubr.msk.f32.gmra.mrb[32].mxu1 %vm8118_vm4, %v8316_v20  ;;  %v8162_v46 = vld [vmem:[#allocation2 + $0x90] sm:$0xff]  ;;  %8294 = vst.msk [vmem:[#allocation3 + $0x60] sm:$0xff] %vm8118_vm4, %v8272_v36  ;;  %v8205_v19 = vadd.f32 %v8183_v7, %v8161_v27  ;;  %v8253_v35 = vadd.f32 %v8228_v24, %v8183_v7  ;;  %v8309_v20 = vld [vmem:[#allocation3 + $0x18] sm:$0xff] }
 0x476   : > { %14273 = vmatprep.mubr.msk.f32.mxu1 %vm15562_vm3, %v15561_v5  ;;  %v8206_v10 = vadd.f32 %v8184_v31, %v8162_v46  ;;  %v8229_v33 = vadd.f32 %v8204_v28, %v8162_v46  ;;  %8295 = vst.msk [vmem:[#allocation3 + $0x68] sm:$0xff] %vm8118_vm4, %v8273_v18  ;;  %v8274_v0 = vmul.f32 0.25, %v8252_v17  ;;  %v8644_v36 = vld [vmem:[#allocation3 + $0x16] sm:$0xff]  ;;  %v8645_v56 = vld [vmem:[#allocation3 + $0x1e] sm:$0xff]  ;;  %v8646_v52 = vld [vmem:[#allocation3 + $0x26] sm:$0x7] }
 0x477   : > { %v8165_v51 = vld [vmem:[#allocation2 + $0xa8] sm:$0x7]  ;;  %v8230_v23 = vadd.f32 %v8205_v19, %v8163_v42  ;;  %v8275_v4 = vmul.f32 0.25, %v8253_v35  ;;  %v8867_v2 = vld [vmem:[%s18598_s3 + $0x1e] sm:$0x3f]  ;;  %v17973_v9 = vld [vmem:[#allocation3 + $0x30] sm:$0xff] }
 0x478   : > { %v8187_v6 = vld [vmem:[#allocation2 + $0xa9] sm:$0x7]  ;;  %v8185_v32 = vld [vmem:[#allocation2 + $0x99] sm:$0xff]  ;;  %v8186_v40 = vld [vmem:[#allocation2 + $0xa1] sm:$0xff]  ;;  %v8254_v50 = vadd.f32 %v8229_v33, %v8184_v31  ;;  %8296 = vst.msk [vmem:[#allocation3 + $0x70] sm:$0xff] %vm8118_vm4, %v8274_v0 }
 0x479   : > { %14274 = vmatmul.mubr.msk.f32.vlgmr.msra.gmra.mrb[34].mxu1 %vm8118_vm4, %v8306_v55  ;;  %v8164_v29 = vld [vmem:[#allocation2 + $0xa0] sm:$0xff]  ;;  %v8207_v34 = vadd.f32 %v8185_v32, %v8163_v42  ;;  %v8210_v39 = vld [vmem:[#allocation2 + $0xa8] sm:$0xff]  ;;  %v8209_v44 = vadd.f32 %v8187_v6, %v8165_v51  ;;  %v8255_v8 = vadd.f32 %v8230_v23, %v8185_v32  ;;  %8297 = vst.msk [vmem:[#allocation3 + $0x78] sm:$0xff] %vm8118_vm4, %v8275_v4  ;;  %v17979_v7 = vld [vmem:[#allocation3 + $0x38] sm:$0xff] }
 0x47a   : > { %14289 = vmatpush3.msk.msra.mxu1 %vm8332_vm2, %v8528_v12  ;;  %14276 = vmatprep.mubr.msk.f32.mxu1 %vm15562_vm3, %v15561_v5  ;;  %v8208_v54 = vadd.f32 %v8186_v40, %v8164_v29  ;;  %v8231_v43 = vadd.f32 %v8206_v10, %v8164_v29  ;;  %v8276_v38 = vmul.f32 0.25, %v8254_v50  ;;  %v8641_v12 = vld [vmem:[%s18598_s3 + $0x12] sm:$0x3f]  ;;  %v8642_v51 = vld [vmem:[#allocation3 + $0x6] sm:$0xff]  ;;  %v8872_v46 = vld [vmem:[#allocation3 + $0x40] sm:$0x7] }
 0x47b   : > { %14305 = vmatprep.subr.mxu1 %v15561_v5  ;;  %v8232_v59 = vadd.f32 %v8210_v39, %v8207_v34  ;;  %v8212_v26 = vld [vmem:[#allocation2 + $0xb8] sm:$0x7]  ;;  %v8277_v16 = vmul.f32 0.25, %v8255_v8  ;;  %v8530_v55 = vld [vmem:[#allocation3 + $0xc] sm:$0xff]  ;;  %v8758_v57 = vld [vmem:[#allocation3 + $0x20] sm:$0xff] }
 0x47c   : > { %v8235_v13 = vld [vmem:[#allocation2 + $0xa9] sm:$0xff]  ;;  %v8256_v21 = vadd.f32 %v8231_v43, %v8186_v40  ;;  %v8236_v41 = vld [vmem:[#allocation2 + $0xb1] sm:$0xff]  ;;  %v8234_v37 = vadd.f32 %v8212_v26, %v8209_v44  ;;  %v8237_v61 = vld [vmem:[#allocation2 + $0xb9] sm:$0x7]  ;;  %8298 = vst.msk [vmem:[#allocation3 + $0x80] sm:$0xff] %vm8118_vm4, %v8276_v38 }
 0x47d   : > { %14277 = vmatmul.mubr.msk.f32.gmra.mrb[36].mxu1 %vm8118_vm4, %v17869_v22  ;;  %v8211_v30 = vld [vmem:[#allocation2 + $0xb0] sm:$0xff]  ;;  %v8257_v63 = vadd.f32 %v8235_v13, %v8232_v59  ;;  %8299 = vst.msk [vmem:[#allocation3 + $0x88] sm:$0xff] %vm8118_vm4, %v8277_v16  ;;  %v8980_v27 = vld [vmem:[%s18598_s3 + $0x24] sm:$0x3f]  ;;  %v9093_v31 = vld [vmem:[%s18598_s3 + $0x2a] sm:$0x3f] }
 0x47e   : > { %14279 = vmatprep.mubr.msk.f32.mxu1 %vm15562_vm3, %v15561_v5  ;;  %v8233_v53 = vadd.f32 %v8211_v30, %v8208_v54  ;;  %v8278_v14 = vmul.f32 0.25, %v8256_v21  ;;  %v8259_v49 = vadd.f32 %v8237_v61, %v8234_v37  ;;  %v8643_v6 = vld [vmem:[#allocation3 + $0xe] sm:$0xff]  ;;  %v8981_v18 = vld [vmem:[#allocation3 + $0x22] sm:$0xff]  ;;  %v8984_v10 = vld [vmem:[#allocation3 + $0x3a] sm:$0xff] }
 0x47f   : > { %v8279_v60 = vmul.f32 0.25, %v8257_v63  ;;  %v17967_v28 = vld [vmem:[#allocation3 + $0x28] sm:$0xff]  ;;  %v8983_v24 = vld [vmem:[#allocation3 + $0x32] sm:$0xff]  ;;  %v8985_v42 = vld [vmem:[#allocation3 + $0x42] sm:$0x7] }
 0x480   : > { %v8258_v1 = vadd.f32 %v8236_v41, %v8233_v53  ;;  %8300 = vst.msk [vmem:[#allocation3 + $0x90] sm:$0xff] %vm8118_vm4, %v8278_v14  ;;  %v8281_v58 = vmul.f32 0.25, %v8259_v49  ;;  %v8982_v19 = vld [vmem:[#allocation3 + $0x2a] sm:$0xff]  ;;  %v9096_v33 = vld [vmem:[#allocation3 + $0x34] sm:$0xff]  ;;  %v9097_v34 = vld [vmem:[#allocation3 + $0x3c] sm:$0xff] }
 0x481   : > { %14280 = vmatmul.mubr.msk.f32.gmra.mrb[38].mxu1 %vm8118_vm4, %v17878_v47  ;;  %8301 = vst.msk [vmem:[#allocation3 + $0x98] sm:$0xff] %vm8118_vm4, %v8279_v60  ;;  %v9206_v32 = vld [vmem:[%s18598_s3 + $0x30] sm:$0x3f]  ;;  %v9094_v29 = vld [vmem:[#allocation3 + $0x24] sm:$0xff]  ;;  %v9319_v35 = vld [vmem:[%s18598_s3 + $0x36] sm:$0x3f] }
 0x482   : > { %14282 = vmatprep.mubr.msk.f32.mxu1 %vm15562_vm3, %v15561_v5  ;;  %v8280_v3 = vmul.f32 0.25, %v8258_v1  ;;  %8304 = vst.msk [vmem:[#allocation3 + $0xa8] sm:$0x7] %vm8303_vm6, %v8281_v58  ;;  %v9095_v17 = vld [vmem:[#allocation3 + $0x2c] sm:$0xff]  ;;  %v9098_v40 = vld [vmem:[#allocation3 + $0x44] sm:$0x7] }
 0x483   : > { %v9207_v23 = vld [vmem:[#allocation3 + $0x26] sm:$0xff]  ;;  %v9208_v54 = vld [vmem:[#allocation3 + $0x2e] sm:$0xff]  ;;  %v9209_v43 = vld [vmem:[#allocation3 + $0x36] sm:$0xff] }
 0x484   : > { %8302 = vst.msk [vmem:[#allocation3 + $0xa0] sm:$0xff] %vm8118_vm4, %v8280_v3  ;;  %v9210_v39 = vld [vmem:[#allocation3 + $0x3e] sm:$0xff]  ;;  %v9211_v13 = vld [vmem:[#allocation3 + $0x46] sm:$0x7]  ;;  %v18085_v44 = vld [vmem:[#allocation3 + $0x50] sm:$0xff] }
 0x485   : > { %14283 = vmatmul.mubr.msk.f32.gmra.mrb[40].mxu1 %vm8118_vm4, %v8309_v20  ;;  %v9323_v0 = vld [vmem:[#allocation3 + $0x40] sm:$0xff]  ;;  %v9324_v50 = vld [vmem:[#allocation3 + $0x48] sm:$0x7]  ;;  %v18091_v8 = vld [vmem:[#allocation3 + $0x58] sm:$0xff] }
 0x486   : > { %14285 = vmatprep.mubr.msk.f32.mxu1 %vm15562_vm3, %v15561_v5  ;;  %v9545_v59 = vld [vmem:[%s18598_s3 + $0x42] sm:$0x3f]  ;;  %v18079_v30 = vld [vmem:[#allocation3 + $0x48] sm:$0xff]  ;;  %v9548_v60 = vld [vmem:[#allocation3 + $0x52] sm:$0xff] }
 0x487   : > { %v9437_v26 = vld [vmem:[#allocation3 + $0x60] sm:$0x7]  ;;  %v9658_v63 = vld [vmem:[%s18598_s3 + $0x48] sm:$0x3f] }
 0x488   : > { %v9546_v37 = vld [vmem:[#allocation3 + $0x42] sm:$0xff]  ;;  %v9547_v1 = vld [vmem:[#allocation3 + $0x4a] sm:$0xff]  ;;  %v9549_v58 = vld [vmem:[#allocation3 + $0x5a] sm:$0xff] }
 0x489   : > { %14286 = vmatmul.mubr.msk.f32.gmra.mrb[42].mxu1 %vm8118_vm4, %v8310_v11 }
 0x48a   : > { %14290 = vmatprep.mubr.msk.f32.mxu1 %vm15562_vm3, %v15561_v5 }
 0x48d   : > { %14291 = vmatmul.mubr.msk.f32.vlgmr.msra.gmra.mrb[44].mxu1 %vm8118_vm4, %v8529_v62 }
 0x48e   : > { %14306 = vmatpush3.msk.msra.mxu1 %vm8332_vm2, %v8641_v12  ;;  %14293 = vmatprep.mubr.msk.f32.mxu1 %vm15562_vm3, %v15561_v5 }
 0x48f   : > { %14322 = vmatprep.subr.mxu1 %v15561_v5 }
 0x491   : > { %14294 = vmatmul.mubr.msk.f32.gmra.mrb[46].mxu1 %vm8118_vm4, %v8530_v55  ;;  %v9550_v55 = vld [vmem:[#allocation3 + $0x62] sm:$0x7] }
 0x492   : > { %14296 = vmatprep.mubr.msk.f32.mxu1 %vm15562_vm3, %v15561_v5 }
 0x495   : > { %14297 = vmatmul.mubr.msk.f32.gmra.mrb[48].mxu1 %vm8118_vm4, %v8531_v25 }
 0x496   : > { %14299 = vmatprep.mubr.msk.f32.mxu1 %vm15562_vm3, %v15561_v5 }
 0x499   : > { %14300 = vmatmul.mubr.msk.f32.gmra.mrb[50].mxu1 %vm8118_vm4, %v8532_v15  ;;  %v9771_v15 = vld [vmem:[%s18598_s3 + $0x4e] sm:$0x3f] }
 0x49a   : > { %14302 = vmatprep.mubr.msk.f32.mxu1 %vm15562_vm3, %v15561_v5 }
 0x49d   : > { %14303 = vmatmul.mubr.msk.f32.gmra.mrb[52].mxu1 %vm8118_vm4, %v8533_v45 }
 0x49e   : > { %14307 = vmatprep.mubr.msk.f32.mxu1 %vm15562_vm3, %v15561_v5 }
 0x4a1   : > { %14308 = vmatmul.mubr.msk.f32.vlgmr.msra.gmra.mrb[54].mxu1 %vm8118_vm4, %v8642_v51 }
 0x4a2   : > { %14323 = vmatpush3.msk.msra.mxu1 %vm8332_vm2, %v8754_v48  ;;  %14310 = vmatprep.mubr.msk.f32.mxu1 %vm15562_vm3, %v15561_v5  ;;  %v9659_v48 = vld [vmem:[#allocation3 + $0x44] sm:$0xff] }
 0x4a3   : > { %14339 = vmatprep.subr.mxu1 %v15561_v5 }
 0x4a5   : > { %14311 = vmatmul.mubr.msk.f32.gmra.mrb[56].mxu1 %vm8118_vm4, %v8643_v6 }
 0x4a6   : > { %14313 = vmatprep.mubr.msk.f32.mxu1 %vm15562_vm3, %v15561_v5 }
 0x4a9   : > { %14314 = vmatmul.mubr.msk.f32.gmra.mrb[58].mxu1 %vm8118_vm4, %v8644_v36  ;;  %v9660_v36 = vld [vmem:[#allocation3 + $0x4c] sm:$0xff] }
 0x4aa   : > { %14316 = vmatprep.mubr.msk.f32.mxu1 %vm15562_vm3, %v15561_v5 }
 0x4ad   : > { %14317 = vmatmul.mubr.msk.f32.gmra.mrb[60].mxu1 %vm8118_vm4, %v8645_v56 }
 0x4ae   : > { %14319 = vmatprep.mubr.msk.f32.mxu1 %vm15562_vm3, %v15561_v5 }
 0x4b1   : > { %14320 = vmatmul.mubr.msk.f32.gmra.mrb[62].mxu1 %vm8118_vm4, %v8646_v52 }
 0x4b2   : > { %14324 = vmatprep.mubr.msk.f32.mxu1 %vm15562_vm3, %v15561_v5 }
 0x4b5   : > { %14325 = vmatmul.mubr.msk.f32.vlgmr.msra.gmra.mrb[64].mxu1 %vm8118_vm4, %v17869_v22  ;;  %v8759_v22 = vld [vmem:[#allocation3 + $0x28] sm:$0x7] }
 0x4b6   : > { %14340 = vmatpush3.msk.msra.mxu1 %vm8332_vm2, %v8867_v2  ;;  %14327 = vmatprep.mubr.msk.f32.mxu1 %vm15562_vm3, %v15561_v5  ;;  %v9661_v2 = vld [vmem:[#allocation3 + $0x54] sm:$0xff] }
 0x4b7   : > { %14356 = vmatprep.subr.mxu1 %v15561_v5 }
 0x4b9   : > { %14328 = vmatmul.mubr.msk.f32.gmra.mrb[66].mxu1 %vm8118_vm4, %v17878_v47  ;;  %v9432_v47 = vld [vmem:[%s18598_s3 + $0x3c] sm:$0x3f] }
 0x4ba   : > { %14330 = vmatprep.mubr.msk.f32.mxu1 %vm15562_vm3, %v15561_v5 }
 0x4bd   : > { %14331 = vmatmul.mubr.msk.f32.gmra.mrb[68].mxu1 %vm8118_vm4, %v8309_v20 }
 0x4be   : > { %14333 = vmatprep.mubr.msk.f32.mxu1 %vm15562_vm3, %v15561_v5 }
 0x4c1   : > { %14334 = vmatmul.mubr.msk.f32.gmra.mrb[70].mxu1 %vm8118_vm4, %v8758_v57 }
 0x4c2   : > { %14336 = vmatprep.mubr.msk.f32.mxu1 %vm15562_vm3, %v15561_v5 }
 0x4c5   : > { %14337 = vmatmul.mubr.msk.f32.gmra.mrb[72].mxu1 %vm8118_vm4, %v8759_v22 }
 0x4c6   : > { %14341 = vmatprep.mubr.msk.f32.mxu1 %vm15562_vm3, %v15561_v5 }
 0x4c9   : > { %14342 = vmatmul.mubr.msk.f32.vlgmr.msra.gmra.mrb[74].mxu1 %vm8118_vm4, %v8758_v57 }
 0x4ca   : > { %14357 = vmatpush3.msk.msra.mxu1 %vm8332_vm2, %v8980_v27  ;;  %14344 = vmatprep.mubr.msk.f32.mxu1 %vm15562_vm3, %v15561_v5 }
 0x4cb   : > { %14373 = vmatprep.subr.mxu1 %v15561_v5 }
 0x4cd   : > { %14345 = vmatmul.mubr.msk.f32.gmra.mrb[76].mxu1 %vm8118_vm4, %v17967_v28 }
 0x4ce   : > { %14347 = vmatprep.mubr.msk.f32.mxu1 %vm15562_vm3, %v15561_v5 }
 0x4d1   : > { %14348 = vmatmul.mubr.msk.f32.gmra.mrb[78].mxu1 %vm8118_vm4, %v17973_v9 }
 0x4d2   : > { %14350 = vmatprep.mubr.msk.f32.mxu1 %vm15562_vm3, %v15561_v5 }
 0x4d5   : > { %14351 = vmatmul.mubr.msk.f32.gmra.mrb[80].mxu1 %vm8118_vm4, %v17979_v7 }
 0x4d6   : > { %14353 = vmatprep.mubr.msk.f32.mxu1 %vm15562_vm3, %v15561_v5 }
 0x4d9   : > { %14354 = vmatmul.mubr.msk.f32.gmra.mrb[82].mxu1 %vm8118_vm4, %v8872_v46 }
 0x4da   : > { %14358 = vmatprep.mubr.msk.f32.mxu1 %vm15562_vm3, %v15561_v5 }
 0x4dd   : > { %14359 = vmatmul.mubr.msk.f32.vlgmr.msra.gmra.mrb[84].mxu1 %vm8118_vm4, %v8981_v18 }
 0x4de   : > { %14374 = vmatpush3.msk.msra.mxu1 %vm8332_vm2, %v9093_v31  ;;  %14361 = vmatprep.mubr.msk.f32.mxu1 %vm15562_vm3, %v15561_v5  ;;  %v9663_v31 = vld [vmem:[#allocation3 + $0x64] sm:$0x7] }
 0x4df   : > { %14390 = vmatprep.subr.mxu1 %v15561_v5 }
 0x4e1   : > { %14362 = vmatmul.mubr.msk.f32.gmra.mrb[86].mxu1 %vm8118_vm4, %v8982_v19  ;;  %v9884_v19 = vld [vmem:[%s18598_s3 + $0x54] sm:$0x3f] }
 0x4e2   : > { %14364 = vmatprep.mubr.msk.f32.mxu1 %vm15562_vm3, %v15561_v5 }
 0x4e5   : > { %14365 = vmatmul.mubr.msk.f32.gmra.mrb[88].mxu1 %vm8118_vm4, %v8983_v24 }
 0x4e6   : > { %14367 = vmatprep.mubr.msk.f32.mxu1 %vm15562_vm3, %v15561_v5 }
 0x4e9   : > { %14368 = vmatmul.mubr.msk.f32.gmra.mrb[90].mxu1 %vm8118_vm4, %v8984_v10  ;;  %v9772_v10 = vld [vmem:[#allocation3 + $0x46] sm:$0xff] }
 0x4ea   : > { %14370 = vmatprep.mubr.msk.f32.mxu1 %vm15562_vm3, %v15561_v5 }
 0x4ed   : > { %14371 = vmatmul.mubr.msk.f32.gmra.mrb[92].mxu1 %vm8118_vm4, %v8985_v42 }
 0x4ee   : > { %14375 = vmatprep.mubr.msk.f32.mxu1 %vm15562_vm3, %v15561_v5 }
 0x4f1   : > { %14376 = vmatmul.mubr.msk.f32.vlgmr.msra.gmra.mrb[94].mxu1 %vm8118_vm4, %v9094_v29  ;;  %v9773_v29 = vld [vmem:[#allocation3 + $0x4e] sm:$0xff] }
 0x4f2   : > { %14391 = vmatpush3.msk.msra.mxu1 %vm8332_vm2, %v9206_v32  ;;  %14378 = vmatprep.mubr.msk.f32.mxu1 %vm15562_vm3, %v15561_v5 }
 0x4f3   : > { %14407 = vmatprep.subr.mxu1 %v15561_v5 }
 0x4f5   : > { %14379 = vmatmul.mubr.msk.f32.gmra.mrb[96].mxu1 %vm8118_vm4, %v9095_v17 }
 0x4f6   : > { %14381 = vmatprep.mubr.msk.f32.mxu1 %vm15562_vm3, %v15561_v5 }
 0x4f9   : > { %14382 = vmatmul.mubr.msk.f32.gmra.mrb[98].mxu1 %vm8118_vm4, %v9096_v33 }
 0x4fa   : > { %14384 = vmatprep.mubr.msk.f32.mxu1 %vm15562_vm3, %v15561_v5 }
 0x4fd   : > { %14385 = vmatmul.mubr.msk.f32.gmra.mrb[100].mxu1 %vm8118_vm4, %v9097_v34  ;;  %v9774_v34 = vld [vmem:[#allocation3 + $0x56] sm:$0xff] }
 0x4fe   : > { %14387 = vmatprep.mubr.msk.f32.mxu1 %vm15562_vm3, %v15561_v5 }
 0x501   : > { %14388 = vmatmul.mubr.msk.f32.gmra.mrb[102].mxu1 %vm8118_vm4, %v9098_v40 }
 0x502   : > { %14392 = vmatprep.mubr.msk.f32.mxu1 %vm15562_vm3, %v15561_v5 }
 0x505   : > { %14393 = vmatmul.mubr.msk.f32.vlgmr.msra.gmra.mrb[104].mxu1 %vm8118_vm4, %v9207_v23 }
 0x506   : > { %14408 = vmatpush3.msk.msra.mxu1 %vm8332_vm2, %v9319_v35  ;;  %14395 = vmatprep.mubr.msk.f32.mxu1 %vm15562_vm3, %v15561_v5 }
 0x507   : > { %14424 = vmatprep.subr.mxu1 %v15561_v5 }
 0x509   : > { %14396 = vmatmul.mubr.msk.f32.gmra.mrb[106].mxu1 %vm8118_vm4, %v9208_v54  ;;  %v9775_v54 = vld [vmem:[#allocation3 + $0x5e] sm:$0xff] }
 0x50a   : > { %14398 = vmatprep.mubr.msk.f32.mxu1 %vm15562_vm3, %v15561_v5 }
 0x50d   : > { %14399 = vmatmul.mubr.msk.f32.gmra.mrb[108].mxu1 %vm8118_vm4, %v9209_v43 }
 0x50e   : > { %14401 = vmatprep.mubr.msk.f32.mxu1 %vm15562_vm3, %v15561_v5 }
 0x511   : > { %14402 = vmatmul.mubr.msk.f32.gmra.mrb[110].mxu1 %vm8118_vm4, %v9210_v39 }
 0x512   : > { %14404 = vmatprep.mubr.msk.f32.mxu1 %vm15562_vm3, %v15561_v5 }
 0x515   : > { %14405 = vmatmul.mubr.msk.f32.gmra.mrb[112].mxu1 %vm8118_vm4, %v9211_v13 }
 0x516   : > { %14409 = vmatprep.mubr.msk.f32.mxu1 %vm15562_vm3, %v15561_v5 }
 0x519   : > { %14410 = vmatmul.mubr.msk.f32.vlgmr.msra.gmra.mrb[114].mxu1 %vm8118_vm4, %v17967_v28  ;;  %v9662_v28 = vld [vmem:[#allocation3 + $0x5c] sm:$0xff] }
 0x51a   : > { %14425 = vmatpush3.msk.msra.mxu1 %vm8332_vm2, %v9432_v47  ;;  %14412 = vmatprep.mubr.msk.f32.mxu1 %vm15562_vm3, %v15561_v5  ;;  %v9776_v47 = vld [vmem:[#allocation3 + $0x66] sm:$0x7] }
 0x51b   : > { %14441 = vmatprep.subr.mxu1 %v15561_v5 }
 0x51d   : > { %14413 = vmatmul.mubr.msk.f32.gmra.mrb[116].mxu1 %vm8118_vm4, %v17973_v9 }
 0x51e   : > { %14415 = vmatprep.mubr.msk.f32.mxu1 %vm15562_vm3, %v15561_v5 }
 0x521   : > { %14416 = vmatmul.mubr.msk.f32.gmra.mrb[118].mxu1 %vm8118_vm4, %v17979_v7 }
 0x522   : > { %14418 = vmatprep.mubr.msk.f32.mxu1 %vm15562_vm3, %v15561_v5 }
 0x525   : > { %14419 = vmatmul.mubr.msk.f32.gmra.mrb[120].mxu1 %vm8118_vm4, %v9323_v0 }
 0x526   : > { %14421 = vmatprep.mubr.msk.f32.mxu1 %vm15562_vm3, %v15561_v5 }
 0x529   : > { %14422 = vmatmul.mubr.msk.f32.gmra.mrb[122].mxu1 %vm8118_vm4, %v9324_v50  ;;  %v9997_v50 = vld [vmem:[%s18598_s3 + $0x5a] sm:$0x3f] }
 0x52a   : > { %14426 = vmatprep.mubr.msk.f32.mxu1 %vm15562_vm3, %v15561_v5 }
 0x52d   : > { %14427 = vmatmul.mubr.msk.f32.vlgmr.msra.gmra.mrb[124].mxu1 %vm8118_vm4, %v9323_v0 }
 0x52e   : > { %14442 = vmatpush3.msk.msra.mxu1 %vm8332_vm2, %v9545_v59  ;;  %14429 = vmatprep.mubr.msk.f32.mxu1 %vm15562_vm3, %v15561_v5 }
 0x52f   : > { %14458 = vmatprep.subr.mxu1 %v15561_v5 }
 0x531   : > { %14430 = vmatmul.mubr.msk.f32.gmra.mrb[126].mxu1 %vm8118_vm4, %v18079_v30 }
 0x532   : > { %14432 = vmatprep.mubr.msk.f32.mxu1 %vm15562_vm3, %v15561_v5 }
 0x535   : > { %14433 = vmatmul.mubr.msk.f32.gmra.mrb[128].mxu1 %vm8118_vm4, %v18085_v44 }
 0x536   : > { %14435 = vmatprep.mubr.msk.f32.mxu1 %vm15562_vm3, %v15561_v5 }
 0x538   : > { %v8402_v4 = vpop.f32.mrb[24].mxu1 }
 0x539   : > { %v14258_v21 = vpop.f32.mrb[25].mxu1  ;;  %14436 = vmatmul.mubr.msk.f32.gmra.mrb[130].mxu1 %vm8118_vm4, %v18091_v8 }
 0x53a   : > { %14438 = vmatprep.mubr.msk.f32.mxu1 %vm15562_vm3, %v15561_v5 }
 0x53c   : > { %v8407_v53 = vpop.f32.mrb[26].mxu1 }
 0x53d   : > { %v14261_v38 = vpop.f32.mrb[27].mxu1  ;;  %14439 = vmatmul.mubr.msk.f32.gmra.mrb[132].mxu1 %vm8118_vm4, %v9437_v26 }
 0x53e   : > { %14443 = vmatprep.mubr.msk.f32.mxu1 %vm15562_vm3, %v15561_v5 }
 0x540   : > { %v8411_v41 = vpop.f32.mrb[28].mxu1 }
 0x541   : > { %v14264_v16 = vpop.f32.mrb[29].mxu1  ;;  %14444 = vmatmul.mubr.msk.f32.vlgmr.msra.gmra.mrb[134].mxu1 %vm8118_vm4, %v9546_v37  ;;  %v9888_v41 = vld [vmem:[#allocation3 + $0x60] sm:$0xff] }
 0x542   : > { %14459 = vmatpush3.msk.msra.mxu1 %vm8332_vm2, %v9658_v63  ;;  %14446 = vmatprep.mubr.msk.f32.mxu1 %vm15562_vm3, %v15561_v5 }
 0x543   : > { %14475 = vmatprep.subr.mxu1 %v15561_v5 }
 0x544   : > { %v8415_v14 = vpop.f32.mrb[30].mxu1 }
 0x545   : > { %v14267_v61 = vpop.f32.mrb[31].mxu1  ;;  %14447 = vmatmul.mubr.msk.f32.gmra.mrb[136].mxu1 %vm8118_vm4, %v9547_v1  ;;  %v9889_v14 = vld [vmem:[#allocation3 + $0x68] sm:$0x7] }
 0x546   : > { %14449 = vmatprep.mubr.msk.f32.mxu1 %vm15562_vm3, %v15561_v5 }
 0x548   : > { %v8419_v20 = vpop.f32.mrb[32].mxu1 }
 0x549   : > { %v14270_v49 = vpop.f32.mrb[33].mxu1  ;;  %14450 = vmatmul.mubr.msk.f32.gmra.mrb[138].mxu1 %vm8118_vm4, %v9548_v60 }
 0x54a   : > { %14452 = vmatprep.mubr.msk.f32.mxu1 %vm15562_vm3, %v15561_v5  ;;  %v18191_v49 = vld [vmem:[#allocation3 + $0x68] sm:$0xff] }
 0x54c   : > { %v8507_v3 = vpop.f32.mrb[34].mxu1 }
 0x54d   : > { %v8508_v11 = vadd.f32 %v8507_v3, %v8402_v4  ;;  %v14275_v12 = vpop.f32.mrb[35].mxu1  ;;  %14453 = vmatmul.mubr.msk.f32.gmra.mrb[140].mxu1 %vm8118_vm4, %v9549_v58 }
 0x54e   : > { %14455 = vmatprep.mubr.msk.f32.mxu1 %vm15562_vm3, %v15561_v5 }
 0x550   : > { %v8512_v62 = vpop.f32.mrb[36].mxu1 }
 0x551   : > { %v14278_v25 = vpop.f32.mrb[37].mxu1  ;;  %14456 = vmatmul.mubr.msk.f32.gmra.mrb[142].mxu1 %vm8118_vm4, %v9550_v55 }
 0x552   : > { %14460 = vmatprep.mubr.msk.f32.mxu1 %vm15562_vm3, %v15561_v5  ;;  %v18203_v25 = vld [vmem:[#allocation3 + $0x78] sm:$0xff] }
 0x554   : > { %v8516_v45 = vpop.f32.mrb[38].mxu1 }
 0x555   : > { %v14281_v51 = vpop.f32.mrb[39].mxu1  ;;  %14461 = vmatmul.mubr.msk.f32.vlgmr.msra.gmra.mrb[144].mxu1 %vm8118_vm4, %v9659_v48 }
 0x556   : > { %14476 = vmatpush3.msk.msra.mxu1 %vm8332_vm2, %v9771_v15  ;;  %14463 = vmatprep.mubr.msk.f32.mxu1 %vm15562_vm3, %v15561_v5  ;;  %v10002_v51 = vld [vmem:[#allocation3 + $0x80] sm:$0x7] }
 0x557   : > { %14492 = vmatprep.subr.mxu1 %v15561_v5 }
 0x558   : > { %v8520_v6 = vpop.f32.mrb[40].mxu1 }
 0x559   : > { %v14284_v56 = vpop.f32.mrb[41].mxu1  ;;  %14464 = vmatmul.mubr.msk.f32.gmra.mrb[146].mxu1 %vm8118_vm4, %v9660_v36  ;;  %v10223_v36 = vld [vmem:[%s18598_s3 + $0x66] sm:$0x3f] }
 0x55a   : > { %14466 = vmatprep.mubr.msk.f32.mxu1 %vm15562_vm3, %v15561_v5 }
 0x55c   : > { %v8524_v52 = vpop.f32.mrb[42].mxu1 }
 0x55d   : > { %v8525_v57 = vadd.f32 %v8524_v52, %v8419_v20  ;;  %v14287_v22 = vpop.f32.mrb[43].mxu1  ;;  %14467 = vmatmul.mubr.msk.f32.gmra.mrb[148].mxu1 %vm8118_vm4, %v9661_v2  ;;  %v10111_v52 = vld [vmem:[#allocation3 + $0x62] sm:$0xff] }
 0x55e   : > { %14469 = vmatprep.mubr.msk.f32.mxu1 %vm15562_vm3, %v15561_v5  ;;  %v10112_v22 = vld [vmem:[#allocation3 + $0x6a] sm:$0xff] }
 0x560   : > { %v8618_v27 = vpop.f32.mrb[44].mxu1 }
 0x561   : > { %v8639_v9 = vadd.f32 %v8618_v27, %v8508_v11  ;;  %v14292_v7 = vpop.f32.mrb[45].mxu1  ;;  %14470 = vmatmul.mubr.msk.f32.gmra.mrb[150].mxu1 %vm8118_vm4, %v9662_v28  ;;  %v18197_v11 = vld [vmem:[#allocation3 + $0x70] sm:$0xff] }
 0x562   : > { %14472 = vmatprep.mubr.msk.f32.mxu1 %vm15562_vm3, %v15561_v5 }
 0x564   : > { %v8623_v46 = vpop.f32.mrb[46].mxu1 }
 0x565   : > { %v14295_v18 = vpop.f32.mrb[47].mxu1  ;;  %14473 = vmatmul.mubr.msk.f32.gmra.mrb[152].mxu1 %vm8118_vm4, %v9663_v31 }
 0x566   : > { %14477 = vmatprep.mubr.msk.f32.mxu1 %vm15562_vm3, %v15561_v5  ;;  %v10114_v18 = vld [vmem:[#allocation3 + $0x7a] sm:$0xff] }
 0x568   : > { %v8627_v24 = vpop.f32.mrb[48].mxu1 }
 0x569   : > { %v14298_v42 = vpop.f32.mrb[49].mxu1  ;;  %14478 = vmatmul.mubr.msk.f32.vlgmr.msra.gmra.mrb[154].mxu1 %vm8118_vm4, %v9772_v10 }
 0x56a   : > { %14493 = vmatpush3.msk.msra.mxu1 %vm8332_vm2, %v9884_v19  ;;  %14480 = vmatprep.mubr.msk.f32.mxu1 %vm15562_vm3, %v15561_v5  ;;  %v10115_v42 = vld [vmem:[#allocation3 + $0x82] sm:$0x7] }
 0x56b   : > { %14509 = vmatprep.subr.mxu1 %v15561_v5 }
 0x56c   : > { %v8631_v32 = vpop.f32.mrb[50].mxu1 }
 0x56d   : > { %v14301_v17 = vpop.f32.mrb[51].mxu1  ;;  %14481 = vmatmul.mubr.msk.f32.gmra.mrb[156].mxu1 %vm8118_vm4, %v9773_v29  ;;  %v10336_v29 = vld [vmem:[%s18598_s3 + $0x6c] sm:$0x3f] }
 0x56e   : > { %14483 = vmatprep.mubr.msk.f32.mxu1 %vm15562_vm3, %v15561_v5 }
 0x570   : > { %v8635_v33 = vpop.f32.mrb[52].mxu1 }
 0x571   : > { %v8640_v40 = vadd.f32 %v8635_v33, %v8525_v57  ;;  %v14304_v35 = vpop.f32.mrb[53].mxu1  ;;  %14484 = vmatmul.mubr.msk.f32.gmra.mrb[158].mxu1 %vm8118_vm4, %v9774_v34  ;;  %v10224_v33 = vld [vmem:[#allocation3 + $0x64] sm:$0xff] }
 0x572   : > { %14486 = vmatprep.mubr.msk.f32.mxu1 %vm15562_vm3, %v15561_v5  ;;  %v10225_v35 = vld [vmem:[#allocation3 + $0x6c] sm:$0xff] }
 0x574   : > { %v8731_v23 = vpop.f32.mrb[54].mxu1 }
 0x575   : > { %v8752_v43 = vadd.f32 %v8731_v23, %v8639_v9  ;;  %v14309_v39 = vpop.f32.mrb[55].mxu1  ;;  %14487 = vmatmul.mubr.msk.f32.gmra.mrb[160].mxu1 %vm8118_vm4, %v9775_v54  ;;  %v10113_v9 = vld [vmem:[#allocation3 + $0x72] sm:$0xff] }
 0x576   : > { %14489 = vmatprep.mubr.msk.f32.mxu1 %vm15562_vm3, %v15561_v5 }
 0x578   : > { %v8736_v13 = vpop.f32.mrb[56].mxu1 }
 0x579   : > { %v14312_v0 = vpop.f32.mrb[57].mxu1  ;;  %14490 = vmatmul.mubr.msk.f32.gmra.mrb[162].mxu1 %vm8118_vm4, %v9776_v47 }
 0x57a   : > { %14494 = vmatprep.mubr.msk.f32.mxu1 %vm15562_vm3, %v15561_v5  ;;  %v10227_v0 = vld [vmem:[#allocation3 + $0x7c] sm:$0xff] }
 0x57c   : > { %v8740_v59 = vpop.f32.mrb[58].mxu1 }
 0x57d   : > { %v14315_v4 = vpop.f32.mrb[59].mxu1  ;;  %14495 = vmatmul.mubr.msk.f32.vlgmr.msra.gmra.mrb[164].mxu1 %vm8118_vm4, %v18079_v30 }
 0x57e   : > { %14510 = vmatpush3.msk.msra.mxu1 %vm8332_vm2, %v9997_v50  ;;  %14497 = vmatprep.mubr.msk.f32.mxu1 %vm15562_vm3, %v15561_v5 }
 0x57f   : > { %14526 = vmatprep.subr.mxu1 %v15561_v5 }
 0x580   : > { %v8744_v21 = vpop.f32.mrb[60].mxu1 }
 0x581   : > { %v14318_v53 = vpop.f32.mrb[61].mxu1  ;;  %14498 = vmatmul.mubr.msk.f32.gmra.mrb[166].mxu1 %vm8118_vm4, %v18085_v44  ;;  %v10228_v21 = vld [vmem:[#allocation3 + $0x84] sm:$0x7] }
 0x582   : > { %14500 = vmatprep.mubr.msk.f32.mxu1 %vm15562_vm3, %v15561_v5 }
 0x584   : > { %v8748_v26 = vpop.f32.mrb[62].mxu1 }
 0x585   : > { %v8753_v38 = vadd.f32 %v8748_v26, %v8640_v40  ;;  %v14321_v63 = vpop.f32.mrb[63].mxu1  ;;  %14501 = vmatmul.mubr.msk.f32.gmra.mrb[168].mxu1 %vm8118_vm4, %v18091_v8  ;;  %v10110_v8 = vld [vmem:[%s18598_s3 + $0x60] sm:$0x3f]  ;;  %v10449_v26 = vld [vmem:[%s18598_s3 + $0x72] sm:$0x3f] }
 0x586   : > { %14503 = vmatprep.mubr.msk.f32.mxu1 %vm15562_vm3, %v15561_v5  ;;  %v10337_v63 = vld [vmem:[#allocation3 + $0x66] sm:$0xff] }
 0x588   : > { %v8844_v30 = vpop.f32.mrb[64].mxu1 }
 0x589   : > { %v8865_v37 = vadd.f32 %v8844_v30, %v8752_v43  ;;  %v14326_v16 = vpop.f32.mrb[65].mxu1  ;;  %14504 = vmatmul.mubr.msk.f32.gmra.mrb[170].mxu1 %vm8118_vm4, %v9888_v41  ;;  %v10226_v43 = vld [vmem:[#allocation3 + $0x74] sm:$0xff] }
 0x58a   : > { %14506 = vmatprep.mubr.msk.f32.mxu1 %vm15562_vm3, %v15561_v5 }
 0x58c   : > { %v8849_v44 = vpop.f32.mrb[66].mxu1 }
 0x58d   : > { %v14329_v1 = vpop.f32.mrb[67].mxu1  ;;  %14507 = vmatmul.mubr.msk.f32.gmra.mrb[172].mxu1 %vm8118_vm4, %v9889_v14  ;;  %v10339_v14 = vld [vmem:[#allocation3 + $0x76] sm:$0xff] }
 0x58e   : > { %14511 = vmatprep.mubr.msk.f32.mxu1 %vm15562_vm3, %v15561_v5 }
 0x590   : > { %v8853_v61 = vpop.f32.mrb[68].mxu1 }
 0x591   : > { %v14332_v20 = vpop.f32.mrb[69].mxu1  ;;  %14512 = vmatmul.mubr.msk.f32.vlgmr.msra.gmra.mrb[174].mxu1 %vm8118_vm4, %v9888_v41 }
 0x592   : > { %14527 = vmatpush3.msk.msra.mxu1 %vm8332_vm2, %v10110_v8  ;;  %14514 = vmatprep.mubr.msk.f32.mxu1 %vm15562_vm3, %v15561_v5  ;;  %v10340_v20 = vld [vmem:[#allocation3 + $0x7e] sm:$0xff] }
 0x593   : > { %14543 = vmatprep.subr.mxu1 %v15561_v5 }
 0x594   : > { %v8857_v60 = vpop.f32.mrb[70].mxu1 }
 0x595   : > { %v14335_v3 = vpop.f32.mrb[71].mxu1  ;;  %14515 = vmatmul.mubr.msk.f32.gmra.mrb[176].mxu1 %vm8118_vm4, %v18191_v49 }
 0x596   : > { %14517 = vmatprep.mubr.msk.f32.mxu1 %vm15562_vm3, %v15561_v5 }
 0x598   : > { %v8861_v58 = vpop.f32.mrb[72].mxu1 }
 0x599   : > { %v8866_v12 = vadd.f32 %v8861_v58, %v8753_v38  ;;  %v14338_v62 = vpop.f32.mrb[73].mxu1  ;;  %14518 = vmatmul.mubr.msk.f32.gmra.mrb[178].mxu1 %vm8118_vm4, %v18197_v11 }
 0x59a   : > { %14520 = vmatprep.mubr.msk.f32.mxu1 %vm15562_vm3, %v15561_v5 }
 0x59c   : > { %v8957_v55 = vpop.f32.mrb[74].mxu1 }
 0x59d   : > { %v8978_v15 = vadd.f32 %v8957_v55, %v8865_v37  ;;  %v14343_v45 = vpop.f32.mrb[75].mxu1  ;;  %14521 = vmatmul.mubr.msk.f32.gmra.mrb[180].mxu1 %vm8118_vm4, %v18203_v25  ;;  %v10338_v37 = vld [vmem:[#allocation3 + $0x6e] sm:$0xff]  ;;  %v10562_v55 = vld [vmem:[%s18598_s3 + $0x78] sm:$0x3f] }
 0x59e   : > { %14523 = vmatprep.mubr.msk.f32.mxu1 %vm15562_vm3, %v15561_v5 }
 0x5a0   : > { %v8962_v48 = vpop.f32.mrb[76].mxu1 }
 0x5a1   : > { %v14346_v6 = vpop.f32.mrb[77].mxu1  ;;  %14524 = vmatmul.mubr.msk.f32.gmra.mrb[182].mxu1 %vm8118_vm4, %v10002_v51 }
 0x5a2   : > { %14528 = vmatprep.mubr.msk.f32.mxu1 %vm15562_vm3, %v15561_v5 }
 0x5a4   : > { %v8966_v56 = vpop.f32.mrb[78].mxu1 }
 0x5a5   : > { %v14349_v2 = vpop.f32.mrb[79].mxu1  ;;  %14529 = vmatmul.mubr.msk.f32.vlgmr.msra.gmra.mrb[184].mxu1 %vm8118_vm4, %v10111_v52  ;;  %v10453_v52 = vld [vmem:[#allocation3 + $0x80] sm:$0xff] }
 0x5a6   : > { %14544 = vmatpush3.msk.msra.mxu1 %vm8332_vm2, %v10223_v36  ;;  %14531 = vmatprep.mubr.msk.f32.mxu1 %vm15562_vm3, %v15561_v5 }
 0x5a7   : > { %14560 = vmatprep.subr.mxu1 %v15561_v5 }
 0x5a8   : > { %v8970_v57 = vpop.f32.mrb[80].mxu1 }
 0x5a9   : > { %v14352_v27 = vpop.f32.mrb[81].mxu1  ;;  %14532 = vmatmul.mubr.msk.f32.gmra.mrb[186].mxu1 %vm8118_vm4, %v10112_v22  ;;  %v10454_v22 = vld [vmem:[#allocation3 + $0x88] sm:$0x7] }
 0x5aa   : > { %14534 = vmatprep.mubr.msk.f32.mxu1 %vm15562_vm3, %v15561_v5 }
 0x5ac   : > { %v8974_v28 = vpop.f32.mrb[82].mxu1 }
 0x5ad   : > { %v8979_v7 = vadd.f32 %v8974_v28, %v8866_v12  ;;  %v14355_v46 = vpop.f32.mrb[83].mxu1  ;;  %14535 = vmatmul.mubr.msk.f32.gmra.mrb[188].mxu1 %vm8118_vm4, %v10113_v9  ;;  %v10341_v12 = vld [vmem:[#allocation3 + $0x86] sm:$0x7] }
 0x5ae   : > { %14537 = vmatprep.mubr.msk.f32.mxu1 %vm15562_vm3, %v15561_v5  ;;  %v18303_v46 = vld [vmem:[#allocation3 + $0x88] sm:$0xff] }
 0x5b0   : > { %v9070_v31 = vpop.f32.mrb[84].mxu1 }
 0x5b1   : > { %v9091_v19 = vadd.f32 %v9070_v31, %v8978_v15  ;;  %v14360_v24 = vpop.f32.mrb[85].mxu1  ;;  %14538 = vmatmul.mubr.msk.f32.gmra.mrb[190].mxu1 %vm8118_vm4, %v10114_v18 }
 0x5b2   : > { %14540 = vmatprep.mubr.msk.f32.mxu1 %vm15562_vm3, %v15561_v5 }
 0x5b4   : > { %v9075_v10 = vpop.f32.mrb[86].mxu1 }
 0x5b5   : > { %v14363_v32 = vpop.f32.mrb[87].mxu1  ;;  %14541 = vmatmul.mubr.msk.f32.gmra.mrb[192].mxu1 %vm8118_vm4, %v10115_v42 }
 0x5b6   : > { %14545 = vmatprep.mubr.msk.f32.mxu1 %vm15562_vm3, %v15561_v5  ;;  %v18315_v32 = vld [vmem:[#allocation3 + $0x98] sm:$0xff] }
 0x5b8   : > { %v9079_v17 = vpop.f32.mrb[88].mxu1 }
 0x5b9   : > { %v14366_v34 = vpop.f32.mrb[89].mxu1  ;;  %14546 = vmatmul.mubr.msk.f32.vlgmr.msra.gmra.mrb[194].mxu1 %vm8118_vm4, %v10224_v33 }
 0x5ba   : > { %14561 = vmatpush3.msk.msra.mxu1 %vm8332_vm2, %v10336_v29  ;;  %14548 = vmatprep.mubr.msk.f32.mxu1 %vm15562_vm3, %v15561_v5  ;;  %v10567_v34 = vld [vmem:[#allocation3 + $0xa0] sm:$0x7] }
 0x5bb   : > { %14577 = vmatprep.subr.mxu1 %v15561_v5 }
 0x5bc   : > { %v9083_v40 = vpop.f32.mrb[90].mxu1 }
 0x5bd   : > { %v14369_v23 = vpop.f32.mrb[91].mxu1  ;;  %14549 = vmatmul.mubr.msk.f32.gmra.mrb[196].mxu1 %vm8118_vm4, %v10225_v35  ;;  %v10788_v35 = vld [vmem:[%s18598_s3 + $0x84] sm:$0x3f] }
 0x5be   : > { %14551 = vmatprep.mubr.msk.f32.mxu1 %vm15562_vm3, %v15561_v5 }
 0x5c0   : > { %v9087_v54 = vpop.f32.mrb[92].mxu1 }
 0x5c1   : > { %v9092_v39 = vadd.f32 %v9087_v54, %v8979_v7  ;;  %v14372_v13 = vpop.f32.mrb[93].mxu1  ;;  %14552 = vmatmul.mubr.msk.f32.gmra.mrb[198].mxu1 %vm8118_vm4, %v10226_v43  ;;  %v10676_v54 = vld [vmem:[#allocation3 + $0x82] sm:$0xff] }
 0x5c2   : > { %14554 = vmatprep.mubr.msk.f32.mxu1 %vm15562_vm3, %v15561_v5  ;;  %v10677_v13 = vld [vmem:[#allocation3 + $0x8a] sm:$0xff] }
 0x5c4   : > { %v9183_v47 = vpop.f32.mrb[94].mxu1 }
 0x5c5   : > { %v9204_v50 = vadd.f32 %v9183_v47, %v9091_v19  ;;  %v14377_v59 = vpop.f32.mrb[95].mxu1  ;;  %14555 = vmatmul.mubr.msk.f32.gmra.mrb[200].mxu1 %vm8118_vm4, %v10227_v0  ;;  %v18309_v19 = vld [vmem:[#allocation3 + $0x90] sm:$0xff] }
 0x5c6   : > { %14557 = vmatprep.mubr.msk.f32.mxu1 %vm15562_vm3, %v15561_v5 }
 0x5c8   : > { %v9188_v4 = vpop.f32.mrb[96].mxu1 }
 0x5c9   : > { %v14380_v53 = vpop.f32.mrb[97].mxu1  ;;  %14558 = vmatmul.mubr.msk.f32.gmra.mrb[202].mxu1 %vm8118_vm4, %v10228_v21 }
 0x5ca   : > { %14562 = vmatprep.mubr.msk.f32.mxu1 %vm15562_vm3, %v15561_v5  ;;  %v10679_v53 = vld [vmem:[#allocation3 + $0x9a] sm:$0xff] }
 0x5cc   : > { %v9192_v38 = vpop.f32.mrb[98].mxu1 }
 0x5cd   : > { %v14383_v30 = vpop.f32.mrb[99].mxu1  ;;  %14563 = vmatmul.mubr.msk.f32.vlgmr.msra.gmra.mrb[204].mxu1 %vm8118_vm4, %v10337_v63 }
 0x5ce   : > { %14578 = vmatpush3.msk.msra.mxu1 %vm8332_vm2, %v10449_v26  ;;  %14565 = vmatprep.mubr.msk.f32.mxu1 %vm15562_vm3, %v15561_v5  ;;  %v10680_v30 = vld [vmem:[#allocation3 + $0xa2] sm:$0x7] }
 0x5cf   : > { %14594 = vmatprep.subr.mxu1 %v15561_v5 }
 0x5d0   : > { %v9196_v41 = vpop.f32.mrb[100].mxu1 }
 0x5d1   : > { %v14386_v16 = vpop.f32.mrb[101].mxu1  ;;  %14566 = vmatmul.mubr.msk.f32.gmra.mrb[206].mxu1 %vm8118_vm4, %v10338_v37  ;;  %v10901_v37 = vld [vmem:[%s18598_s3 + $0x8a] sm:$0x3f] }
 0x5d2   : > { %14568 = vmatprep.mubr.msk.f32.mxu1 %vm15562_vm3, %v15561_v5 }
 0x5d4   : > { %v9200_v44 = vpop.f32.mrb[102].mxu1 }
 0x5d5   : > { %v9205_v1 = vadd.f32 %v9200_v44, %v9092_v39  ;;  %v14389_v8 = vpop.f32.mrb[103].mxu1  ;;  %14569 = vmatmul.mubr.msk.f32.gmra.mrb[208].mxu1 %vm8118_vm4, %v10339_v14  ;;  %v10789_v44 = vld [vmem:[#allocation3 + $0x84] sm:$0xff] }
 0x5d6   : > { %14571 = vmatprep.mubr.msk.f32.mxu1 %vm15562_vm3, %v15561_v5  ;;  %v10790_v8 = vld [vmem:[#allocation3 + $0x8c] sm:$0xff] }
 0x5d8   : > { %v9296_v61 = vpop.f32.mrb[104].mxu1 }
 0x5d9   : > { %v9317_v60 = vadd.f32 %v9296_v61, %v9204_v50  ;;  %v14394_v3 = vpop.f32.mrb[105].mxu1  ;;  %14572 = vmatmul.mubr.msk.f32.gmra.mrb[210].mxu1 %vm8118_vm4, %v10340_v20  ;;  %v10678_v50 = vld [vmem:[#allocation3 + $0x92] sm:$0xff] }
 0x5da   : > { %14574 = vmatprep.mubr.msk.f32.mxu1 %vm15562_vm3, %v15561_v5 }
 0x5dc   : > { %v9301_v58 = vpop.f32.mrb[106].mxu1 }
 0x5dd   : > { %v14397_v62 = vpop.f32.mrb[107].mxu1  ;;  %14575 = vmatmul.mubr.msk.f32.gmra.mrb[212].mxu1 %vm8118_vm4, %v10341_v12 }
 0x5de   : > { %14579 = vmatprep.mubr.msk.f32.mxu1 %vm15562_vm3, %v15561_v5  ;;  %v10792_v62 = vld [vmem:[#allocation3 + $0x9c] sm:$0xff] }
 0x5e0   : > { %v9305_v15 = vpop.f32.mrb[108].mxu1 }
 0x5e1   : > { %v14400_v45 = vpop.f32.mrb[109].mxu1  ;;  %14580 = vmatmul.mubr.msk.f32.vlgmr.msra.gmra.mrb[214].mxu1 %vm8118_vm4, %v18191_v49 }
 0x5e2   : > { %14595 = vmatpush3.msk.msra.mxu1 %vm8332_vm2, %v10562_v55  ;;  %14582 = vmatprep.mubr.msk.f32.mxu1 %vm15562_vm3, %v15561_v5 }
 0x5e3   : > { %14611 = vmatprep.subr.mxu1 %v15561_v5 }
 0x5e4   : > { %v9309_v48 = vpop.f32.mrb[110].mxu1 }
 0x5e5   : > { %v14403_v51 = vpop.f32.mrb[111].mxu1  ;;  %14583 = vmatmul.mubr.msk.f32.gmra.mrb[216].mxu1 %vm8118_vm4, %v18197_v11  ;;  %v10793_v48 = vld [vmem:[#allocation3 + $0xa4] sm:$0x7] }
 0x5e6   : > { %14585 = vmatprep.mubr.msk.f32.mxu1 %vm15562_vm3, %v15561_v5 }
 0x5e8   : > { %v9313_v6 = vpop.f32.mrb[112].mxu1 }
 0x5e9   : > { %v9318_v36 = vadd.f32 %v9313_v6, %v9205_v1  ;;  %v14406_v56 = vpop.f32.mrb[113].mxu1  ;;  %14586 = vmatmul.mubr.msk.f32.gmra.mrb[218].mxu1 %vm8118_vm4, %v18203_v25  ;;  %v10675_v25 = vld [vmem:[%s18598_s3 + $0x7e] sm:$0x3f]  ;;  %v11014_v6 = vld [vmem:[%s18598_s3 + $0x90] sm:$0x3f] }
 0x5ea   : > { %14588 = vmatprep.mubr.msk.f32.mxu1 %vm15562_vm3, %v15561_v5  ;;  %v10902_v56 = vld [vmem:[#allocation3 + $0x86] sm:$0xff] }
 0x5ec   : > { %v9409_v49 = vpop.f32.mrb[114].mxu1 }
 0x5ed   : > { %v9430_v2 = vadd.f32 %v9409_v49, %v9317_v60  ;;  %v14411_v57 = vpop.f32.mrb[115].mxu1  ;;  %14589 = vmatmul.mubr.msk.f32.gmra.mrb[220].mxu1 %vm8118_vm4, %v10453_v52  ;;  %v10791_v60 = vld [vmem:[#allocation3 + $0x94] sm:$0xff] }
 0x5ee   : > { %14591 = vmatprep.mubr.msk.f32.mxu1 %vm15562_vm3, %v15561_v5 }
 0x5f0   : > { %v9414_v11 = vpop.f32.mrb[116].mxu1 }
 0x5f1   : > { %v14414_v27 = vpop.f32.mrb[117].mxu1  ;;  %14592 = vmatmul.mubr.msk.f32.gmra.mrb[222].mxu1 %vm8118_vm4, %v10454_v22  ;;  %v10904_v22 = vld [vmem:[#allocation3 + $0x96] sm:$0xff] }
 0x5f2   : > { %14596 = vmatprep.mubr.msk.f32.mxu1 %vm15562_vm3, %v15561_v5 }
 0x5f4   : > { %v9418_v28 = vpop.f32.mrb[118].mxu1 }
 0x5f5   : > { %v14417_v9 = vpop.f32.mrb[119].mxu1  ;;  %14597 = vmatmul.mubr.msk.f32.vlgmr.msra.gmra.mrb[224].mxu1 %vm8118_vm4, %v10453_v52 }
 0x5f6   : > { %14612 = vmatpush3.msk.msra.mxu1 %vm8332_vm2, %v10675_v25  ;;  %14599 = vmatprep.mubr.msk.f32.mxu1 %vm15562_vm3, %v15561_v5  ;;  %v10905_v9 = vld [vmem:[#allocation3 + $0x9e] sm:$0xff] }
 0x5f7   : > { %14628 = vmatprep.subr.mxu1 %v15561_v5 }
 0x5f8   : > { %v9422_v7 = vpop.f32.mrb[120].mxu1 }
 0x5f9   : > { %v14420_v31 = vpop.f32.mrb[121].mxu1  ;;  %14600 = vmatmul.mubr.msk.f32.gmra.mrb[226].mxu1 %vm8118_vm4, %v18303_v46 }
 0x5fa   : > { %14602 = vmatprep.mubr.msk.f32.mxu1 %vm15562_vm3, %v15561_v5 }
 0x5fc   : > { %v9426_v18 = vpop.f32.mrb[122].mxu1 }
 0x5fd   : > { %v9431_v24 = vadd.f32 %v9426_v18, %v9318_v36  ;;  %v14423_v10 = vpop.f32.mrb[123].mxu1  ;;  %14603 = vmatmul.mubr.msk.f32.gmra.mrb[228].mxu1 %vm8118_vm4, %v18309_v19 }
 0x5fe   : > { %14605 = vmatprep.mubr.msk.f32.mxu1 %vm15562_vm3, %v15561_v5 }
 0x600   : > { %v9522_v42 = vpop.f32.mrb[124].mxu1 }
 0x601   : > { %v9543_v29 = vadd.f32 %v9522_v42, %v9430_v2  ;;  %v14428_v17 = vpop.f32.mrb[125].mxu1  ;;  %14606 = vmatmul.mubr.msk.f32.gmra.mrb[230].mxu1 %vm8118_vm4, %v18315_v32  ;;  %v10903_v2 = vld [vmem:[#allocation3 + $0x8e] sm:$0xff] }
 0x602   : > { %14608 = vmatprep.mubr.msk.f32.mxu1 %vm15562_vm3, %v15561_v5 }
 0x604   : > { %v9527_v33 = vpop.f32.mrb[126].mxu1 }
 0x605   : > { %v14431_v40 = vpop.f32.mrb[127].mxu1  ;;  %14609 = vmatmul.mubr.msk.f32.gmra.mrb[232].mxu1 %vm8118_vm4, %v10567_v34 }
 0x606   : > { %14613 = vmatprep.mubr.msk.f32.mxu1 %vm15562_vm3, %v15561_v5 }
 0x608   : > { %v9531_v23 = vpop.f32.mrb[128].mxu1 }
 0x609   : > { %v14434_v43 = vpop.f32.mrb[129].mxu1  ;;  %14614 = vmatmul.mubr.msk.f32.vlgmr.msra.gmra.mrb[234].mxu1 %vm8118_vm4, %v10676_v54  ;;  %v11018_v23 = vld [vmem:[#allocation3 + $0xa0] sm:$0xff] }
 0x60a   : > { %14629 = vmatpush3.msk.msra.mxu1 %vm8332_vm2, %v10788_v35  ;;  %14616 = vmatprep.mubr.msk.f32.mxu1 %vm15562_vm3, %v15561_v5 }
 0x60b   : > { %14645 = vmatprep.subr.mxu1 %v15561_v5 }
 0x60c   : > { %v9535_v39 = vpop.f32.mrb[130].mxu1 }
 0x60d   : > { %v14437_v47 = vpop.f32.mrb[131].mxu1  ;;  %14617 = vmatmul.mubr.msk.f32.gmra.mrb[236].mxu1 %vm8118_vm4, %v10677_v13  ;;  %v11019_v39 = vld [vmem:[#allocation3 + $0xa8] sm:$0x7] }
 0x60e   : > { %14619 = vmatprep.mubr.msk.f32.mxu1 %vm15562_vm3, %v15561_v5 }
 0x610   : > { %v9539_v0 = vpop.f32.mrb[132].mxu1 }
 0x611   : > { %v9544_v59 = vadd.f32 %v9539_v0, %v9431_v24  ;;  %v14440_v4 = vpop.f32.mrb[133].mxu1  ;;  %14620 = vmatmul.mubr.msk.f32.gmra.mrb[238].mxu1 %vm8118_vm4, %v10678_v50  ;;  %v10906_v24 = vld [vmem:[#allocation3 + $0xa6] sm:$0x7] }
 0x612   : > { %14622 = vmatprep.mubr.msk.f32.mxu1 %vm15562_vm3, %v15561_v5 }
 0x614   : > { %v9635_v21 = vpop.f32.mrb[134].mxu1 }
 0x615   : > { %v9656_v26 = vadd.f32 %v9635_v21, %v9543_v29  ;;  %v14445_v38 = vpop.f32.mrb[135].mxu1  ;;  %14623 = vmatmul.mubr.msk.f32.gmra.mrb[240].mxu1 %vm8118_vm4, %v10679_v53 }
 0x616   : > { %14625 = vmatprep.mubr.msk.f32.mxu1 %vm15562_vm3, %v15561_v5 }
 0x618   : > { %v9640_v63 = vpop.f32.mrb[136].mxu1 }
 0x619   : > { %v14448_v41 = vpop.f32.mrb[137].mxu1  ;;  %14626 = vmatmul.mubr.msk.f32.gmra.mrb[242].mxu1 %vm8118_vm4, %v10680_v30 }
 0x61a   : > { %14630 = vmatprep.mubr.msk.f32.mxu1 %vm15562_vm3, %v15561_v5 }
 0x61c   : > { %v9644_v16 = vpop.f32.mrb[138].mxu1 }
 0x61d   : > { %v14451_v14 = vpop.f32.mrb[139].mxu1  ;;  %14631 = vmatmul.mubr.msk.f32.vlgmr.msra.gmra.mrb[244].mxu1 %vm8118_vm4, %v10789_v44 }
 0x61e   : > { %14646 = vmatpush3.msk.msra.mxu1 %vm8332_vm2, %v10901_v37  ;;  %14633 = vmatprep.mubr.msk.f32.mxu1 %vm15562_vm3, %v15561_v5 }
 0x61f   : > { %14662 = vmatprep.subr.mxu1 %v15561_v5 }
 0x620   : > { %v9648_v1 = vpop.f32.mrb[140].mxu1 }
 0x621   : > { %v14454_v61 = vpop.f32.mrb[141].mxu1  ;;  %14634 = vmatmul.mubr.msk.f32.gmra.mrb[246].mxu1 %vm8118_vm4, %v10790_v8 }
 0x622   : > { %14636 = vmatprep.mubr.msk.f32.mxu1 %vm15562_vm3, %v15561_v5 }
 0x624   : > { %v9652_v20 = vpop.f32.mrb[142].mxu1 }
 0x625   : > { %v9657_v3 = vadd.f32 %v9652_v20, %v9544_v59  ;;  %v14457_v58 = vpop.f32.mrb[143].mxu1  ;;  %14637 = vmatmul.mubr.msk.f32.gmra.mrb[248].mxu1 %vm8118_vm4, %v10791_v60 }
 0x626   : > { %14639 = vmatprep.mubr.msk.f32.mxu1 %vm15562_vm3, %v15561_v5 }
 0x628   : > { %v9748_v12 = vpop.f32.mrb[144].mxu1 }
 0x629   : > { %v9769_v55 = vadd.f32 %v9748_v12, %v9656_v26  ;;  %v14462_v15 = vpop.f32.mrb[145].mxu1  ;;  %14640 = vmatmul.mubr.msk.f32.gmra.mrb[250].mxu1 %vm8118_vm4, %v10792_v62 }
 0x62a   : > { %14642 = vmatprep.mubr.msk.f32.mxu1 %vm15562_vm3, %v15561_v5 }
 0x62c   : > { %v9753_v45 = vpop.f32.mrb[146].mxu1 }
 0x62d   : > { %v14465_v51 = vpop.f32.mrb[147].mxu1  ;;  %14643 = vmatmul.mubr.msk.f32.gmra.mrb[252].mxu1 %vm8118_vm4, %v10793_v48 }
 0x62e   : > { %14647 = vmatprep.mubr.msk.f32.mxu1 %vm15562_vm3, %v15561_v5 }
 0x630   : > { %v9757_v36 = vpop.f32.mrb[148].mxu1 }
 0x631   : > { %v14468_v49 = vpop.f32.mrb[149].mxu1  ;;  %14648 = vmatmul.mubr.msk.f32.vlgmr.msra.gmra.mrb[254].mxu1 %vm8118_vm4, %v10902_v56 }
 0x632   : > { %14663 = vmatpush3.msk.msra.mxu1 %vm8332_vm2, %v11014_v6  ;;  %14650 = vmatprep.mubr.msk.f32.mxu1 %vm15562_vm3, %v15561_v5 }
 0x634   : > { %v9761_v52 = vpop.f32.mrb[150].mxu1 }
 0x635   : > { %v14471_v57 = vpop.f32.mrb[151].mxu1  ;;  %14651 = vmatmul.mubr.msk.f32.gmra.mrb[0].mxu1 %vm8118_vm4, %v10903_v2  ;;  %v15563_v2 = vmov 0.0|0.0  }
 0x636   : > { %14653 = vmatprep.mubr.msk.f32.mxu1 %vm15562_vm3, %v15561_v5  ;;  %14765 = vmatprep.subr.bf16.mxu1 %v15563_v2 }
 0x638   : > { %v9765_v11 = vpop.f32.mrb[152].mxu1 }
 0x639   : > { %v9770_v27 = vadd.f32 %v9765_v11, %v9657_v3  ;;  %v14474_v25 = vpop.f32.mrb[153].mxu1  ;;  %14654 = vmatmul.mubr.msk.f32.gmra.mrb[2].mxu1 %vm8118_vm4, %v10904_v22  ;;  %v11139_v22 = vld [vmem:[%s18600_s5] sm:$0xff] }
 0x63a   : > { %14656 = vmatprep.mubr.msk.f32.mxu1 %vm15562_vm3, %v15561_v5 }
 0x63c   : > { %v9861_v28 = vpop.f32.mrb[154].mxu1 }
 0x63d   : > { %v9882_v7 = vadd.f32 %v9861_v28, %v9769_v55  ;;  %v14479_v31 = vpop.f32.mrb[155].mxu1  ;;  %14657 = vmatmul.mubr.msk.f32.gmra.mrb[4].mxu1 %vm8118_vm4, %v10905_v9 }
 0x63e   : > { %14659 = vmatprep.mubr.msk.f32.mxu1 %vm15562_vm3, %v15561_v5 }
 0x640   : > { %v9866_v18 = vpop.f32.mrb[156].mxu1 }
 0x641   : > { %v14482_v10 = vpop.f32.mrb[157].mxu1  ;;  %14660 = vmatmul.mubr.msk.f32.gmra.mrb[6].mxu1 %vm8118_vm4, %v10906_v24 }
 0x642   : > { %14664 = vmatprep.mubr.msk.f32.mxu1 %vm15562_vm3, %v15561_v5 }
 0x644   : > { %v9870_v42 = vpop.f32.mrb[158].mxu1 }
 0x645   : > { %v14485_v29 = vpop.f32.mrb[159].mxu1  ;;  %14665 = vmatmul.mubr.msk.f32.vlgmr.msra.gmra.mrb[8].mxu1 %vm8118_vm4, %v18303_v46 }
 0x646   : > { %14667 = vmatprep.mubr.msk.f32.mxu1 %vm15562_vm3, %v15561_v5 }
 0x648   : > { %v9874_v17 = vpop.f32.mrb[160].mxu1 }
 0x649   : > { %v14488_v33 = vpop.f32.mrb[161].mxu1  ;;  %14668 = vmatmul.mubr.msk.f32.gmra.mrb[10].mxu1 %vm8118_vm4, %v18309_v19 }
 0x64a   : > { %14670 = vmatprep.mubr.msk.f32.mxu1 %vm15562_vm3, %v15561_v5 }
 0x64c   : > { %v9878_v34 = vpop.f32.mrb[162].mxu1 }
 0x64d   : > { %v9883_v40 = vadd.f32 %v9878_v34, %v9770_v27  ;;  %v14491_v35 = vpop.f32.mrb[163].mxu1  ;;  %14671 = vmatmul.mubr.msk.f32.gmra.mrb[12].mxu1 %vm8118_vm4, %v18315_v32  ;;  %v11140_v27 = vld [vmem:[%s18600_s5 + $0x8] sm:$0xff] }
 0x64e   : > { %14673 = vmatprep.mubr.msk.f32.mxu1 %vm15562_vm3, %v15561_v5  ;;  %v14766_v25 = vpack.c.bf16 %v11140_v27, %v11139_v22 }
 0x650   : > { %v9974_v46 = vpop.f32.mrb[164].mxu1  ;;  %14767 = vmatpush3.bf16.msra.mxu1 %v14766_v25 }
 0x651   : > { %v9995_v54 = vadd.f32 %v9974_v46, %v9882_v7  ;;  %v14496_v43 = vpop.f32.mrb[165].mxu1  ;;  %14674 = vmatmul.mubr.msk.f32.gmra.mrb[14].mxu1 %vm8118_vm4, %v11018_v23  ;;  %14768 = vmatprep.subr.bf16.mxu1 %v15563_v2 }
 0x652   : > { %14676 = vmatprep.mubr.msk.f32.mxu1 %vm15562_vm3, %v15561_v5 }
 0x654   : > { %v9979_v19 = vpop.f32.mrb[166].mxu1 }
 0x655   : > { %v14499_v13 = vpop.f32.mrb[167].mxu1  ;;  %14677 = vmatmul.mubr.msk.f32.gmra.mrb[16].mxu1 %vm8118_vm4, %v11019_v39 }
 0x656   : > { %14683 = vmatprep.mubr.msk.f32.mxu1 %vm15562_vm3, %v15561_v5 }
 0x658   : > { %v9983_v32 = vpop.f32.mrb[168].mxu1 }
 0x659   : > { %v14502_v47 = vpop.f32.mrb[169].mxu1 }
 0x65c   : > { %v9987_v0 = vpop.f32.mrb[170].mxu1 }
 0x65d   : > { %v14505_v50 = vpop.f32.mrb[171].mxu1 }
 0x660   : > { %v9991_v59 = vpop.f32.mrb[172].mxu1 }
 0x661   : > { %v9996_v4 = vadd.f32 %v9991_v59, %v9883_v40  ;;  %v14508_v21 = vpop.f32.mrb[173].mxu1 }
 0x664   : > { %v10087_v53 = vpop.f32.mrb[174].mxu1 }
 0x665   : > { %v10108_v26 = vadd.f32 %v10087_v53, %v9995_v54  ;;  %v14513_v38 = vpop.f32.mrb[175].mxu1 }
 0x668   : > { %v10092_v63 = vpop.f32.mrb[176].mxu1 }
 0x669   : > { %v14516_v30 = vpop.f32.mrb[177].mxu1 }
 0x66c   : > { %v10096_v41 = vpop.f32.mrb[178].mxu1 }
 0x66d   : > { %v14519_v37 = vpop.f32.mrb[179].mxu1 }
 0x670   : > { %v10100_v16 = vpop.f32.mrb[180].mxu1 }
 0x671   : > { %v14522_v44 = vpop.f32.mrb[181].mxu1 }
 0x674   : > { %v10104_v14 = vpop.f32.mrb[182].mxu1 }
 0x675   : > { %v10109_v1 = vadd.f32 %v10104_v14, %v9996_v4  ;;  %v14525_v8 = vpop.f32.mrb[183].mxu1 }
 0x678   : > { %v10200_v61 = vpop.f32.mrb[184].mxu1 }
 0x679   : > { %v10221_v20 = vadd.f32 %v10200_v61, %v10108_v26  ;;  %v14530_v60 = vpop.f32.mrb[185].mxu1 }
 0x67c   : > { %v10205_v3 = vpop.f32.mrb[186].mxu1 }
 0x67d   : > { %v14533_v58 = vpop.f32.mrb[187].mxu1 }
 0x680   : > { %v10209_v12 = vpop.f32.mrb[188].mxu1 }
 0x681   : > { %v14536_v62 = vpop.f32.mrb[189].mxu1 }
 0x684   : > { %v10213_v55 = vpop.f32.mrb[190].mxu1 }
 0x685   : > { %v14539_v15 = vpop.f32.mrb[191].mxu1 }
 0x688   : > { %v10217_v45 = vpop.f32.mrb[192].mxu1 }
 0x689   : > { %v10222_v48 = vadd.f32 %v10217_v45, %v10109_v1  ;;  %v14542_v51 = vpop.f32.mrb[193].mxu1 }
 0x68c   : > { %v10313_v6 = vpop.f32.mrb[194].mxu1 }
 0x68d   : > { %v10334_v36 = vadd.f32 %v10313_v6, %v10221_v20  ;;  %v14547_v56 = vpop.f32.mrb[195].mxu1 }
 0x690   : > { %v10318_v49 = vpop.f32.mrb[196].mxu1 }
 0x691   : > { %v14550_v52 = vpop.f32.mrb[197].mxu1 }
 0x694   : > { %v10322_v57 = vpop.f32.mrb[198].mxu1 }
 0x695   : > { %v14553_v11 = vpop.f32.mrb[199].mxu1 }
 0x698   : > { %v10326_v28 = vpop.f32.mrb[200].mxu1 }
 0x699   : > { %v14556_v9 = vpop.f32.mrb[201].mxu1 }
 0x69c   : > { %v10330_v7 = vpop.f32.mrb[202].mxu1 }
 0x69d   : > { %v10335_v31 = vadd.f32 %v10330_v7, %v10222_v48  ;;  %v14559_v18 = vpop.f32.mrb[203].mxu1 }
 0x6a0   : > { %v10426_v24 = vpop.f32.mrb[204].mxu1 }
 0x6a1   : > { %v10447_v10 = vadd.f32 %v10426_v24, %v10334_v36  ;;  %v14564_v42 = vpop.f32.mrb[205].mxu1 }
 0x6a4   : > { %v10431_v29 = vpop.f32.mrb[206].mxu1 }
 0x6a5   : > { %v14567_v17 = vpop.f32.mrb[207].mxu1 }
 0x6a8   : > { %v10435_v33 = vpop.f32.mrb[208].mxu1 }
 0x6a9   : > { %v14570_v34 = vpop.f32.mrb[209].mxu1 }
 0x6ac   : > { %v10439_v40 = vpop.f32.mrb[210].mxu1 }
 0x6ad   : > { %v14573_v35 = vpop.f32.mrb[211].mxu1 }
 0x6b0   : > { %v10443_v46 = vpop.f32.mrb[212].mxu1 }
 0x6b1   : > { %v10448_v23 = vadd.f32 %v10443_v46, %v10335_v31  ;;  %v14576_v54 = vpop.f32.mrb[213].mxu1 }
 0x6b2   : > { %v12477_v54 = vld [vmem:[%s18599_s4] ss:$0 sm:$0xff] }
 0x6b4   : > { %v10539_v43 = vpop.f32.mrb[214].mxu1 }
 0x6b5   : > { %v10560_v19 = vadd.f32 %v10539_v43, %v10447_v10  ;;  %v14581_v39 = vpop.f32.mrb[215].mxu1 }
 0x6b8   : > { %v10544_v13 = vpop.f32.mrb[216].mxu1 }
 0x6b9   : > { %v14584_v32 = vpop.f32.mrb[217].mxu1 }
 0x6bc   : > { %v10548_v47 = vpop.f32.mrb[218].mxu1 }
 0x6bd   : > { %v14587_v0 = vpop.f32.mrb[219].mxu1 }
 0x6c0   : > { %v10552_v50 = vpop.f32.mrb[220].mxu1 }
 0x6c1   : > { %v14590_v59 = vpop.f32.mrb[221].mxu1  ;;  %v11216_v50 = vld [vmem:[%s18600_s5 + $0x10] sm:$0xff] }
 0x6c2   : > { %v11217_v59 = vld [vmem:[%s18600_s5 + $0x18] sm:$0xff] }
 0x6c4   : > { %v10556_v4 = vpop.f32.mrb[222].mxu1 }
 0x6c5   : > { %v10561_v21 = vadd.f32 %v10556_v4, %v10448_v23  ;;  %v14593_v53 = vpop.f32.mrb[223].mxu1 }
 0x6c6   : > { %v14769_v53 = vpack.c.bf16 %v11217_v59, %v11216_v50  ;;  %v11460_v50 = vld [vmem:[%s18603_s8] sm:$0x1] }
 0x6c8   : > { %v10652_v26 = vpop.f32.mrb[224].mxu1 }
 0x6c9   : > { %v10673_v38 = vadd.f32 %v10652_v26, %v10560_v19  ;;  %v14598_v63 = vpop.f32.mrb[225].mxu1 }
 0x6cc   : > { %v10657_v30 = vpop.f32.mrb[226].mxu1 }
 0x6cd   : > { %v14601_v41 = vpop.f32.mrb[227].mxu1 }
 0x6ce   : > { %v11292_v41 = vld [vmem:[%s18600_s5 + $0x20] sm:$0xff] }
 0x6d0   : > { %v10661_v37 = vpop.f32.mrb[228].mxu1 }
 0x6d1   : > { %v14604_v16 = vpop.f32.mrb[229].mxu1  ;;  %v11293_v37 = vld [vmem:[%s18600_s5 + $0x28] sm:$0xff] }
 0x6d4   : > { %v10665_v44 = vpop.f32.mrb[230].mxu1 }
 0x6d5   : > { %v14607_v14 = vpop.f32.mrb[231].mxu1  ;;  %v14772_v44 = vpack.c.bf16 %v11293_v37, %v11292_v41 }
 0x6d8   : > { %v10669_v1 = vpop.f32.mrb[232].mxu1 }
 0x6d9   : > { %v10674_v8 = vadd.f32 %v10669_v1, %v10561_v21  ;;  %v14610_v61 = vpop.f32.mrb[233].mxu1  ;;  %v11368_v1 = vld [vmem:[%s18600_s5 + $0x30] sm:$0xff] }
 0x6dc   : > { %v10765_v20 = vpop.f32.mrb[234].mxu1 }
 0x6dd   : > { %v10786_v60 = vadd.f32 %v10765_v20, %v10673_v38  ;;  %v14615_v3 = vpop.f32.mrb[235].mxu1 }
 0x6de   : > { %v11446_v3 = vld [vmem:[%s18602_s7 + $0x8] sm:$0xff] }
 0x6e0   : > { %v10770_v58 = vpop.f32.mrb[236].mxu1 }
 0x6e1   : > { %v14618_v12 = vpop.f32.mrb[237].mxu1 }
 0x6e4   : > { %v10774_v62 = vpop.f32.mrb[238].mxu1 }
 0x6e5   : > { %v14621_v55 = vpop.f32.mrb[239].mxu1  ;;  %v11447_v62 = vld [vmem:[%s18602_s7 + $0x10] sm:$0xff] }
 0x6e6   : > { %v11448_v55 = vld [vmem:[%s18602_s7 + $0x18] sm:$0xff] }
 0x6e8   : > { %v10778_v15 = vpop.f32.mrb[240].mxu1 }
 0x6e9   : > { %v14624_v45 = vpop.f32.mrb[241].mxu1  ;;  %v14781_v15 = vpack.c.bf16 %v11448_v55, %v11447_v62 }
 0x6ea   : > { %v11449_v45 = vld [vmem:[%s18602_s7 + $0x20] sm:$0xff] }
 0x6ec   : > { %v10782_v48 = vpop.f32.mrb[242].mxu1 }
 0x6ed   : > { %v10787_v51 = vadd.f32 %v10782_v48, %v10674_v8  ;;  %v14627_v6 = vpop.f32.mrb[243].mxu1  ;;  %v11369_v8 = vld [vmem:[%s18600_s5 + $0x38] sm:$0xff]  ;;  %v11450_v48 = vld [vmem:[%s18602_s7 + $0x28] sm:$0xff] }
 0x6ee   : > { %v14775_v61 = vpack.c.bf16 %v11369_v8, %v11368_v1  ;;  %v11451_v6 = vld [vmem:[%s18602_s7 + $0x30] sm:$0xff] }
 0x6f0   : > { %v10878_v36 = vpop.f32.mrb[244].mxu1 }
 0x6f1   : > { %v10899_v56 = vadd.f32 %v10878_v36, %v10786_v60  ;;  %v14632_v49 = vpop.f32.mrb[245].mxu1  ;;  %v11445_v60 = vld [vmem:[%s18602_s7] sm:$0xff]  ;;  %v11452_v36 = vld [vmem:[%s18602_s7 + $0x38] sm:$0xff] }
 0x6f2   : > { %v14778_v58 = vpack.c.bf16 %v11446_v3, %v11445_v60  ;;  %v11453_v49 = vld [vmem:[%s18602_s7 + $0x40] sm:$0xff] }
 0x6f4   : > { %v10883_v52 = vpop.f32.mrb[246].mxu1 }
 0x6f5   : > { %v14635_v57 = vpop.f32.mrb[247].mxu1  ;;  %v11454_v52 = vld [vmem:[%s18602_s7 + $0x48] sm:$0xff] }
 0x6f6   : > { %v11455_v57 = vld [vmem:[%s18602_s7 + $0x50] sm:$0xff] }
 0x6f8   : > { %v10887_v11 = vpop.f32.mrb[248].mxu1 }
 0x6f9   : > { %v14638_v22 = vpop.f32.mrb[249].mxu1  ;;  %v14790_v11 = vpack.c.bf16 %v11454_v52, %v11453_v49 }
 0x6fa   : > { %v11456_v22 = vld [vmem:[%s18602_s7 + $0x58] sm:$0xff] }
 0x6fc   : > { %v10891_v27 = vpop.f32.mrb[250].mxu1 }
 0x6fd   : > { %v14641_v25 = vpop.f32.mrb[251].mxu1  ;;  %v14793_v27 = vpack.c.bf16 %v11456_v22, %v11455_v57 }
 0x6fe   : > { %v11457_v25 = vld [vmem:[%s18602_s7 + $0x60] sm:$0xff] }
 0x700   : > { %v10895_v28 = vpop.f32.mrb[252].mxu1 }
 0x701   : > { %v10900_v9 = vadd.f32 %v10895_v28, %v10787_v51  ;;  %v14644_v7 = vpop.f32.mrb[253].mxu1  ;;  %v14784_v51 = vpack.c.bf16 %v11450_v48, %v11449_v45  ;;  %v11458_v28 = vld [vmem:[%s18602_s7 + $0x68] sm:$0xff] }
 0x702   : > { %v11459_v7 = vld [vmem:[%s18602_s7 + $0x70] sm:$0xff] }
 0x704   : > { %v10991_v31 = vpop.f32.mrb[254].mxu1 }
 0x705   : > { %v11012_v18 = vadd.f32 %v10991_v31, %v10899_v56  ;;  %v14649_v24 = vpop.f32.mrb[255].mxu1  ;;  %v14787_v56 = vpack.c.bf16 %v11452_v36, %v11451_v6  ;;  %v11138_v31 = vld [vmem:[%s18601_s6] sm:$0x1] }
 0x708   : > { %v10996_v10 = vpop.f32.mrb[0].mxu1 }
 0x709   : > { %v14652_v42 = vpop.f32.mrb[1].mxu1 }
 0x70a   : > { %v11536_v42 = vld [vmem:[%s18604_s9] sm:$0xff] }
 0x70c   : > { %v11000_v29 = vpop.f32.mrb[2].mxu1 }
 0x70d   : > { %v14655_v17 = vpop.f32.mrb[3].mxu1  ;;  %v11537_v29 = vld [vmem:[%s18604_s9 + $0x8] sm:$0xff] }
 0x70e   : > { %v14799_v17 = vpack.c.bf16 %v11537_v29, %v11536_v42 }
 0x710   : > { %v11004_v33 = vpop.f32.mrb[4].mxu1 }
 0x711   : > { %v14658_v34 = vpop.f32.mrb[5].mxu1  ;;  %v11538_v33 = vld [vmem:[%s18604_s9 + $0x10] sm:$0xff] }
 0x712   : > { %v11539_v34 = vld [vmem:[%s18604_s9 + $0x18] sm:$0xff] }
 0x714   : > { %v11008_v40 = vpop.f32.mrb[6].mxu1 }
 0x715   : > { %v11013_v35 = vadd.f32 %v11008_v40, %v10900_v9  ;;  %v14661_v46 = vpop.f32.mrb[7].mxu1  ;;  %v14796_v9 = vpack.c.bf16 %v11458_v28, %v11457_v25 }
 0x716   : > { %v11540_v46 = vld [vmem:[%s18604_s9 + $0x20] sm:$0xff] }
 0x718   : > { %v11104_v23 = vpop.f32.mrb[8].mxu1 }
 0x719   : > { %v11125_v43 = vadd.f32 %v11104_v23, %v11012_v18  ;;  %v14666_v19 = vpop.f32.mrb[9].mxu1  ;;  %v11541_v23 = vld [vmem:[%s18604_s9 + $0x28] sm:$0xff] }
 0x71a   : > { %v11543_v19 = vld [vmem:[%s18604_s9 + $0x38] sm:$0xff] }
 0x71b   : > { %v11134_v39 = vadd.f32 %v12477_v54, %v11125_v43  ;;  %v14805_v43 = vpack.c.bf16 %v11541_v23, %v11540_v46 }
 0x71c   : > { %v11109_v13 = vpop.f32.mrb[10].mxu1 }
 0x71d   : > { %15488 = vtanh.f32 %v11134_v39  ;;  %v14669_v32 = vpop.f32.mrb[11].mxu1  ;;  %v11544_v13 = vld [vmem:[%s18604_s9 + $0x40] sm:$0xff] }
 0x71e   : > { %v11545_v32 = vld [vmem:[%s18604_s9 + $0x48] sm:$0xff] }
 0x720   : > { %v11113_v47 = vpop.f32.mrb[12].mxu1 }
 0x721   : > { %v14672_v0 = vpop.f32.mrb[13].mxu1  ;;  %v14811_v47 = vpack.c.bf16 %v11545_v32, %v11544_v13 }
 0x722   : > { %v11546_v0 = vld [vmem:[%s18604_s9 + $0x50] sm:$0xf] }
 0x724   : > { %v11117_v4 = vpop.f32.mrb[14].mxu1 }
 0x725   : > { %v14675_v21 = vpop.f32.mrb[15].mxu1 }
 0x727   : > { %v15489_v26 = vpop.eup %15488 }
 0x728   : > { %v11121_v38 = vpop.f32.mrb[16].mxu1  ;;  %14684 = vmatmul.mubr.msk.f32.vlgmr.msra.gmra.mrb[18].mxu1 %vm11141_vm7, %v15489_v26  ;;  %v11218_v14 = vrot.slane %v15489_v26, 2 }
 0x729   : > { %v11126_v63 = vadd.f32 %v11121_v38, %v11013_v35  ;;  %14770 = vmatpush3.bf16.msra.mxu1 %v14769_v53  ;;  %v14678_v30 = vpop.f32.mrb[17].mxu1  ;;  %14690 = vmatprep.mubr.msk.f32.mxu1 %vm15562_vm3, %v15561_v5  ;;  %v14802_v35 = vpack.c.bf16 %v11539_v34, %v11538_v33 }
 0x72a   : > { %14771 = vmatprep.subr.bf16.mxu1 %v15563_v2 }
 0x72b   : > { %v11135_v16 = vadd.f32 %v12477_v54, %v11126_v63  ;;  %v11542_v54 = vld [vmem:[%s18604_s9 + $0x30] sm:$0xff] }
 0x72c   : > { %v14808_v39 = vpack.c.bf16 %v11543_v19, %v11542_v54 }
 0x72d   : > { %15490 = vtanh.f32 %v11135_v16 }
 0x730   : > { %14691 = vmatmul.mubr.msk.f32.vlgmr.msra.gmra.mrb[18].mxu1 %vm11141_vm7, %v11218_v14 }
 0x731   : > { %14773 = vmatpush3.bf16.msra.mxu1 %v14772_v44  ;;  %14697 = vmatprep.mubr.msk.f32.mxu1 %vm15562_vm3, %v15561_v5 }
 0x732   : > { %14774 = vmatprep.subr.bf16.mxu1 %v15563_v2 }
 0x737   : > { %v15491_v20 = vpop.eup %15490 }
 0x738   : > { %14698 = vmatmul.mubr.msk.f32.vlgmr.msra.gmra.mrb[18].mxu1 %vm11141_vm7, %v15491_v20  ;;  %v11370_v12 = vrot.slane %v15491_v20, 2 }
 0x739   : > { %14776 = vmatpush3.bf16.msra.mxu1 %v14775_v61  ;;  %14704 = vmatprep.mubr.msk.f32.mxu1 %vm15562_vm3, %v15561_v5 }
 0x73a   : > { %14777 = vmatprep.subr.bf16.mxu1 %v15563_v2 }
 0x740   : > { %14705 = vmatmul.mubr.msk.f32.vlgmr.msra.gmra.mrb[18].mxu1 %vm11141_vm7, %v11370_v12 }
 0x741   : > { %14779 = vmatpush3.bf16.msra.mxu1 %v14778_v58  ;;  %14737 = vmatprep.mubr.msk.f32.mxu1 %vm15562_vm3, %v15561_v5 }
 0x742   : > { %14780 = vmatprep.subr.bf16.mxu1 %v15563_v2 }
 0x745   : > { %14782 = vmatpush3.bf16.msra.mxu1 %v14781_v15 }
 0x746   : > { %14783 = vmatprep.subr.bf16.mxu1 %v15563_v2 }
 0x749   : > { %14785 = vmatpush3.bf16.msra.mxu1 %v14784_v51 }
 0x74a   : > { %14786 = vmatprep.subr.bf16.mxu1 %v15563_v2 }
 0x74d   : > { %14788 = vmatpush3.bf16.msra.mxu1 %v14787_v56 }
 0x74e   : > { %14789 = vmatprep.subr.bf16.mxu1 %v15563_v2 }
 0x751   : > { %14791 = vmatpush3.bf16.msra.mxu1 %v14790_v11 }
 0x752   : > { %14792 = vmatprep.subr.bf16.mxu1 %v15563_v2 }
 0x755   : > { %14794 = vmatpush3.bf16.msra.mxu1 %v14793_v27 }
 0x756   : > { %14795 = vmatprep.subr.bf16.mxu1 %v15563_v2 }
 0x759   : > { %14797 = vmatpush3.bf16.msra.mxu1 %v14796_v9 }
 0x75a   : > { %14735 = vmatprep.subr.mxu1 %v15561_v5 }
 0x75d   : > { %14736 = vmatpush3.msra.mxu1 %v11459_v7 }
 0x75e   : > { %14798 = vmatprep.subr.bf16.mxu1 %v15563_v2 }
 0x813   : > { %v11439_v18 = vpop.f32.mrb[18].mxu1 }
 0x814   : > { %v14839_v24 = vadd.f32 %v11439_v18, %v11138_v31  ;;  %v14706_v10 = vpop.f32.mrb[19].mxu1 }
 0x816   : > { %15492 = vtanh.f32 %v14839_v24 }
 0x820   : > { %v15493_v40 = vpop.eup %15492 }
 0x821   : > { %14738 = vmatmul.mubr.msk.f32.vlgmr.msra.gmra.mrb[20].mxu1 %vm11461_vm8, %v15493_v40 }
 0x822   : > { %14800 = vmatpush3.bf16.msra.mxu1 %v14799_v17  ;;  %14762 = vmatprep.mubr.msk.f32.mxu1 %vm15562_vm3, %v15561_v5 }
 0x823   : > { %14801 = vmatprep.subr.bf16.mxu1 %v15563_v2 }
 0x826   : > { %14803 = vmatpush3.bf16.msra.mxu1 %v14802_v35 }
 0x827   : > { %14804 = vmatprep.subr.bf16.mxu1 %v15563_v2 }
 0x82a   : > { %14806 = vmatpush3.bf16.msra.mxu1 %v14805_v43 }
 0x82b   : > { %14807 = vmatprep.subr.bf16.mxu1 %v15563_v2 }
 0x82e   : > { %14809 = vmatpush3.bf16.msra.mxu1 %v14808_v39 }
 0x82f   : > { %14810 = vmatprep.subr.bf16.mxu1 %v15563_v2 }
 0x832   : > { %14812 = vmatpush3.bf16.msra.mxu1 %v14811_v47 }
 0x833   : > { %14760 = vmatprep.subr.mxu1 %v15561_v5  ;;  %v11547_v5 = vld [vmem:[%s18605_s10] sm:$0x1] }
 0x836   : > { %14761 = vmatpush3.msk.msra.mxu1 %vm507_vm0, %v11546_v0 }
 0x8f4   : > { %v11531_v59 = vpop.f32.mrb[20].mxu1 }
 0x8f5   : > { %v11532_v4 = vadd.f32 %v11531_v59, %v11460_v50  ;;  %v14739_v21 = vpop.f32.mrb[21].mxu1 }
 0x8f7   : > { %15494 = vtanh.f32 %v11532_v4 }
 0x901   : > { %v15495_v53 = vpop.eup %15494 }
 0x902   : > { %14763 = vmatmul.mubr.msk.f32.vlgmr.msra.gmra.mrb[22].mxu1 %vm11548_vm9, %v15495_v53 }
 0x9d5   : > { %v11621_v2 = vpop.f32.mrb[22].mxu1 }
 0x9d6   : > { %v11622_v26 = vadd.f32 %v11621_v2, %v11547_v5  ;;  %v14764_v38 = vpop.f32.mrb[23].mxu1 }
 0x9d8   : > { %11626 = vst.msk [vmem:[%s378_s12] sm:$0x1] %vm11625_vm10, %v11622_v26 }
 0x9d9   : > { %15510 = shalt.err (!%p15507_p3)
}
 0x9da   : > { %s15511_s22 = scalar_lea.hbm %s18553_s15, 16  ;;  %s15515_s24 = scalar_lea.hbm %s18606_s11, 32 }
 0x9db   : > { %p15512_p4 = scmp.ne.s32.totalorder %s18553_s15, %s15511_s22  ;;  %p15516_p9 = scmp.lt.u32.totalorder %s18553_s15, %s18606_s11 }
 0x9dc   : > { %p15517_p10 = scmp.lt.u32.totalorder %s15515_s24, %s15511_s22  ;;  %p15519_p12 = scmp.lt.u32.totalorder %s15511_s22, %s18553_s15 }
 0x9dd   : > { %p15513_p7 = pnand %p15512_p4, %p15663_p5 }
 0x9de   : > { %p15518_p11 = por %p15517_p10, %p15516_p9 }
 0x9df   : > { %p15514_p8 = pneg %p15513_p7 }
 0x9e0   : > { %p15520_p13 = por %p15519_p12, %p15518_p11 }
 0x9e2   : > { %p15521_p0 = pnand %p15520_p13, %p15514_p8 }
 0x9e4   : > { %15524 = shalt.err (!%p15521_p0)
}
 0x9e5   : > { %15398 = dma.vmem_to_hbm [thread:$0]  (%p15663_p5), %s18555_s13, 16, %s18553_s15, %s11628_s16  }
 0x9e6 PF: > { %p15404_p1 = scmp.ge.s32.totalorder %s15559_s20, 2  ;;  %s11652_s0 = sand.u32 1, %s15547_s17  }
 0x9e7   : > { %s11653_s25 = scalar_lea.sflag [#allocation5], %s11652_s0 }
 0x9e8   : > { %p15401_p2 = pnand %p15404_p1, %p15667_p6 }
 0x9ea   : > { %15542 = dma.done.wait (!%p15401_p2), %s11653_s25, 16  }
 0x9eb   : > { %15544 = vsyncadd (!%p15401_p2), %s11653_s25, 4294967280  ;;  %p21_p3 = scmp.ge.s32.totalorder %s15650_s23, 4   ;;  %s18862_s17 = smov %s15551_s18 }
 0x9ec   : > { %s18863_s18 = smov %s15555_s19  ;;  %s18864_s19 = smov %s15661_s26 }
 0x9ed   : > { %s18865_s20 = smov %s15650_s23  ;;  %23 = sbr.rel (!%p21_p3) target bundleno = 5 (0x5), region = 99 }
 0x9f4   :  { %11657 = vsyncpa [#allocation5], 1 }
 0x9f5   :  { %11659 = vsyncpa [#allocation5 + $0x1], 1 }

</bundles_post_ra>
